<compile_context>
chip_gen: v7x
topology: tpu7x:2x2x1
jax: 0.10.0
libtpu: 0.0.40
codegen_flags: <defaults>
</compile_context>

<pallas_src>
import jax
import jax.numpy as jnp
from jax.experimental import pallas as pl
from jax.experimental.pallas import tpu as pltpu

HIDDEN = 210            # linear1 output
HIDDEN2 = HIDDEN // 2   # 105
QUAD = 14 * 14          # 196 features per quadrant
IN_FEATS = 784          # 28 * 28

HP = 256    # padded hidden      (210 -> 256)
H2P = 128   # padded hidden//2   (105 -> 128)
CP = 128    # padded class lanes (concat 40 -> 128, logits 10 -> 128)


def model3_kernel(x_ref, w1_ref, b1_ref, w2_ref, b2_ref, w3_ref, b3_ref,
                  w4_ref, b4_ref, out_ref):
    nc = out_ref.shape[-1]                                       # 10

    x = x_ref[...].astype(jnp.bfloat16)                          # (TB, 784), no-op if bf16 input

    # linear1 applied to all 4 quadrants at once (quadrant gather folded into w1s)
    h = jnp.dot(x, w1_ref[...], preferred_element_type=jnp.float32)
    h = jnp.maximum(h + b1_ref[...], 0.0).astype(jnp.bfloat16)   # (TB, 4*HP)

    # linear2: block-diagonal shared weights
    h = jnp.dot(h, w2_ref[...], preferred_element_type=jnp.float32)
    h = jnp.maximum(h + b2_ref[...], 0.0).astype(jnp.bfloat16)   # (TB, 4*H2P)

    # linear3: lanes [0:40) of the result are exactly concat(out1..out4)
    h = jnp.dot(h, w3_ref[...], preferred_element_type=jnp.float32)
    h = jnp.maximum(h + b3_ref[...], 0.0).astype(jnp.bfloat16)   # (TB, CP)

    # linear4 on the padded (CP, CP) weight; padded output lanes carry a -1e30
    # bias so they never win the max nor contribute to the logsumexp.
    # NOTE: this epilogue must stay f32 (see header comment).
    logits = jnp.dot(h, w4_ref[...], preferred_element_type=jnp.float32)
    logits = logits + b4_ref[...]                                # (TB, CP) f32

    # max-stabilized log_softmax over the full 128-lane vector
    m = jnp.max(logits, axis=-1, keepdims=True)
    z = logits - m
    lse = jnp.log(jnp.sum(jnp.exp(z), axis=-1, keepdims=True))
    logp = z - lse
    out_ref[...] = logp[:, :nc]


def prepare_weights(params):
    """One-time transform of the (in, out)-layout params into quadrant-folded,
    lane-padded matrices for the kernel. Matmul operands are cast to bf16
    (f32 accumulation in-kernel); biases stay f32."""
    w1, b1, w2, b2, w3, b3, w4, b4 = params
    H = w1.shape[1]    # 210
    H2 = w2.shape[1]   # 105
    C = w3.shape[1]    # 10 (num_classes)
    assert H <= HP and H2 <= H2P and 4 * C <= CP

    # flat pixel index of quadrant-local feature f, per quadrant
    # (assumes PyTorch row-major 28x28 flatten order -- matches extract_quadrants)
    f = jnp.arange(QUAD)
    rr, cc = f // 14, f % 14

    w1s = jnp.zeros((IN_FEATS, 4 * HP), jnp.float32)
    b1s = jnp.zeros((1, 4 * HP), jnp.float32)
    w2s = jnp.zeros((4 * HP, 4 * H2P), jnp.float32)
    b2s = jnp.zeros((1, 4 * H2P), jnp.float32)
    w3s = jnp.zeros((4 * H2P, CP), jnp.float32)
    b3s = jnp.zeros((1, CP), jnp.float32)
    w4s = jnp.zeros((CP, CP), jnp.float32)
    # padded logit lanes -> huge negative bias (masked for the softmax)
    b4s = jnp.full((1, CP), -1e30, jnp.float32)

    for q in range(4):                       # 0:ul 1:ur 2:dl 3:dr (torch order)
        row0, col0 = 14 * (q // 2), 14 * (q % 2)
        pix = 28 * (row0 + rr) + (col0 + cc)                     # (196,)
        blk = jnp.zeros((IN_FEATS, H), jnp.float32).at[pix, :].set(w1)
        w1s = w1s.at[:, q * HP:q * HP + H].set(blk)
        b1s = b1s.at[0, q * HP:q * HP + H].set(b1[0])
        w2s = w2s.at[q * HP:q * HP + H, q * H2P:q * H2P + H2].set(w2)
        b2s = b2s.at[0, q * H2P:q * H2P + H2].set(b2[0])
        w3s = w3s.at[q * H2P:q * H2P + H2, q * C:(q + 1) * C].set(w3)
        b3s = b3s.at[0, q * C:(q + 1) * C].set(b3[0])

    w4s = w4s.at[:4 * C, :C].set(w4)
    b4s = b4s.at[0, :C].set(b4[0])

    bf = lambda a: a.astype(jnp.bfloat16)
    return (bf(w1s), b1s, bf(w2s), b2s, bf(w3s), b3s, bf(w4s), b4s)


def _resident_spec(shape):
    """Weight block that stays in VMEM across grid steps (constant index_map).
    Single-buffered: it is DMA'd exactly once, so double-buffering only wastes
    VMEM.  Falls back gracefully if pipeline_mode is unavailable."""
    index_map = lambda i: (0, 0)
    try:
        return pl.BlockSpec(shape, index_map, pipeline_mode=pl.Buffered(1))
    except TypeError:
        return pl.BlockSpec(shape, index_map)


def model3_forward(x, packed, num_classes, *, block_batch=1024,
                   vmem_limit_bytes=48 * 1024 * 1024):
    """x: (B, 784) bf16 (preferred) or f32. packed: output of prepare_weights.

    Defaults (block_batch=1024, 48 MiB VMEM) are safe on v5e/v6e/v7x.  On v6e
    you may pass block_batch=2048, vmem_limit_bytes=64 MiB for ~5% extra; do
    NOT do that on v7x (64 MiB physical VMEM per TC)."""
    w1s, b1s, w2s, b2s, w3s, b3s, w4s, b4s = packed
    b = x.shape[0]

    tb = min(block_batch, b)
    if tb == b and b > 8:
        # keep >= 2 grid steps so dimension_semantics=("parallel",) can shard
        # the batch across both TensorCores on v7x.
        tb = pl.cdiv(b, 2)
    if tb != b and tb % 8:
        tb = ((tb + 7) // 8) * 8            # sublane-aligned batch tile
    num_tiles = pl.cdiv(b, tb)              # partial last tile: OOB reads are
                                            # per-row garbage, OOB writes dropped

    grid_spec = pltpu.PrefetchScalarGridSpec(
        num_scalar_prefetch=0,
        grid=(num_tiles,),
        in_specs=[
            pl.BlockSpec((tb, x.shape[1]), lambda i: (i, 0)),    # batch-tiled x
            _resident_spec(w1s.shape), _resident_spec(b1s.shape),
            _resident_spec(w2s.shape), _resident_spec(b2s.shape),
            _resident_spec(w3s.shape), _resident_spec(b3s.shape),
            _resident_spec(w4s.shape), _resident_spec(b4s.shape),
        ],
        out_specs=pl.BlockSpec((tb, num_classes), lambda i: (i, 0)),
    )

    return pl.pallas_call(
        model3_kernel,
        out_shape=jax.ShapeDtypeStruct((b, num_classes), jnp.float32),
        grid_spec=grid_spec,
        compiler_params=pltpu.CompilerParams(
            dimension_semantics=("parallel",),
            vmem_limit_bytes=vmem_limit_bytes),
    )(x, w1s, b1s, w2s, b2s, w3s, b3s, w4s, b4s)


def init_params(key, input_size=784, num_classes=10):
    hidden = HIDDEN
    q = input_size // 4
    ks = jax.random.split(key, 8)

    def lin(kw, kb, fan_in, fan_out):
        bound = 1.0 / jnp.sqrt(float(fan_in))
        w = jax.random.uniform(kw, (fan_in, fan_out), jnp.float32, -bound, bound)
        bb = jax.random.uniform(kb, (1, fan_out), jnp.float32, -bound, bound)
        return w, bb

    w1, b1 = lin(ks[0], ks[1], q, hidden)
    w2, b2 = lin(ks[2], ks[3], hidden, hidden // 2)
    w3, b3 = lin(ks[4], ks[5], hidden // 2, num_classes)
    w4, b4 = lin(ks[6], ks[7], 4 * num_classes, num_classes)
    return (w1, b1, w2, b2, w3, b3, w4, b4)


def extract_quadrants(x):
    """x: (B, 784) -> (4, B, 196) in order [ul, ur, dl, dr]."""
    b = x.shape[0]
    img = x.reshape(b, 28, 28)
    ul = img[:, :14, :14].reshape(b, QUAD)
    ur = img[:, :14, 14:].reshape(b, QUAD)
    dl = img[:, 14:, :14].reshape(b, QUAD)
    dr = img[:, 14:, 14:].reshape(b, QUAD)
    return jnp.stack([ul, ur, dl, dr], axis=0)


def reference_forward(x, params):
    """Pure-JAX f32 reference matching the PyTorch forward."""
    w1, b1, w2, b2, w3, b3, w4, b4 = params
    xq = extract_quadrants(x)
    outs = []
    for q in range(4):
        h = jnp.maximum(xq[q] @ w1 + b1, 0.0)
        h = jnp.maximum(h @ w2 + b2, 0.0)
        h = jnp.maximum(h @ w3 + b3, 0.0)
        outs.append(h)
    cat = jnp.concatenate(outs, axis=1)          # (B, 40)
    logits = cat @ w4 + b4
    return jax.nn.log_softmax(logits, axis=-1)


if __name__ == "__main__":
    key = jax.random.PRNGKey(0)
    k_x, k_p = jax.random.split(key)

    batch = 40            # small demo; block_batch=16 -> 3 grid steps incl. a partial tile
    input_size = 784
    num_classes = 10

    x_f32 = jax.random.normal(k_x, (batch, input_size), jnp.float32)
    # Kernel input contract: the upstream producer emits bf16 (halves the only
    # significant HBM stream); the demo rounds once at data-construction time.
    x = x_f32.astype(jnp.bfloat16)

    params = init_params(k_p, input_size, num_classes)
    packed = prepare_weights(params)

    out = model3_forward(x, packed, num_classes, block_batch=16)
    out = jax.block_until_ready(out)

    # reference in f32 on the same bf16-rounded input (isolates bf16 matmul error)
    ref = reference_forward(x.astype(jnp.float32), params)
    if not jnp.allclose(out, ref, atol=5e-2, rtol=5e-2):
        raise AssertionError("Pallas kernel output does not match JAX reference")

    print("KERNEL_OK")
</pallas_src>

<mosaic_0001>
module attributes {stable_mosaic.version = 11 : i64} {
  func.func @model3_kernel(%arg0: i32, %arg1: memref<16x784xbf16, #tpu.memory_space<vmem>>, %arg2: memref<784x1024xbf16, #tpu.memory_space<vmem>>, %arg3: memref<1x1024xf32, #tpu.memory_space<vmem>>, %arg4: memref<1024x512xbf16, #tpu.memory_space<vmem>>, %arg5: memref<1x512xf32, #tpu.memory_space<vmem>>, %arg6: memref<512x128xbf16, #tpu.memory_space<vmem>>, %arg7: memref<1x128xf32, #tpu.memory_space<vmem>>, %arg8: memref<128x128xbf16, #tpu.memory_space<vmem>>, %arg9: memref<1x128xf32, #tpu.memory_space<vmem>>, %arg10: memref<16x10xf32, #tpu.memory_space<vmem>>) attributes {dimension_semantics = [#tpu.dimension_semantics<parallel>], iteration_bounds = array<i64: 3>, scalar_prefetch = 0 : i64, scratch_operands = 0 : i64, tpu.core_type = #tpu.core_type<tc>, window_params = [{transform_indices = @transform_0, window_bounds = array<i64: 16, 784>}, {pipeline_mode = #tpu.pipeline_mode<synchronous>, transform_indices = @transform_1, window_bounds = array<i64: 784, 1024>}, {pipeline_mode = #tpu.pipeline_mode<synchronous>, transform_indices = @transform_2, window_bounds = array<i64: 1, 1024>}, {pipeline_mode = #tpu.pipeline_mode<synchronous>, transform_indices = @transform_3, window_bounds = array<i64: 1024, 512>}, {pipeline_mode = #tpu.pipeline_mode<synchronous>, transform_indices = @transform_4, window_bounds = array<i64: 1, 512>}, {pipeline_mode = #tpu.pipeline_mode<synchronous>, transform_indices = @transform_5, window_bounds = array<i64: 512, 128>}, {pipeline_mode = #tpu.pipeline_mode<synchronous>, transform_indices = @transform_6, window_bounds = array<i64: 1, 128>}, {pipeline_mode = #tpu.pipeline_mode<synchronous>, transform_indices = @transform_7, window_bounds = array<i64: 128, 128>}, {pipeline_mode = #tpu.pipeline_mode<synchronous>, transform_indices = @transform_8, window_bounds = array<i64: 1, 128>}, {transform_indices = @transform_9, window_bounds = array<i64: 16, 10>}]} {
    %c0 = arith.constant 0 : index
    %c0_0 = arith.constant 0 : index
    %0 = vector.load %arg1[%c0, %c0_0] : memref<16x784xbf16, #tpu.memory_space<vmem>>, vector<16x784xbf16>
    %c0_1 = arith.constant 0 : index
    %c0_2 = arith.constant 0 : index
    %1 = vector.load %arg2[%c0_1, %c0_2] : memref<784x1024xbf16, #tpu.memory_space<vmem>>, vector<784x1024xbf16>
    %cst = arith.constant dense<0.000000e+00> : vector<16x1024xf32>
    %2 = tpu.matmul %0, %1, %cst {dimension_numbers = #tpu.dot_dimension_numbers<[1], [0], [0], [1], [0, 0, 1, 1], [], []>} : vector<16x784xbf16>, vector<784x1024xbf16>, vector<16x1024xf32> -> vector<16x1024xf32>
    %c0_3 = arith.constant 0 : index
    %c0_4 = arith.constant 0 : index
    %3 = vector.load %arg3[%c0_3, %c0_4] : memref<1x1024xf32, #tpu.memory_space<vmem>>, vector<1x1024xf32>
    %4 = vector.broadcast %3 : vector<1x1024xf32> to vector<16x1024xf32>
    %5 = arith.addf %2, %4 : vector<16x1024xf32>
    %cst_5 = arith.constant 0.000000e+00 : f32
    %6 = vector.broadcast %cst_5 : f32 to vector<16x1024xf32>
    %7 = arith.maximumf %5, %6 : vector<16x1024xf32>
    %8 = arith.truncf %7 : vector<16x1024xf32> to vector<16x1024xbf16>
    %c0_6 = arith.constant 0 : index
    %c0_7 = arith.constant 0 : index
    %9 = vector.load %arg4[%c0_6, %c0_7] : memref<1024x512xbf16, #tpu.memory_space<vmem>>, vector<1024x512xbf16>
    %cst_8 = arith.constant dense<0.000000e+00> : vector<16x512xf32>
    %10 = tpu.matmul %8, %9, %cst_8 {dimension_numbers = #tpu.dot_dimension_numbers<[1], [0], [0], [1], [0, 0, 1, 1], [], []>} : vector<16x1024xbf16>, vector<1024x512xbf16>, vector<16x512xf32> -> vector<16x512xf32>
    %c0_9 = arith.constant 0 : index
    %c0_10 = arith.constant 0 : index
    %11 = vector.load %arg5[%c0_9, %c0_10] : memref<1x512xf32, #tpu.memory_space<vmem>>, vector<1x512xf32>
    %12 = vector.broadcast %11 : vector<1x512xf32> to vector<16x512xf32>
    %13 = arith.addf %10, %12 : vector<16x512xf32>
    %cst_11 = arith.constant 0.000000e+00 : f32
    %14 = vector.broadcast %cst_11 : f32 to vector<16x512xf32>
    %15 = arith.maximumf %13, %14 : vector<16x512xf32>
    %16 = arith.truncf %15 : vector<16x512xf32> to vector<16x512xbf16>
    %c0_12 = arith.constant 0 : index
    %c0_13 = arith.constant 0 : index
    %17 = vector.load %arg6[%c0_12, %c0_13] : memref<512x128xbf16, #tpu.memory_space<vmem>>, vector<512x128xbf16>
    %cst_14 = arith.constant dense<0.000000e+00> : vector<16x128xf32>
    %18 = tpu.matmul %16, %17, %cst_14 {dimension_numbers = #tpu.dot_dimension_numbers<[1], [0], [0], [1], [0, 0, 1, 1], [], []>} : vector<16x512xbf16>, vector<512x128xbf16>, vector<16x128xf32> -> vector<16x128xf32>
    %c0_15 = arith.constant 0 : index
    %c0_16 = arith.constant 0 : index
    %19 = vector.load %arg7[%c0_15, %c0_16] : memref<1x128xf32, #tpu.memory_space<vmem>>, vector<1x128xf32>
    %20 = vector.broadcast %19 : vector<1x128xf32> to vector<16x128xf32>
    %21 = arith.addf %18, %20 : vector<16x128xf32>
    %cst_17 = arith.constant 0.000000e+00 : f32
    %22 = vector.broadcast %cst_17 : f32 to vector<16x128xf32>
    %23 = arith.maximumf %21, %22 : vector<16x128xf32>
    %24 = arith.truncf %23 : vector<16x128xf32> to vector<16x128xbf16>
    %c0_18 = arith.constant 0 : index
    %c0_19 = arith.constant 0 : index
    %25 = vector.load %arg8[%c0_18, %c0_19] : memref<128x128xbf16, #tpu.memory_space<vmem>>, vector<128x128xbf16>
    %cst_20 = arith.constant dense<0.000000e+00> : vector<16x128xf32>
    %26 = tpu.matmul %24, %25, %cst_20 {dimension_numbers = #tpu.dot_dimension_numbers<[1], [0], [0], [1], [0, 0, 1, 1], [], []>} : vector<16x128xbf16>, vector<128x128xbf16>, vector<16x128xf32> -> vector<16x128xf32>
    %c0_21 = arith.constant 0 : index
    %c0_22 = arith.constant 0 : index
    %27 = vector.load %arg9[%c0_21, %c0_22] : memref<1x128xf32, #tpu.memory_space<vmem>>, vector<1x128xf32>
    %28 = vector.broadcast %27 : vector<1x128xf32> to vector<16x128xf32>
    %29 = arith.addf %26, %28 : vector<16x128xf32>
    %cst_23 = arith.constant dense<0xFF800000> : vector<16xf32>
    %30 = vector.multi_reduction <maximumf>, %29, %cst_23 [1] : vector<16x128xf32> to vector<16xf32>
    %31 = vector.shape_cast %30 : vector<16xf32> to vector<16x1xf32>
    %32 = vector.broadcast %31 : vector<16x1xf32> to vector<16x128xf32>
    %33 = arith.subf %29, %32 : vector<16x128xf32>
    %34 = math.exp %33 : vector<16x128xf32>
    %cst_24 = arith.constant dense<0.000000e+00> : vector<16xf32>
    %35 = vector.multi_reduction <add>, %34, %cst_24 [1] : vector<16x128xf32> to vector<16xf32>
    %36 = vector.shape_cast %35 : vector<16xf32> to vector<16x1xf32>
    %37 = math.log %36 : vector<16x1xf32>
    %38 = vector.broadcast %37 : vector<16x1xf32> to vector<16x128xf32>
    %39 = arith.subf %33, %38 : vector<16x128xf32>
    %40 = vector.extract_strided_slice %39 {offsets = [0, 0], sizes = [16, 10], strides = [1, 1]} : vector<16x128xf32> to vector<16x10xf32>
    %c0_25 = arith.constant 0 : index
    %c0_26 = arith.constant 0 : index
    %41 = vector.load %arg10[%c0_25, %c0_26] : memref<16x10xf32, #tpu.memory_space<vmem>>, vector<16x10xf32>
    tpu.vector_store %arg10[%c0_25, %c0_26], %40 {strides = array<i32>} : memref<16x10xf32, #tpu.memory_space<vmem>>, vector<16x10xf32>,
    return
  }
  func.func @transform_0(%arg0: i32) -> (i32, i32) {
    %c0_i32 = arith.constant 0 : i32
    %c0_i32_0 = arith.constant 0 : i32
    return %arg0, %c0_i32 : i32, i32
  }
  func.func @transform_1(%arg0: i32) -> (i32, i32) {
    %c0_i32 = arith.constant 0 : i32
    %c0_i32_0 = arith.constant 0 : i32
    %c0_i32_1 = arith.constant 0 : i32
    return %c0_i32, %c0_i32_0 : i32, i32
  }
  func.func @transform_2(%arg0: i32) -> (i32, i32) {
    %c0_i32 = arith.constant 0 : i32
    %c0_i32_0 = arith.constant 0 : i32
    %c0_i32_1 = arith.constant 0 : i32
    return %c0_i32, %c0_i32_0 : i32, i32
  }
  func.func @transform_3(%arg0: i32) -> (i32, i32) {
    %c0_i32 = arith.constant 0 : i32
    %c0_i32_0 = arith.constant 0 : i32
    %c0_i32_1 = arith.constant 0 : i32
    return %c0_i32, %c0_i32_0 : i32, i32
  }
  func.func @transform_4(%arg0: i32) -> (i32, i32) {
    %c0_i32 = arith.constant 0 : i32
    %c0_i32_0 = arith.constant 0 : i32
    %c0_i32_1 = arith.constant 0 : i32
    return %c0_i32, %c0_i32_0 : i32, i32
  }
  func.func @transform_5(%arg0: i32) -> (i32, i32) {
    %c0_i32 = arith.constant 0 : i32
    %c0_i32_0 = arith.constant 0 : i32
    %c0_i32_1 = arith.constant 0 : i32
    return %c0_i32, %c0_i32_0 : i32, i32
  }
  func.func @transform_6(%arg0: i32) -> (i32, i32) {
    %c0_i32 = arith.constant 0 : i32
    %c0_i32_0 = arith.constant 0 : i32
    %c0_i32_1 = arith.constant 0 : i32
    return %c0_i32, %c0_i32_0 : i32, i32
  }
  func.func @transform_7(%arg0: i32) -> (i32, i32) {
    %c0_i32 = arith.constant 0 : i32
    %c0_i32_0 = arith.constant 0 : i32
    %c0_i32_1 = arith.constant 0 : i32
    return %c0_i32, %c0_i32_0 : i32, i32
  }
  func.func @transform_8(%arg0: i32) -> (i32, i32) {
    %c0_i32 = arith.constant 0 : i32
    %c0_i32_0 = arith.constant 0 : i32
    %c0_i32_1 = arith.constant 0 : i32
    return %c0_i32, %c0_i32_0 : i32, i32
  }
  func.func @transform_9(%arg0: i32) -> (i32, i32) {
    %c0_i32 = arith.constant 0 : i32
    %c0_i32_0 = arith.constant 0 : i32
    return %arg0, %c0_i32 : i32, i32
  }
}

</mosaic_0001>

<bundles_post_ra>
// kernel: tpu_custom_call.1
= control target key start
LH: loop header
LB: loop body
LE: loop exit
PB: predicated region body
PF: predicated region fallthrough
CT: control target
= control target key end

     0   :  { %s8805_s0 = inlined_call_operand.hbm [shape: bf16[40,784], index: 0, kind: input, shape index: {}]   ;;  %s8806_s1 = inlined_call_operand.hbm [shape: bf16[784,1024], index: 1, kind: input, shape index: {}]   ;;  %s8807_s2 = inlined_call_operand.hbm [shape: f32[1,1024], index: 2, kind: input, shape index: {}]   ;;  %s8808_s3 = inlined_call_operand.hbm [shape: bf16[1024,512], index: 3, kind: input, shape index: {}]   ;;  %s8809_s4 = inlined_call_operand.hbm [shape: f32[1,512], index: 4, kind: input, shape index: {}]   ;;  %s8810_s5 = inlined_call_operand.hbm [shape: bf16[512,128], index: 5, kind: input, shape index: {}]   ;;  %s8811_s6 = inlined_call_operand.hbm [shape: f32[1,128], index: 6, kind: input, shape index: {}]   ;;  %s8812_s7 = inlined_call_operand.hbm [shape: bf16[128,128], index: 7, kind: input, shape index: {}]   ;;  %s8813_s8 = inlined_call_operand.hbm [shape: f32[1,128], index: 8, kind: input, shape index: {}]   ;;  %s8814_s9 = inlined_call_operand.vmem [shape: f32[40,10], index: 9, kind: output, shape index: {}]  }
   0x1   :  { %8824 = sst [smem:[#allocation26_spill]] %s8806_s1 }
   0x2   :  { %8825 = sst [smem:[#allocation27_spill]] %s8808_s3 }
   0x3   :  { %8826 = sst [smem:[#allocation28_spill]] %s8814_s9 }
   0x4   :  { %14 = vsyncpa [#allocation3], 0 }
   0x5   :  { %16 = vsyncpa [#allocation3 + $0x1], 0 }
   0x6   :  { %17 = vsyncpa [#allocation5], 0 }
   0x7   :  { %18 = vsyncpa [#allocation8], 0 }
   0x8   :  { %19 = vsyncpa [#allocation11], 0 }
   0x9   :  { %20 = vsyncpa [#allocation14], 0  ;;  %s8330_s30 = smov 0   ;;  %s8332_s10 = smov 0  }
   0xa   :  { %s8334_s11 = smov 0   ;;  %s8336_s12 = smov 0  }
   0xb LB: > { %s8349_s13 = sadd.s32 4294967295, %s8226_s12   ;;  %s8352_s14 = sadd.s32 1, %s8226_s12   ;;  %s8226_s12 = sphi %s8336_s12, %s8855_s12   ;;  %s8222_s11 = sphi %s8334_s11, %s8859_s11   ;;  %s8218_s10 = sphi %s8332_s10, %s8858_s10   ;;  %s8214_s30 = sphi %s8330_s30, %s8857_s30  }
   0xc   : > { %8827 = sst [smem:[#allocation22_spill]] %s8349_s13  ;;  %s30_s15 = ssub.s32 %s8226_s12, %s8352_s14 }
   0xd   : > { %8828 = sst [smem:[#allocation23_spill]] %s8352_s14  ;;  %s33_s16 = sadd.s32 1, %s8222_s11 }
   0xe   : > { %p31_p0 = scmp.eq.s32.totalorder %s30_s15, 0  ;;  %p40_p1 = scmp.ne.s32.totalorder %s8222_s11, %s8218_s10 }
   0xf   : > { %p41_p2 = scmp.eq.s32.totalorder %s8226_s12, 0  ;;  %p46_p3 = scmp.ne.s32.totalorder %s8218_s10, %s8214_s30 }
  0x10   : > { %s8362_s17 = scalar_select %p31_p0, %s8222_s11, %s33_s16  }
  0x11   : > { %p8364_p4 = por %p41_p2, %p40_p1  ;;  %p8815_p5 = scmp.eq.s32.totalorder %s8349_s13, 0 }
  0x12   : > { %8829 = sst [smem:[#allocation24_spill]] %s8362_s17  ;;  %p238_p6 = scmp.eq.s32.totalorder %s8349_s13, 2 }
  0x13   : > { %s8830_s18 = scalar_select %p8364_p4, 1, 0 }
  0x14   : > { %p6332_p7 = scmp.ge.s32.totalorder %s8226_s12, 1  ;;  %p8373_p8 = por %p8815_p5, %p46_p3 }
  0x15   : > { %p251_p9 = scmp.lt.s32.totalorder %s8226_s12, 4  ;;  %p8378_p10 = por %p238_p6, %p40_p1 }
  0x16   : > { %s8831_s19 = scalar_select %p8373_p8, 1, 0 }
  0x17   : > { %s8832_s20 = scalar_select %p8378_p10, 1, 0 }
  0x18   : > { %p8382_p11 = pnand %p6332_p7, %p251_p9  ;;  %s8260_s22 = smov [#allocation4]  }
  0x19   : > { %8833 = sst [smem:[#allocation25_spill]] %s8832_s20  ;;  %s263_s23 = sshll.u32 %s8260_s22, 4  ;;  %s264_s23 = int_to_ptr.vmem [resolvable:$true] %s263_s23 }
  0x1a   : > { %s8834_s21 = scalar_select %p8382_p11, 1, 0 }
  0x1b   : > { %p7285_p12 = pneg %p8382_p11  ;;  %s8261_s25 = smov [#allocation7]  }
  0x1c   : > { %s287_s26 = sshll.u32 %s8261_s25, 4  ;;  %s8836_s1 = sld [smem:[#allocation26_spill]]  ;;  %s8394_s26 = int_to_ptr.vmem [resolvable:$true] %s287_s26 }
  0x1d   : > { %p8390_p13 = pnand %p7285_p12, %p8815_p5 }
  0x1f   : > { %p8404_p1 = pneg %p8390_p13 }
  0x22   : > { %s7892_s29 = scalar_lea.hbm %s8836_s1, 50176 }
  0x23   : > { %p7893_p0 = scmp.ne.s32.totalorder %s8836_s1, %s7892_s29  ;;  %p7899_p6 = scmp.lt.u32.totalorder %s7892_s29, %s8836_s1 }
  0x25   : > { %p7895_p2 = pnand %p8404_p1, %p7893_p0 }
  0x27   : > { %p7896_p3 = pneg %p7895_p2 }
  0x29   : > { %p7901_p7 = pnand %p7899_p6, %p7896_p3 }
  0x2b   : > { %7904 = shalt.err (!%p7901_p7)
}
  0x2c   : > { %s7905_s27 = scalar_lea.vmem %s264_s23, 50176  ;;  %p7913_p10 = scmp.lt.s32.totalorder %s264_s23, %s264_s23 }
  0x2d   : > { %p7906_p9 = scmp.ne.s32.totalorder %s264_s23, %s7905_s27  ;;  %p7914_p8 = scmp.lt.s32.totalorder %s7905_s27, %s7905_s27 }
  0x2f   : > { %p7908_p12 = pnand %p7906_p9, %p8404_p1  ;;  %p7915_p11 = por %p7914_p8, %p7913_p10 }
  0x31   : > { %p7909_p5 = pneg %p7908_p12 }
  0x33   : > { %p7916_p4 = pnand %p7915_p11, %p7909_p5 }
  0x35   : > { %7919 = shalt.err (!%p7916_p4)
}
  0x36   : > { %s8262_s28 = smov 512   ;;  %s8263_s30 = smov 32  }
  0x37   : > { %7288 = dma.hbm_to_vmem [thread:$0]  (!%p8390_p13), %s8836_s1, 50176, %s264_s23, [#allocation5], %s8262_s28, %s8262_s28, %s8263_s30  }
  0x38   : > { %s8838_s3 = sld [smem:[#allocation27_spill]] }
  0x3e   : > { %s7920_s17 = scalar_lea.hbm %s8838_s3, 32768 }
  0x3f   : > { %p7921_p0 = scmp.ne.s32.totalorder %s8838_s3, %s7920_s17  ;;  %p7927_p8 = scmp.lt.u32.totalorder %s7920_s17, %s8838_s3 }
  0x41   : > { %p7923_p5 = pnand %p7921_p0, %p8404_p1 }
  0x43   : > { %p7924_p4 = pneg %p7923_p5 }
  0x45   : > { %p7929_p10 = pnand %p7927_p8, %p7924_p4 }
  0x47   : > { %7932 = shalt.err (!%p7929_p10)
}
  0x48   : > { %s7933_s23 = scalar_lea.vmem %s8394_s26, 32768  ;;  %p7941_p6 = scmp.lt.s32.totalorder %s8394_s26, %s8394_s26 }
  0x49   : > { %p7934_p11 = scmp.ne.s32.totalorder %s8394_s26, %s7933_s23  ;;  %p7942_p7 = scmp.lt.s32.totalorder %s7933_s23, %s7933_s23 }
  0x4b   : > { %p7936_p2 = pnand %p7934_p11, %p8404_p1  ;;  %p7943_p9 = por %p7942_p7, %p7941_p6 }
  0x4d   : > { %p7937_p3 = pneg %p7936_p2 }
  0x4f   : > { %p7944_p12 = pnand %p7943_p9, %p7937_p3 }
  0x51   : > { %7947 = shalt.err (!%p7944_p12)
}
  0x52   : > { %s8264_s9 = smov 256   ;;  %s8265_s14 = smov 16  }
  0x53   : > { %7294 = dma.hbm_to_vmem [thread:$0]  (!%p8390_p13), %s8838_s3, 32768, %s8394_s26, [#allocation8], %s8264_s9, %s8264_s9, %s8265_s14  }
  0x54   : > { %s8266_s28 = smov [#allocation10]   ;;  %s7948_s22 = scalar_lea.hbm %s8810_s5, 4096 }
  0x55   : > { %s311_s30 = sshll.u32 %s8266_s28, 4  ;;  %p7949_p0 = scmp.ne.s32.totalorder %s8810_s5, %s7948_s22  ;;  %s312_s30 = int_to_ptr.vmem [resolvable:$true] %s311_s30 }
  0x56   : > { %p7955_p8 = scmp.lt.u32.totalorder %s7948_s22, %s8810_s5 }
  0x57   : > { %p7951_p5 = pnand %p7949_p0, %p8404_p1 }
  0x59   : > { %p7952_p4 = pneg %p7951_p5 }
  0x5b   : > { %p7957_p10 = pnand %p7955_p8, %p7952_p4 }
  0x5d   : > { %7960 = shalt.err (!%p7957_p10)
}
  0x5e   : > { %s7961_s26 = scalar_lea.vmem %s312_s30, 4096  ;;  %p7969_p6 = scmp.lt.s32.totalorder %s312_s30, %s312_s30 }
  0x5f   : > { %p7962_p11 = scmp.ne.s32.totalorder %s312_s30, %s7961_s26  ;;  %p7970_p7 = scmp.lt.s32.totalorder %s7961_s26, %s7961_s26 }
  0x61   : > { %p7964_p2 = pnand %p7962_p11, %p8404_p1  ;;  %p7971_p9 = por %p7970_p7, %p7969_p6 }
  0x63   : > { %p7965_p3 = pneg %p7964_p2 }
  0x65   : > { %p7972_p12 = pnand %p7971_p9, %p7965_p3 }
  0x67   : > { %7975 = shalt.err (!%p7972_p12)
}
  0x68   : > { %s8267_s9 = smov 64   ;;  %s8268_s14 = smov 4  }
  0x69   : > { %7300 = dma.hbm_to_vmem [thread:$0]  (!%p8390_p13), %s8810_s5, 4096, %s312_s30, [#allocation11], %s8267_s9, %s8267_s9, %s8268_s14  }
  0x6a   : > { %s8269_s20 = smov [#allocation13]   ;;  %s8270_s15 = smov [#allocation6]  }
  0x6b   : > { %s335_s28 = sshll.u32 %s8269_s20, 4  ;;  %s277_s29 = sshll.u32 %s8270_s15, 4  ;;  %s336_s28 = int_to_ptr.vmem [resolvable:$true] %s335_s28  ;;  %s278_s29 = int_to_ptr.vmem [resolvable:$true] %s277_s29 }
  0x6c   : > { %s7976_s27 = scalar_lea.hbm %s8812_s7, 1024 }
  0x6d   : > { %p7977_p0 = scmp.ne.s32.totalorder %s8812_s7, %s7976_s27  ;;  %p7983_p8 = scmp.lt.u32.totalorder %s7976_s27, %s8812_s7 }
  0x6f   : > { %p7979_p5 = pnand %p7977_p0, %p8404_p1 }
  0x71   : > { %p7980_p4 = pneg %p7979_p5 }
  0x73   : > { %p7985_p10 = pnand %p7983_p8, %p7980_p4 }
  0x75   : > { %7988 = shalt.err (!%p7985_p10)
}
  0x76   : > { %s7989_s30 = scalar_lea.vmem %s336_s28, 1024  ;;  %p7997_p6 = scmp.lt.s32.totalorder %s336_s28, %s336_s28 }
  0x77   : > { %p7990_p11 = scmp.ne.s32.totalorder %s336_s28, %s7989_s30  ;;  %p7998_p7 = scmp.lt.s32.totalorder %s7989_s30, %s7989_s30 }
  0x79   : > { %p7992_p2 = pnand %p7990_p11, %p8404_p1  ;;  %p7999_p9 = por %p7998_p7, %p7997_p6 }
  0x7b   : > { %p7993_p3 = pneg %p7992_p2 }
  0x7d   : > { %p8000_p12 = pnand %p7999_p9, %p7993_p3 }
  0x7f   : > { %8003 = shalt.err (!%p8000_p12)
}
  0x80   : > { %7306 = dma.hbm_to_vmem [thread:$0]  (!%p8390_p13), %s8812_s7, 1024, %s336_s28, [#allocation14], %s8267_s9, %s8267_s9, %s8268_s14  }
  0x81   : > { %s8004_s20 = scalar_lea.hbm %s8807_s2, 128 }
  0x82   : > { %p8005_p0 = scmp.ne.s32.totalorder %s8807_s2, %s8004_s20  ;;  %p8011_p8 = scmp.lt.u32.totalorder %s8004_s20, %s8807_s2 }
  0x84   : > { %p8007_p5 = pnand %p8005_p0, %p8404_p1 }
  0x86   : > { %p8008_p4 = pneg %p8007_p5 }
  0x88   : > { %p8013_p10 = pnand %p8011_p8, %p8008_p4 }
  0x8a   : > { %8016 = shalt.err (!%p8013_p10)
}
  0x8b   : > { %s8017_s23 = scalar_lea.vmem %s278_s29, 128  ;;  %p8025_p6 = scmp.lt.s32.totalorder %s278_s29, %s278_s29 }
  0x8c   : > { %p8018_p11 = scmp.ne.s32.totalorder %s278_s29, %s8017_s23  ;;  %p8026_p7 = scmp.lt.s32.totalorder %s8017_s23, %s8017_s23 }
  0x8e   : > { %p8020_p2 = pnand %p8018_p11, %p8404_p1  ;;  %p8027_p9 = por %p8026_p7, %p8025_p6 }
  0x90   : > { %p8021_p3 = pneg %p8020_p2 }
  0x92   : > { %p8028_p12 = pnand %p8027_p9, %p8021_p3 }
  0x94   : > { %8031 = shalt.err (!%p8028_p12)
}
  0x95   : > { %7291 = dma.hbm_to_vmem [thread:$0]  (!%p8390_p13), %s8807_s2, 128, %s278_s29, [#allocation5]  }
  0x96   : > { %s8271_s28 = smov [#allocation9]   ;;  %s8272_s30 = smov [#allocation12]  }
  0x97   : > { %s301_s26 = sshll.u32 %s8271_s28, 4  ;;  %s325_s1 = sshll.u32 %s8272_s30, 4  ;;  %s302_s26 = int_to_ptr.vmem [resolvable:$true] %s301_s26  ;;  %s326_s1 = int_to_ptr.vmem [resolvable:$true] %s325_s1 }
  0x98   : > { %s8032_s13 = scalar_lea.hbm %s8809_s4, 64 }
  0x99   : > { %p8033_p0 = scmp.ne.s32.totalorder %s8809_s4, %s8032_s13  ;;  %p8039_p8 = scmp.lt.u32.totalorder %s8032_s13, %s8809_s4 }
  0x9b   : > { %p8035_p5 = pnand %p8033_p0, %p8404_p1 }
  0x9d   : > { %p8036_p4 = pneg %p8035_p5 }
  0x9f   : > { %p8041_p10 = pnand %p8039_p8, %p8036_p4 }
  0xa1   : > { %8044 = shalt.err (!%p8041_p10)
}
  0xa2   : > { %s8045_s29 = scalar_lea.vmem %s302_s26, 64  ;;  %p8053_p6 = scmp.lt.s32.totalorder %s302_s26, %s302_s26 }
  0xa3   : > { %p8046_p11 = scmp.ne.s32.totalorder %s302_s26, %s8045_s29  ;;  %p8054_p7 = scmp.lt.s32.totalorder %s8045_s29, %s8045_s29 }
  0xa5   : > { %p8048_p2 = pnand %p8046_p11, %p8404_p1  ;;  %p8055_p9 = por %p8054_p7, %p8053_p6 }
  0xa7   : > { %p8049_p3 = pneg %p8048_p2 }
  0xa9   : > { %p8056_p12 = pnand %p8055_p9, %p8049_p3 }
  0xab   : > { %8059 = shalt.err (!%p8056_p12)
}
  0xac   : > { %7297 = dma.hbm_to_vmem [thread:$0]  (!%p8390_p13), %s8809_s4, 64, %s302_s26, [#allocation8]  }
  0xad   : > { %s8060_s28 = scalar_lea.hbm %s8811_s6, 16 }
  0xae   : > { %p8061_p0 = scmp.ne.s32.totalorder %s8811_s6, %s8060_s28  ;;  %p8067_p8 = scmp.lt.u32.totalorder %s8060_s28, %s8811_s6 }
  0xb0   : > { %p8063_p5 = pnand %p8061_p0, %p8404_p1 }
  0xb2   : > { %p8064_p4 = pneg %p8063_p5 }
  0xb4   : > { %p8069_p10 = pnand %p8067_p8, %p8064_p4 }
  0xb6   : > { %8072 = shalt.err (!%p8069_p10)
}
  0xb7   : > { %s8073_s20 = scalar_lea.vmem %s326_s1, 16  ;;  %s8080_s26 = scalar_lea.vmem %s326_s1, 32 }
  0xb8   : > { %p8074_p11 = scmp.ne.s32.totalorder %s326_s1, %s8073_s20  ;;  %p8081_p6 = scmp.lt.s32.totalorder %s326_s1, %s326_s1 }
  0xb9   : > { %p8082_p7 = scmp.lt.s32.totalorder %s8080_s26, %s8073_s20 }
  0xba   : > { %p8076_p2 = pnand %p8074_p11, %p8404_p1 }
  0xbb   : > { %p8083_p9 = por %p8082_p7, %p8081_p6 }
  0xbc   : > { %p8077_p3 = pneg %p8076_p2 }
  0xbe   : > { %p8084_p12 = pnand %p8083_p9, %p8077_p3 }
  0xc0   : > { %8087 = shalt.err (!%p8084_p12)
}
  0xc1   : > { %7303 = dma.hbm_to_vmem [thread:$0]  (!%p8390_p13), %s8811_s6, 16, %s326_s1, [#allocation11]  }
  0xc2   : > { %s8273_s25 = smov [#allocation15]   ;;  %s8088_s9 = scalar_lea.hbm %s8813_s8, 16 }
  0xc3   : > { %s349_s29 = sshll.u32 %s8273_s25, 4  ;;  %p8089_p0 = scmp.ne.s32.totalorder %s8813_s8, %s8088_s9  ;;  %s350_s29 = int_to_ptr.vmem [resolvable:$true] %s349_s29 }
  0xc4   : > { %p8095_p8 = scmp.lt.u32.totalorder %s8088_s9, %s8813_s8 }
  0xc5   : > { %p8091_p5 = pnand %p8089_p0, %p8404_p1 }
  0xc7   : > { %p8092_p4 = pneg %p8091_p5 }
  0xc9   : > { %p8097_p10 = pnand %p8095_p8, %p8092_p4 }
  0xcb   : > { %8100 = shalt.err (!%p8097_p10)
}
  0xcc   : > { %s8101_s1 = scalar_lea.vmem %s350_s29, 16  ;;  %s8108_s3 = scalar_lea.vmem %s350_s29, 32 }
  0xcd   : > { %p8102_p11 = scmp.ne.s32.totalorder %s350_s29, %s8101_s1  ;;  %p8109_p6 = scmp.lt.s32.totalorder %s350_s29, %s350_s29 }
  0xce   : > { %p8110_p7 = scmp.lt.s32.totalorder %s8108_s3, %s8101_s1 }
  0xcf   : > { %p8104_p2 = pnand %p8102_p11, %p8404_p1 }
  0xd0   : > { %p8111_p9 = por %p8110_p7, %p8109_p6 }
  0xd1   : > { %p8105_p3 = pneg %p8104_p2 }
  0xd3   : > { %p8112_p12 = pnand %p8111_p9, %p8105_p3 }
  0xd5   : > { %8115 = shalt.err (!%p8112_p12)
}
  0xd6   : > { %7309 = dma.hbm_to_vmem [thread:$0]  (!%p8390_p13), %s8813_s8, 16, %s350_s29, [#allocation14]  }
  0xd7   : > { %p6341_p0 = scmp.ge.s32.totalorder %s8226_s12, 3 }
  0xd8   : > { %p8839_p5 = scmp.ne.s32.totalorder (!%p6341_p0), %s8830_s18, 0 }
  0xd9   : > { %356 = sbr.rel (%p6341_p0) target bundleno = 260 (0x104), region = 48 }
  0xe0   : > { %359 = sbr.rel (!%p8839_p5) target bundleno = 260 (0x104), region = 52  ;;  %s360_s16 = sand.u32 (%p8839_p5), 1, %s8222_s11  }
  0xe1   : > { %s6342_s26 = sshll.u32 (%p8839_p5), %s8226_s12, 1  ;;  %s7249_s15 = smul.u32 (%p8839_p5), 56, %s360_s16 }
  0xe2   : > { %s366_s22 = ssub.s32 (%p8839_p5), 5, %s6342_s26  ;;  %s8559_s27 = scalar_lea.sflag (%p8839_p5), [#allocation3], %s360_s16 }
  0xe3   : > { %p367_p1 = scmp.lt.s32.totalorder (%p8839_p5), %s366_s22, 2  ;;  %s364_s29 = scalar_lea.vmem (%p8839_p5), [#allocation2], %s7249_s15 }
  0xe7   : > { %s8861_s22 = smov (!%p367_p1, %s366_s22), 2 }
  0xe8   : > { %s8556_s25 = smul.u32 448, %s8861_s22 }
  0xea   : > { %s372_s24 = ssub.s32 896, %s8556_s25 }
  0xeb   : > { %373 = vsyncadd %s8559_s27, %s372_s24  ;;  %p6345_p13 = scmp.ne.s32.totalorder %s8556_s25, 0  ;;  %s7250_s18 = smul.u32 896, %s8226_s12 }
  0xec   : > { %s379_s23 = sshll.u32 %s364_s29, 4  ;;  %s8120_s12 = scalar_lea.hbm %s8805_s0, 2240  ;;  %s8569_s23 = int_to_ptr.vmem [resolvable:$true] %s379_s23 }
  0xed   : > { %s8567_s28 = scalar_lea.hbm %s8805_s0, %s7250_s18 }
  0xee   : > { %s8116_s30 = scalar_lea.hbm %s8567_s28, %s8556_s25  ;;  %p8121_p11 = scmp.lt.u32.totalorder %s8567_s28, %s8805_s0 }
  0xef   : > { %p8117_p4 = scmp.ne.s32.totalorder %s8567_s28, %s8116_s30  ;;  %p8122_p2 = scmp.lt.u32.totalorder %s8120_s12, %s8116_s30 }
  0xf0   : > { %p8124_p6 = scmp.lt.u32.totalorder %s8116_s30, %s8567_s28 }
  0xf1   : > { %p8118_p8 = pnand %p8117_p4, %p6345_p13  ;;  %p8123_p3 = por %p8122_p2, %p8121_p11 }
  0xf3   : > { %p8119_p10 = pneg %p8118_p8  ;;  %p8125_p7 = por %p8124_p6, %p8123_p3 }
  0xf5   : > { %p8126_p9 = pnand %p8125_p7, %p8119_p10 }
  0xf7   : > { %8129 = shalt.err (!%p8126_p9)
}
  0xf8   : > { %s8130_s20 = scalar_lea.vmem %s8569_s23, %s8556_s25  ;;  %s8274_s16 = smov [#allocation2]  }
  0xf9   : > { %p8131_p12 = scmp.ne.s32.totalorder %s8569_s23, %s8130_s20  ;;  %s8134_s26 = sshll.u32 %s8274_s16, 4  ;;  %s8135_s26 = int_to_ptr.vmem [resolvable:$false] %s8134_s26 }
  0xfa   : > { %s8136_s15 = scalar_lea.vmem %s8135_s26, 1792  ;;  %p8137_p1 = scmp.lt.s32.totalorder %s8569_s23, %s8135_s26 }
  0xfb   : > { %p8132_p0 = pnand %p8131_p12, %p6345_p13  ;;  %p8138_p4 = scmp.lt.s32.totalorder %s8136_s15, %s8130_s20 }
  0xfd   : > { %p8133_p5 = pneg %p8132_p0  ;;  %p8139_p8 = por %p8138_p4, %p8137_p1 }
  0xff   : > { %p8140_p11 = pnand %p8139_p8, %p8133_p5 }
 0x101   : > { %8143 = shalt.err (!%p8140_p11)
}
 0x102   : > { %s8275_s22 = smov 448   ;;  %s8276_s24 = smov 28  }
 0x103   : > { %385 = dma.hbm_to_vmem [thread:$0]  (%p6345_p13), %s8567_s28, %s8556_s25, %s8569_s23, %s8559_s27, %s8275_s22, %s8275_s22, %s8276_s24  }
 0x104 PF: > { %p8840_p10 = scmp.ne.s32.totalorder %s8834_s21, 0 }
 0x105   : > { %s8599_s29 = sand.u32 (!%p8840_p10), 1, %s8218_s10   ;;  %p8841_p2 = scmp.ne.s32.totalorder (!%p8840_p10), %s8831_s19, 0 }
 0x106   : > { %391 = sbr.rel (%p8840_p10) target bundleno = 1998 (0x7ce), region = 56  ;;  %s394_s9 = scalar_lea.sflag (!%p8840_p10), [#allocation3], %s8599_s29 }
 0x107   : > { %s7251_s18 = smul.u32 (!%p8840_p10), 56, %s8599_s29 }
 0x109   : > { %s8603_s14 = scalar_lea.vmem (!%p8840_p10), [#allocation2], %s7251_s18 }
 0x10d   : > { %8193 = dma.done.wait (%p8841_p2), %s394_s9, 896  }
 0x10e   : > { %8195 = vsyncadd (%p8841_p2), %s394_s9, 4294966400  ;;  %s8842_s25 = sld [smem:[#allocation22_spill]] }
 0x114   : > { %p8843_p13 = scmp.eq.s32.totalorder %s8842_s25, 0 }
 0x116   : > { %8197 = dma.done.wait (%p8843_p13), [#allocation5], 50304   ;;  %p8844_p3 = pmov %p8843_p13 }
 0x118   : > { %8199 = vsyncadd (%p8844_p3), [#allocation5], 4294916992  ;;  %p8845_p6 = pmov %p8844_p3 }
 0x119   : > { %p8846_p7 = pmov %p8844_p3 }
 0x11a   : > { %8201 = dma.done.wait (%p8845_p6), [#allocation8], 32832  }
 0x11b   : > { %8203 = vsyncadd (%p8846_p7), [#allocation8], 4294934464  ;;  %p8847_p9 = pmov %p8844_p3 }
 0x11c   : > { %p8848_p12 = pmov %p8844_p3 }
 0x11d   : > { %8205 = dma.done.wait (%p8847_p9), [#allocation11], 4112  }
 0x11e   : > { %8207 = vsyncadd (%p8848_p12), [#allocation11], 4294963184  ;;  %p8849_p0 = pmov %p8844_p3 }
 0x120   : > { %8209 = dma.done.wait (%p8849_p0), [#allocation14], 1040   ;;  %p8850_p5 = pmov %p8849_p0 }
 0x121   : > { %v8277_v0 = vmov 0   ;;  %v483_v1 = vld [vmem:[#allocation4] sm:$0xff]  ;;  %v484_v13 = vld [vmem:[#allocation4 + $0x8] sm:$0xff]  ;;  %vm2912_vm0 = vcmask 130048   ;;  %vm8279_vm1 = vmmov 0   ;;  %s6358_s19 = sshll.u32 %s8599_s29, 4 }
 0x122   : > { %8211 = vsyncadd (%p8850_p5), [#allocation14], 4294966256  ;;  %3077 = vmatprep.mubr.bf16.mxu1 %v8277_v0  ;;  %v487_v2 = vld [vmem:[#allocation4 + $0x20] sm:$0xff]  ;;  %v488_v14 = vld [vmem:[#allocation4 + $0x28] sm:$0xff]  ;;  %vm6022_vm2 = vcmask 80896   ;;  %s8757_s21 = scalar_lea.vmem [#allocation16], %s6358_s19  }
 0x123   : > { %v867_v3 = vld [vmem:[#allocation4 + $0xc00] sm:$0xff]  ;;  %v6367_v4 = vcombine.high %v483_v1, %v487_v2  ;;  %v6366_v6 = vcombine.low %v483_v1, %v487_v2  ;;  %v6369_v16 = vcombine.high %v484_v13, %v488_v14  ;;  %v492_v19 = vld [vmem:[#allocation4 + $0x48] sm:$0xff]  ;;  %v6368_v21 = vcombine.low %v484_v13, %v488_v14  ;;  %s8851_s27 = sld [smem:[#allocation25_spill]] }
 0x124   : > { %v871_v5 = vld [vmem:[#allocation4 + $0xc20] sm:$0xff]  ;;  %v496_v20 = vld [vmem:[#allocation4 + $0x68] sm:$0xff] }
 0x125   : > { %v491_v7 = vld [vmem:[#allocation4 + $0x40] sm:$0xff]  ;;  %v6751_v9 = vcombine.high %v867_v3, %v871_v5  ;;  %v6750_v10 = vcombine.low %v867_v3, %v871_v5  ;;  %2916 = vmatprep.subr.bf16.mxu0 %v6367_v4  ;;  %v6377_v23 = vcombine.high %v492_v19, %v496_v20  ;;  %v500_v26 = vld [vmem:[#allocation4 + $0x88] sm:$0xff]  ;;  %v6376_v29 = vcombine.low %v492_v19, %v496_v20 }
 0x126   : > { %v495_v8 = vld [vmem:[#allocation4 + $0x60] sm:$0xff]  ;;  %2917 = vmatpush1.bf16.msra.mxu0 %v6366_v6  ;;  %v504_v27 = vld [vmem:[#allocation4 + $0xa8] sm:$0xff] }
 0x127   : > { %v6375_v11 = vcombine.high %v491_v7, %v495_v8  ;;  %v7441_v12 = vld [vmem:[%s8603_s14 + $0x18] ss:$28 sps:$4 sm:$0xff]   ;;  %3045 = vmatprep.subr.bf16.mxu1 %v6751_v9  ;;  %v6374_v17 = vcombine.low %v491_v7, %v495_v8  ;;  %v6385_v31 = vcombine.high %v500_v26, %v504_v27  ;;  %v6384_v37 = vcombine.low %v500_v26, %v504_v27  ;;  %v7442_v60 = vld [vmem:[%s8603_s14 + $0x4] ss:$28 sps:$4 sm:$0xff]  }
 0x128   : > { %v499_v15 = vld [vmem:[#allocation4 + $0x80] sm:$0xff]  ;;  %3046 = vmatpush1.bf16.msra.mxu1 %v6750_v10  ;;  %v508_v34 = vld [vmem:[#allocation4 + $0xc8] sm:$0xff]  ;;  %2948 = vmatprep.mubr.bf16.mxu0 %v7442_v60 }
 0x129   : > { %v503_v18 = vld [vmem:[#allocation4 + $0xa0] sm:$0xff]  ;;  %2918 = vmatprep.subr.bf16.mxu0 %v6375_v11  ;;  %3088 = vmatprep.subr.bf16.mxu1 %v6369_v16  ;;  %v512_v35 = vld [vmem:[#allocation4 + $0xe8] sm:$0xff]  ;;  %p8852_p1 = scmp.ne.s32.totalorder %s8851_s27, 0 }
 0x12a   : > { %v6383_v22 = vcombine.high %v499_v15, %v503_v18  ;;  %v507_v24 = vld [vmem:[#allocation4 + $0xc0] sm:$0xff]  ;;  %2919 = vmatpush1.bf16.msra.mxu0 %v6374_v17  ;;  %v6382_v28 = vcombine.low %v499_v15, %v503_v18  ;;  %v6393_v39 = vcombine.high %v508_v34, %v512_v35  ;;  %v516_v42 = vld [vmem:[#allocation4 + $0x108] sm:$0xff]  ;;  %v6392_v45 = vcombine.low %v508_v34, %v512_v35  ;;  %s8853_s23 = sld [smem:[#allocation22_spill]] (%p8852_p1)  ;;  %s8854_s3 = sld [smem:[#allocation28_spill]] (%p8852_p1) }
 0x12b   : > { %v511_v25 = vld [vmem:[#allocation4 + $0xe0] sm:$0xff]  ;;  %6758 = vmatmul.mubr.msk.bf16.vlgmr.msra.gmra.mrb[0].mxu1 %vm2912_vm0, %v7441_v12  ;;  %v520_v43 = vld [vmem:[#allocation4 + $0x128] sm:$0xff] }
 0x12c   : > { %3089 = vmatpush1.bf16.msra.mxu1 %v6368_v21  ;;  %2920 = vmatprep.subr.bf16.mxu0 %v6383_v22  ;;  %v6391_v30 = vcombine.high %v507_v24, %v511_v25  ;;  %v515_v32 = vld [vmem:[#allocation4 + $0x100] sm:$0xff]  ;;  %v6390_v36 = vcombine.low %v507_v24, %v511_v25  ;;  %v6401_v47 = vcombine.high %v516_v42, %v520_v43  ;;  %v524_v50 = vld [vmem:[#allocation4 + $0x148] sm:$0xff] }
 0x12d   : > { %3090 = vmatprep.subr.bf16.mxu1 %v6377_v23  ;;  %v519_v33 = vld [vmem:[#allocation4 + $0x120] sm:$0xff]  ;;  %v528_v51 = vld [vmem:[#allocation4 + $0x168] sm:$0xff]  ;;  %v6400_v53 = vcombine.low %v516_v42, %v520_v43  ;;  %3120 = vmatprep.mubr.bf16.mxu1 %v7442_v60 }
 0x12e   : > { %2921 = vmatpush1.bf16.msra.mxu0 %v6382_v28  ;;  %v6399_v38 = vcombine.high %v515_v32, %v519_v33  ;;  %v523_v40 = vld [vmem:[#allocation4 + $0x140] sm:$0xff]  ;;  %v6398_v44 = vcombine.low %v515_v32, %v519_v33  ;;  %v6409_v56 = vcombine.high %v524_v50, %v528_v51  ;;  %v532_v58 = vld [vmem:[#allocation4 + $0x188] sm:$0xff]  ;;  %v6408_v62 = vcombine.low %v524_v50, %v528_v51 }
 0x12f   : > { %2922 = vmatprep.subr.bf16.mxu0 %v6391_v30  ;;  %v527_v41 = vld [vmem:[#allocation4 + $0x160] sm:$0xff]  ;;  %v536_v59 = vld [vmem:[#allocation4 + $0x1a8] sm:$0xff] }
 0x130   : > { %3091 = vmatpush1.bf16.msra.mxu1 %v6376_v29  ;;  %v6407_v46 = vcombine.high %v523_v40, %v527_v41  ;;  %v531_v48 = vld [vmem:[#allocation4 + $0x180] sm:$0xff]  ;;  %v6406_v52 = vcombine.low %v523_v40, %v527_v41  ;;  %v6417_v1 = vcombine.high %v532_v58, %v536_v59  ;;  %v540_v4 = vld [vmem:[#allocation4 + $0x1c8] sm:$0xff]  ;;  %v6416_v7 = vcombine.low %v532_v58, %v536_v59  ;;  %s7061_s28 = sshll.u32 (%p8852_p1), %s8853_s23, 1  ;;  %s7077_s30 = sshll.u32 (%p8852_p1), %s8853_s23, 4 }
 0x131   : > { %3092 = vmatprep.subr.bf16.mxu1 %v6385_v31  ;;  %v535_v49 = vld [vmem:[#allocation4 + $0x1a0] sm:$0xff]  ;;  %v544_v5 = vld [vmem:[#allocation4 + $0x1e8] sm:$0xff]  ;;  %s6033_s17 = ssub.s32 (%p8852_p1), 5, %s7061_s28  ;;  %s8768_s13 = scalar_lea.vmem (%p8852_p1), %s8854_s3, %s7077_s30  }
 0x132   : > { %2923 = vmatpush1.bf16.msra.mxu0 %v6390_v36  ;;  %v6415_v54 = vcombine.high %v531_v48, %v535_v49  ;;  %v539_v55 = vld [vmem:[#allocation4 + $0x1c0] sm:$0xff]  ;;  %v6414_v61 = vcombine.low %v531_v48, %v535_v49  ;;  %v6425_v9 = vcombine.high %v540_v4, %v544_v5  ;;  %v548_v12 = vld [vmem:[#allocation4 + $0x208] sm:$0xff]  ;;  %v6424_v15 = vcombine.low %v540_v4, %v544_v5  ;;  %p6034_p4 = scmp.lt.s32.totalorder (%p8852_p1), %s6033_s17, 2 }
 0x133   : > { %2924 = vmatprep.subr.bf16.mxu0 %v6399_v38  ;;  %v543_v57 = vld [vmem:[#allocation4 + $0x1e0] sm:$0xff]  ;;  %v552_v13 = vld [vmem:[#allocation4 + $0x228] sm:$0xff] }
 0x134   : > { %3093 = vmatpush1.bf16.msra.mxu1 %v6384_v37  ;;  %v6423_v63 = vcombine.high %v539_v55, %v543_v57  ;;  %v547_v2 = vld [vmem:[#allocation4 + $0x200] sm:$0xff]  ;;  %v6422_v6 = vcombine.low %v539_v55, %v543_v57  ;;  %v6433_v17 = vcombine.high %v548_v12, %v552_v13  ;;  %v556_v20 = vld [vmem:[#allocation4 + $0x248] sm:$0xff]  ;;  %v6432_v23 = vcombine.low %v548_v12, %v552_v13 }
 0x135   : > { %3094 = vmatprep.subr.bf16.mxu1 %v6393_v39  ;;  %v551_v3 = vld [vmem:[#allocation4 + $0x220] sm:$0xff]  ;;  %v560_v21 = vld [vmem:[#allocation4 + $0x268] sm:$0xff] }
 0x136   : > { %2925 = vmatpush1.bf16.msra.mxu0 %v6398_v44  ;;  %v6431_v8 = vcombine.high %v547_v2, %v551_v3  ;;  %v555_v10 = vld [vmem:[#allocation4 + $0x240] sm:$0xff]  ;;  %v6430_v14 = vcombine.low %v547_v2, %v551_v3  ;;  %v6441_v25 = vcombine.high %v556_v20, %v560_v21  ;;  %v564_v28 = vld [vmem:[#allocation4 + $0x288] sm:$0xff]  ;;  %v6440_v31 = vcombine.low %v556_v20, %v560_v21 }
 0x137   : > { %2926 = vmatprep.subr.bf16.mxu0 %v6407_v46  ;;  %v559_v11 = vld [vmem:[#allocation4 + $0x260] sm:$0xff]  ;;  %v568_v29 = vld [vmem:[#allocation4 + $0x2a8] sm:$0xff] }
 0x138   : > { %3095 = vmatpush1.bf16.msra.mxu1 %v6392_v45  ;;  %v6439_v16 = vcombine.high %v555_v10, %v559_v11  ;;  %v563_v18 = vld [vmem:[#allocation4 + $0x280] sm:$0xff]  ;;  %v6438_v22 = vcombine.low %v555_v10, %v559_v11  ;;  %v6449_v33 = vcombine.high %v564_v28, %v568_v29  ;;  %v572_v36 = vld [vmem:[#allocation4 + $0x2c8] sm:$0xff]  ;;  %v6448_v39 = vcombine.low %v564_v28, %v568_v29 }
 0x139   : > { %3096 = vmatprep.subr.bf16.mxu1 %v6401_v47  ;;  %v567_v19 = vld [vmem:[#allocation4 + $0x2a0] sm:$0xff]  ;;  %v576_v37 = vld [vmem:[#allocation4 + $0x2e8] sm:$0xff] }
 0x13a   : > { %2927 = vmatpush1.bf16.msra.mxu0 %v6406_v52  ;;  %v6447_v24 = vcombine.high %v563_v18, %v567_v19  ;;  %v571_v26 = vld [vmem:[#allocation4 + $0x2c0] sm:$0xff]  ;;  %v6446_v30 = vcombine.low %v563_v18, %v567_v19  ;;  %v6457_v41 = vcombine.high %v572_v36, %v576_v37  ;;  %v580_v44 = vld [vmem:[#allocation4 + $0x308] sm:$0xff]  ;;  %v6456_v47 = vcombine.low %v572_v36, %v576_v37 }
 0x13b   : > { %2928 = vmatprep.subr.bf16.mxu0 %v6415_v54  ;;  %v575_v27 = vld [vmem:[#allocation4 + $0x2e0] sm:$0xff]  ;;  %v584_v45 = vld [vmem:[#allocation4 + $0x328] sm:$0xff] }
 0x13c   : > { %3097 = vmatpush1.bf16.msra.mxu1 %v6400_v53  ;;  %v6455_v32 = vcombine.high %v571_v26, %v575_v27  ;;  %v579_v34 = vld [vmem:[#allocation4 + $0x300] sm:$0xff]  ;;  %v6454_v38 = vcombine.low %v571_v26, %v575_v27  ;;  %v6465_v49 = vcombine.high %v580_v44, %v584_v45  ;;  %v588_v52 = vld [vmem:[#allocation4 + $0x348] sm:$0xff]  ;;  %v6464_v55 = vcombine.low %v580_v44, %v584_v45 }
 0x13d   : > { %3098 = vmatprep.subr.bf16.mxu1 %v6409_v56  ;;  %v583_v35 = vld [vmem:[#allocation4 + $0x320] sm:$0xff]  ;;  %v592_v53 = vld [vmem:[#allocation4 + $0x368] sm:$0xff] }
 0x13e   : > { %2929 = vmatpush1.bf16.msra.mxu0 %v6414_v61  ;;  %v6463_v40 = vcombine.high %v579_v34, %v583_v35  ;;  %v587_v42 = vld [vmem:[#allocation4 + $0x340] sm:$0xff]  ;;  %v6462_v46 = vcombine.low %v579_v34, %v583_v35  ;;  %v6473_v57 = vcombine.high %v588_v52, %v592_v53  ;;  %v596_v60 = vld [vmem:[#allocation4 + $0x388] sm:$0xff] }
 0x13f   : > { %2930 = vmatprep.subr.bf16.mxu0 %v6423_v63  ;;  %v591_v43 = vld [vmem:[#allocation4 + $0x360] sm:$0xff]  ;;  %v600_v61 = vld [vmem:[#allocation4 + $0x3a8] sm:$0xff]  ;;  %v6472_v63 = vcombine.low %v588_v52, %v592_v53 }
 0x140   : > { %3099 = vmatpush1.bf16.msra.mxu1 %v6408_v62  ;;  %v6471_v48 = vcombine.high %v587_v42, %v591_v43  ;;  %v595_v50 = vld [vmem:[#allocation4 + $0x380] sm:$0xff]  ;;  %v6470_v54 = vcombine.low %v587_v42, %v591_v43  ;;  %v6481_v2 = vcombine.high %v596_v60, %v600_v61  ;;  %v604_v5 = vld [vmem:[#allocation4 + $0x3c8] sm:$0xff] }
 0x141   : > { %3100 = vmatprep.subr.bf16.mxu1 %v6417_v1  ;;  %v599_v51 = vld [vmem:[#allocation4 + $0x3a0] sm:$0xff] }
 0x142   : > { %2931 = vmatpush1.bf16.msra.mxu0 %v6422_v6  ;;  %v6479_v56 = vcombine.high %v595_v50, %v599_v51  ;;  %v603_v58 = vld [vmem:[#allocation4 + $0x3c0] sm:$0xff]  ;;  %v6478_v62 = vcombine.low %v595_v50, %v599_v51  ;;  %v608_v6 = vld [vmem:[#allocation4 + $0x3e8] sm:$0xff] }
 0x143   : > { %2932 = vmatprep.subr.bf16.mxu0 %v6431_v8  ;;  %v607_v59 = vld [vmem:[#allocation4 + $0x3e0] sm:$0xff]  ;;  %v6480_v8 = vcombine.low %v596_v60, %v600_v61  ;;  %v6489_v10 = vcombine.high %v604_v5, %v608_v6  ;;  %v6488_v18 = vcombine.low %v604_v5, %v608_v6 }
 0x144   : > { %3101 = vmatpush1.bf16.msra.mxu1 %v6416_v7  ;;  %v6487_v1 = vcombine.high %v603_v58, %v607_v59  ;;  %v611_v3 = vld [vmem:[#allocation4 + $0x400] sm:$0xff]  ;;  %v6486_v7 = vcombine.low %v603_v58, %v607_v59 }
 0x145   : > { %3102 = vmatprep.subr.bf16.mxu1 %v6425_v9  ;;  %v615_v4 = vld [vmem:[#allocation4 + $0x420] sm:$0xff] }
 0x146   : > { %2933 = vmatpush1.bf16.msra.mxu0 %v6430_v14  ;;  %v6495_v9 = vcombine.high %v611_v3, %v615_v4  ;;  %v619_v11 = vld [vmem:[#allocation4 + $0x440] sm:$0xff]  ;;  %v612_v14 = vld [vmem:[#allocation4 + $0x408] sm:$0xff] }
 0x147   : > { %2934 = vmatprep.subr.bf16.mxu0 %v6439_v16  ;;  %v623_v12 = vld [vmem:[#allocation4 + $0x460] sm:$0xff]  ;;  %v6494_v16 = vcombine.low %v611_v3, %v615_v4 }
 0x148   : > { %3103 = vmatpush1.bf16.msra.mxu1 %v6424_v15  ;;  %v7444_v13 = vld [vmem:[%s8603_s14] ss:$28 sps:$4 sm:$0xff]   ;;  %v6503_v19 = vcombine.high %v619_v11, %v623_v12 }
 0x149   : > { %3104 = vmatprep.subr.bf16.mxu1 %v6433_v17  ;;  %v616_v15 = vld [vmem:[#allocation4 + $0x428] sm:$0xff]  ;;  %v7445_v17 = vld [vmem:[%s8603_s14 + $0xc] ss:$28 sps:$4 sm:$0xff]   ;;  %v627_v21 = vld [vmem:[#allocation4 + $0x480] sm:$0xff] }
 0x14a   : > { %2935 = vmatpush1.bf16.msra.mxu0 %v6438_v22  ;;  %v6497_v20 = vcombine.high %v612_v14, %v616_v15  ;;  %v631_v22 = vld [vmem:[#allocation4 + $0x4a0] sm:$0xff]  ;;  %v6496_v26 = vcombine.low %v612_v14, %v616_v15 }
 0x14b   : > { %2936 = vmatprep.subr.bf16.mxu0 %v6447_v24  ;;  %v624_v24 = vld [vmem:[#allocation4 + $0x468] sm:$0xff]  ;;  %v6511_v27 = vcombine.high %v627_v21, %v631_v22  ;;  %v635_v28 = vld [vmem:[#allocation4 + $0x4c0] sm:$0xff] }
 0x14c   : > { %3105 = vmatpush1.bf16.msra.mxu1 %v6432_v23  ;;  %v620_v23 = vld [vmem:[#allocation4 + $0x448] sm:$0xff]  ;;  %v643_v34 = vld [vmem:[#allocation4 + $0x500] sm:$0xff] }
 0x14d   : > { %3106 = vmatprep.subr.bf16.mxu1 %v6441_v25  ;;  %v6502_v25 = vcombine.low %v619_v11, %v623_v12  ;;  %v6505_v29 = vcombine.high %v620_v23, %v624_v24  ;;  %v647_v35 = vld [vmem:[#allocation4 + $0x520] sm:$0xff]  ;;  %v6504_v36 = vcombine.low %v620_v23, %v624_v24  ;;  %v684_v24 = vld [vmem:[#allocation4 + $0x648] sm:$0xff] }
 0x14e   : > { %2937 = vmatpush1.bf16.msra.mxu0 %v6446_v30  ;;  %v639_v30 = vld [vmem:[#allocation4 + $0x4e0] sm:$0xff]  ;;  %v6527_v45 = vcombine.high %v643_v34, %v647_v35 }
 0x14f   : > { %2938 = vmatprep.subr.bf16.mxu0 %v6455_v32  ;;  %v632_v32 = vld [vmem:[#allocation4 + $0x4a8] sm:$0xff]  ;;  %v6519_v37 = vcombine.high %v635_v28, %v639_v30  ;;  %v651_v42 = vld [vmem:[#allocation4 + $0x540] sm:$0xff] }
 0x150   : > { %3107 = vmatpush1.bf16.msra.mxu1 %v6440_v31  ;;  %v628_v31 = vld [vmem:[#allocation4 + $0x488] sm:$0xff]  ;;  %v655_v43 = vld [vmem:[#allocation4 + $0x560] sm:$0xff] }
 0x151   : > { %3108 = vmatprep.subr.bf16.mxu1 %v6449_v33  ;;  %v6510_v33 = vcombine.low %v627_v21, %v631_v22  ;;  %v6512_v44 = vcombine.low %v628_v31, %v632_v32  ;;  %v659_v50 = vld [vmem:[#allocation4 + $0x580] sm:$0xff]  ;;  %v6535_v53 = vcombine.high %v651_v42, %v655_v43 }
 0x152   : > { %2939 = vmatpush1.bf16.msra.mxu0 %v6454_v38  ;;  %v636_v38 = vld [vmem:[#allocation4 + $0x4c8] sm:$0xff]  ;;  %v663_v51 = vld [vmem:[#allocation4 + $0x5a0] sm:$0xff] }
 0x153   : > { %2940 = vmatprep.subr.bf16.mxu0 %v6463_v40  ;;  %v6513_v40 = vcombine.high %v628_v31, %v632_v32  ;;  %v667_v58 = vld [vmem:[#allocation4 + $0x5c0] sm:$0xff]  ;;  %v6543_v61 = vcombine.high %v659_v50, %v663_v51  ;;  %v692_v32 = vld [vmem:[#allocation4 + $0x688] sm:$0xff] }
 0x154   : > { %3109 = vmatpush1.bf16.msra.mxu1 %v6448_v39  ;;  %v640_v39 = vld [vmem:[#allocation4 + $0x4e8] sm:$0xff]  ;;  %v671_v59 = vld [vmem:[#allocation4 + $0x5e0] sm:$0xff] }
 0x155   : > { %3110 = vmatprep.subr.bf16.mxu1 %v6457_v41  ;;  %v6518_v41 = vcombine.low %v635_v28, %v639_v30  ;;  %v6520_v52 = vcombine.low %v636_v38, %v640_v39  ;;  %v675_v3 = vld [vmem:[#allocation4 + $0x600] sm:$0xff]  ;;  %v6551_v6 = vcombine.high %v667_v58, %v671_v59 }
 0x156   : > { %2941 = vmatpush1.bf16.msra.mxu0 %v6462_v46  ;;  %v644_v46 = vld [vmem:[#allocation4 + $0x508] sm:$0xff]  ;;  %v679_v4 = vld [vmem:[#allocation4 + $0x620] sm:$0xff] }
 0x157   : > { %2942 = vmatprep.subr.bf16.mxu0 %v6471_v48  ;;  %v6521_v48 = vcombine.high %v636_v38, %v640_v39  ;;  %v6559_v12 = vcombine.high %v675_v3, %v679_v4  ;;  %v687_v14 = vld [vmem:[#allocation4 + $0x660] sm:$0xff] }
 0x158   : > { %3111 = vmatpush1.bf16.msra.mxu1 %v6456_v47  ;;  %v648_v47 = vld [vmem:[#allocation4 + $0x528] sm:$0xff]  ;;  %v691_v21 = vld [vmem:[#allocation4 + $0x680] sm:$0xff] }
 0x159   : > { %3112 = vmatprep.subr.bf16.mxu1 %v6465_v49  ;;  %v6526_v49 = vcombine.low %v643_v34, %v647_v35  ;;  %v6528_v60 = vcombine.low %v644_v46, %v648_v47  ;;  %v695_v22 = vld [vmem:[#allocation4 + $0x6a0] sm:$0xff] }
 0x15a   : > { %2943 = vmatpush1.bf16.msra.mxu0 %v6470_v54  ;;  %v652_v54 = vld [vmem:[#allocation4 + $0x548] sm:$0xff]  ;;  %v6575_v28 = vcombine.high %v691_v21, %v695_v22  ;;  %v703_v30 = vld [vmem:[#allocation4 + $0x6e0] sm:$0xff]  ;;  %v6574_v34 = vcombine.low %v691_v21, %v695_v22 }
 0x15b   : > { %2944 = vmatprep.subr.bf16.mxu0 %v6479_v56  ;;  %v6529_v56 = vcombine.high %v644_v46, %v648_v47  ;;  %v711_v38 = vld [vmem:[#allocation4 + $0x720] sm:$0xff] }
 0x15c   : > { %3113 = vmatpush1.bf16.msra.mxu1 %v6464_v55  ;;  %v656_v55 = vld [vmem:[#allocation4 + $0x568] sm:$0xff]  ;;  %v719_v46 = vld [vmem:[#allocation4 + $0x760] sm:$0xff] }
 0x15d   : > { %3114 = vmatprep.subr.bf16.mxu1 %v6473_v57  ;;  %v6534_v57 = vcombine.low %v651_v42, %v655_v43  ;;  %v6536_v5 = vcombine.low %v652_v54, %v656_v55 }
 0x15e   : > { %2945 = vmatpush1.bf16.msra.mxu0 %v6478_v62  ;;  %v660_v62 = vld [vmem:[#allocation4 + $0x588] sm:$0xff] }
 0x15f   : > { %2946 = vmatprep.subr.bf16.mxu0 %v6487_v1  ;;  %v6537_v1 = vcombine.high %v652_v54, %v656_v55  ;;  %v727_v54 = vld [vmem:[#allocation4 + $0x7a0] sm:$0xff] }
 0x160   : > { %3115 = vmatpush1.bf16.msra.mxu1 %v6472_v63  ;;  %v664_v63 = vld [vmem:[#allocation4 + $0x5a8] sm:$0xff] }
 0x161   : > { %3116 = vmatprep.subr.bf16.mxu1 %v6481_v2  ;;  %v6542_v2 = vcombine.low %v659_v50, %v663_v51  ;;  %v6544_v11 = vcombine.low %v660_v62, %v664_v63 }
 0x162   : > { %2947 = vmatpush1.bf16.msra.mxu0 %v6486_v7  ;;  %v668_v7 = vld [vmem:[#allocation4 + $0x5c8] sm:$0xff] }
 0x163   : > { %2959 = vmatprep.subr.bf16.mxu0 %v6495_v9  ;;  %v6545_v9 = vcombine.high %v660_v62, %v664_v63  ;;  %v735_v62 = vld [vmem:[#allocation4 + $0x7e0] sm:$0xff] }
 0x164   : > { %3117 = vmatpush1.bf16.msra.mxu1 %v6480_v8  ;;  %v672_v8 = vld [vmem:[#allocation4 + $0x5e8] sm:$0xff] }
 0x165   : > { %3118 = vmatprep.subr.bf16.mxu1 %v6489_v10  ;;  %2949 = vmatmul.mubr.bf16.vlgmr.msra.gmra.mrb[0].mxu0 %v7444_v13  ;;  %v6550_v10 = vcombine.low %v667_v58, %v671_v59  ;;  %v6553_v15 = vcombine.high %v668_v7, %v672_v8 }
 0x166   : > { %2960 = vmatpush1.bf16.msra.mxu0 %v6494_v16  ;;  %2991 = vmatprep.mubr.bf16.mxu0 %v7445_v17  ;;  %v676_v16 = vld [vmem:[#allocation4 + $0x608] sm:$0xff] }
 0x167   : > { %2961 = vmatprep.subr.bf16.mxu0 %v6503_v19  ;;  %v6552_v19 = vcombine.low %v668_v7, %v672_v8  ;;  %v743_v7 = vld [vmem:[#allocation4 + $0x820] sm:$0xff] }
 0x168   : > { %3119 = vmatpush1.bf16.msra.mxu1 %v6488_v18  ;;  %v6558_v18 = vcombine.low %v675_v3, %v679_v4 }
 0x169   : > { %3131 = vmatprep.subr.bf16.mxu1 %v6497_v20 }
 0x16a   : > { %2962 = vmatpush1.bf16.msra.mxu0 %v6502_v25  ;;  %v688_v25 = vld [vmem:[#allocation4 + $0x668] sm:$0xff] }
 0x16b   : > { %3121 = vmatmul.mubr.bf16.vlgmr.msra.gmra.mrb[4].mxu1 %v7444_v13  ;;  %2963 = vmatprep.subr.bf16.mxu0 %v6511_v27  ;;  %v683_v13 = vld [vmem:[#allocation4 + $0x640] sm:$0xff]  ;;  %v6569_v31 = vcombine.high %v684_v24, %v688_v25  ;;  %v6568_v35 = vcombine.low %v684_v24, %v688_v25 }
 0x16c   : > { %3132 = vmatpush1.bf16.msra.mxu1 %v6496_v26  ;;  %3163 = vmatprep.mubr.bf16.mxu1 %v7445_v17  ;;  %v680_v17 = vld [vmem:[#allocation4 + $0x628] sm:$0xff]  ;;  %v6567_v20 = vcombine.high %v683_v13, %v687_v14  ;;  %v6566_v26 = vcombine.low %v683_v13, %v687_v14  ;;  %v755_v24 = vld [vmem:[#allocation4 + $0x880] sm:$0xff] }
 0x16d   : > { %3133 = vmatprep.subr.bf16.mxu1 %v6505_v29  ;;  %v6561_v23 = vcombine.high %v676_v16, %v680_v17  ;;  %v6560_v27 = vcombine.low %v676_v16, %v680_v17  ;;  %v699_v29 = vld [vmem:[#allocation4 + $0x6c0] sm:$0xff]  ;;  %v740_v17 = vld [vmem:[#allocation4 + $0x808] sm:$0xff] }
 0x16e   : > { %2964 = vmatpush1.bf16.msra.mxu0 %v6510_v33  ;;  %v696_v33 = vld [vmem:[#allocation4 + $0x6a8] sm:$0xff]  ;;  %v6582_v42 = vcombine.low %v699_v29, %v703_v30  ;;  %v751_v16 = vld [vmem:[#allocation4 + $0x860] sm:$0xff] }
 0x16f   : > { %2965 = vmatprep.subr.bf16.mxu0 %v6519_v37  ;;  %v707_v37 = vld [vmem:[#allocation4 + $0x700] sm:$0xff]  ;;  %v6577_v39 = vcombine.high %v692_v32, %v696_v33  ;;  %v6576_v43 = vcombine.low %v692_v32, %v696_v33 }
 0x170   : > { %3134 = vmatpush1.bf16.msra.mxu1 %v6504_v36  ;;  %v6583_v36 = vcombine.high %v699_v29, %v703_v30  ;;  %v6590_v50 = vcombine.low %v707_v37, %v711_v38  ;;  %v759_v25 = vld [vmem:[#allocation4 + $0x8a0] sm:$0xff] }
 0x171   : > { %3135 = vmatprep.subr.bf16.mxu1 %v6513_v40  ;;  %v700_v40 = vld [vmem:[#allocation4 + $0x6c8] sm:$0xff]  ;;  %v763_v32 = vld [vmem:[#allocation4 + $0x8c0] sm:$0xff] }
 0x172   : > { %2966 = vmatpush1.bf16.msra.mxu0 %v6518_v41  ;;  %v704_v41 = vld [vmem:[#allocation4 + $0x6e8] sm:$0xff]  ;;  %v767_v33 = vld [vmem:[#allocation4 + $0x8e0] sm:$0xff] }
 0x173   : > { %2967 = vmatprep.subr.bf16.mxu0 %v6527_v45  ;;  %v715_v45 = vld [vmem:[#allocation4 + $0x740] sm:$0xff]  ;;  %v6585_v47 = vcombine.high %v700_v40, %v704_v41  ;;  %v6584_v51 = vcombine.low %v700_v40, %v704_v41 }
 0x174   : > { %3136 = vmatpush1.bf16.msra.mxu1 %v6512_v44  ;;  %v6591_v44 = vcombine.high %v707_v37, %v711_v38  ;;  %v6598_v58 = vcombine.low %v715_v45, %v719_v46  ;;  %v6638_v37 = vcombine.low %v755_v24, %v759_v25  ;;  %v771_v40 = vld [vmem:[#allocation4 + $0x900] sm:$0xff] }
 0x175   : > { %3137 = vmatprep.subr.bf16.mxu1 %v6521_v48  ;;  %v708_v48 = vld [vmem:[#allocation4 + $0x708] sm:$0xff]  ;;  %v775_v41 = vld [vmem:[#allocation4 + $0x920] sm:$0xff] }
 0x176   : > { %2968 = vmatpush1.bf16.msra.mxu0 %v6526_v49  ;;  %v712_v49 = vld [vmem:[#allocation4 + $0x728] sm:$0xff] }
 0x177   : > { %2969 = vmatprep.subr.bf16.mxu0 %v6535_v53  ;;  %v723_v53 = vld [vmem:[#allocation4 + $0x780] sm:$0xff]  ;;  %v6593_v55 = vcombine.high %v708_v48, %v712_v49  ;;  %v6592_v59 = vcombine.low %v708_v48, %v712_v49 }
 0x178   : > { %3138 = vmatpush1.bf16.msra.mxu1 %v6520_v52  ;;  %v6599_v52 = vcombine.high %v715_v45, %v719_v46  ;;  %v6606_v3 = vcombine.low %v723_v53, %v727_v54  ;;  %v6646_v45 = vcombine.low %v763_v32, %v767_v33  ;;  %v779_v48 = vld [vmem:[#allocation4 + $0x940] sm:$0xff] }
 0x179   : > { %3139 = vmatprep.subr.bf16.mxu1 %v6529_v56  ;;  %v716_v56 = vld [vmem:[#allocation4 + $0x748] sm:$0xff]  ;;  %v783_v49 = vld [vmem:[#allocation4 + $0x960] sm:$0xff] }
 0x17a   : > { %2970 = vmatpush1.bf16.msra.mxu0 %v6534_v57  ;;  %v720_v57 = vld [vmem:[#allocation4 + $0x768] sm:$0xff] }
 0x17b   : > { %2971 = vmatprep.subr.bf16.mxu0 %v6543_v61  ;;  %v731_v61 = vld [vmem:[#allocation4 + $0x7c0] sm:$0xff]  ;;  %v6601_v63 = vcombine.high %v716_v56, %v720_v57  ;;  %v6600_v4 = vcombine.low %v716_v56, %v720_v57 }
 0x17c   : > { %3140 = vmatpush1.bf16.msra.mxu1 %v6528_v60  ;;  %v6607_v60 = vcombine.high %v723_v53, %v727_v54  ;;  %v6654_v53 = vcombine.low %v771_v40, %v775_v41  ;;  %v787_v56 = vld [vmem:[#allocation4 + $0x980] sm:$0xff] }
 0x17d   : > { %3141 = vmatprep.subr.bf16.mxu1 %v6537_v1  ;;  %v724_v1 = vld [vmem:[#allocation4 + $0x788] sm:$0xff]  ;;  %v791_v57 = vld [vmem:[#allocation4 + $0x9a0] sm:$0xff] }
 0x17e   : > { %2972 = vmatpush1.bf16.msra.mxu0 %v6542_v2  ;;  %v728_v2 = vld [vmem:[#allocation4 + $0x7a8] sm:$0xff] }
 0x17f   : > { %2973 = vmatprep.subr.bf16.mxu0 %v6551_v6  ;;  %v739_v6 = vld [vmem:[#allocation4 + $0x800] sm:$0xff]  ;;  %v6609_v8 = vcombine.high %v724_v1, %v728_v2  ;;  %v6608_v13 = vcombine.low %v724_v1, %v728_v2 }
 0x180   : > { %3142 = vmatpush1.bf16.msra.mxu1 %v6536_v5  ;;  %v6615_v5 = vcombine.high %v731_v61, %v735_v62  ;;  %v6623_v14 = vcombine.high %v739_v6, %v743_v7  ;;  %v6622_v21 = vcombine.low %v739_v6, %v743_v7  ;;  %v795_v1 = vld [vmem:[#allocation4 + $0x9c0] sm:$0xff]  ;;  %v6670_v6 = vcombine.low %v787_v56, %v791_v57 }
 0x181   : > { %3143 = vmatprep.subr.bf16.mxu1 %v6545_v9  ;;  %v732_v9 = vld [vmem:[#allocation4 + $0x7c8] sm:$0xff]  ;;  %v799_v2 = vld [vmem:[#allocation4 + $0x9e0] sm:$0xff] }
 0x182   : > { %2974 = vmatpush1.bf16.msra.mxu0 %v6550_v10  ;;  %v736_v10 = vld [vmem:[#allocation4 + $0x7e8] sm:$0xff] }
 0x183   : > { %2975 = vmatprep.subr.bf16.mxu0 %v6559_v12  ;;  %v747_v12 = vld [vmem:[#allocation4 + $0x840] sm:$0xff]  ;;  %v6616_v22 = vcombine.low %v732_v9, %v736_v10 }
 0x184   : > { %3144 = vmatpush1.bf16.msra.mxu1 %v6544_v11  ;;  %v6614_v11 = vcombine.low %v731_v61, %v735_v62  ;;  %v6630_v29 = vcombine.low %v747_v12, %v751_v16  ;;  %v6662_v61 = vcombine.low %v779_v48, %v783_v49 }
 0x185   : > { %3145 = vmatprep.subr.bf16.mxu1 %v6553_v15  ;;  %v7447_v15 = vld [vmem:[%s8603_s14 + $0x8] ss:$28 sps:$4 sm:$0xff]  }
 0x186   : > { %2976 = vmatpush1.bf16.msra.mxu0 %v6558_v18  ;;  %v6617_v18 = vcombine.high %v732_v9, %v736_v10  ;;  %v803_v9 = vld [vmem:[#allocation4 + $0xa00] sm:$0xff] }
 0x187   : > { %2977 = vmatprep.subr.bf16.mxu0 %v6567_v20  ;;  %v7448_v20 = vld [vmem:[%s8603_s14 + $0x14] ss:$28 sps:$4 sm:$0xff]  }
 0x188   : > { %3146 = vmatpush1.bf16.msra.mxu1 %v6552_v19  ;;  %v744_v19 = vld [vmem:[#allocation4 + $0x828] sm:$0xff]  ;;  %v807_v10 = vld [vmem:[#allocation4 + $0xa20] sm:$0xff] }
 0x189   : > { %3147 = vmatprep.subr.bf16.mxu1 %v6561_v23  ;;  %v6631_v23 = vcombine.high %v747_v12, %v751_v16  ;;  %v6624_v30 = vcombine.low %v740_v17, %v744_v19  ;;  %v796_v12 = vld [vmem:[#allocation4 + $0x9c8] sm:$0xff]  ;;  %v6687_v16 = vcombine.high %v803_v9, %v807_v10 }
 0x18a   : > { %2978 = vmatpush1.bf16.msra.mxu0 %v6566_v26  ;;  %v6625_v26 = vcombine.high %v740_v17, %v744_v19  ;;  %v811_v17 = vld [vmem:[#allocation4 + $0xa40] sm:$0xff] }
 0x18b   : > { %2979 = vmatprep.subr.bf16.mxu0 %v6575_v28  ;;  %v752_v28 = vld [vmem:[#allocation4 + $0x868] sm:$0xff] }
 0x18c   : > { %3148 = vmatpush1.bf16.msra.mxu1 %v6560_v27  ;;  %v748_v27 = vld [vmem:[#allocation4 + $0x848] sm:$0xff] }
 0x18d   : > { %3149 = vmatprep.subr.bf16.mxu1 %v6569_v31  ;;  %v6639_v31 = vcombine.high %v755_v24, %v759_v25  ;;  %v6632_v38 = vcombine.low %v748_v27, %v752_v28  ;;  %v819_v25 = vld [vmem:[#allocation4 + $0xa80] sm:$0xff] }
 0x18e   : > { %2980 = vmatpush1.bf16.msra.mxu0 %v6574_v34  ;;  %v6633_v34 = vcombine.high %v748_v27, %v752_v28  ;;  %v812_v28 = vld [vmem:[#allocation4 + $0xa48] sm:$0xff] }
 0x18f   : > { %2981 = vmatprep.subr.bf16.mxu0 %v6583_v36  ;;  %v760_v36 = vld [vmem:[#allocation4 + $0x8a8] sm:$0xff] }
 0x190   : > { %3150 = vmatpush1.bf16.msra.mxu1 %v6568_v35  ;;  %v756_v35 = vld [vmem:[#allocation4 + $0x888] sm:$0xff] }
 0x191   : > { %3151 = vmatprep.subr.bf16.mxu1 %v6577_v39  ;;  %v6647_v39 = vcombine.high %v763_v32, %v767_v33  ;;  %v6640_v46 = vcombine.low %v756_v35, %v760_v36  ;;  %v827_v33 = vld [vmem:[#allocation4 + $0xac0] sm:$0xff] }
 0x192   : > { %2982 = vmatpush1.bf16.msra.mxu0 %v6582_v42  ;;  %v6641_v42 = vcombine.high %v756_v35, %v760_v36  ;;  %v820_v36 = vld [vmem:[#allocation4 + $0xa88] sm:$0xff] }
 0x193   : > { %2983 = vmatprep.subr.bf16.mxu0 %v6591_v44  ;;  %v768_v44 = vld [vmem:[#allocation4 + $0x8e8] sm:$0xff] }
 0x194   : > { %3152 = vmatpush1.bf16.msra.mxu1 %v6576_v43  ;;  %v764_v43 = vld [vmem:[#allocation4 + $0x8c8] sm:$0xff] }
 0x195   : > { %3153 = vmatprep.subr.bf16.mxu1 %v6585_v47  ;;  %v6655_v47 = vcombine.high %v771_v40, %v775_v41  ;;  %v6648_v54 = vcombine.low %v764_v43, %v768_v44  ;;  %v835_v41 = vld [vmem:[#allocation4 + $0xb00] sm:$0xff] }
 0x196   : > { %2984 = vmatpush1.bf16.msra.mxu0 %v6590_v50  ;;  %v6649_v50 = vcombine.high %v764_v43, %v768_v44  ;;  %v828_v44 = vld [vmem:[#allocation4 + $0xac8] sm:$0xff] }
 0x197   : > { %2985 = vmatprep.subr.bf16.mxu0 %v6599_v52  ;;  %v776_v52 = vld [vmem:[#allocation4 + $0x928] sm:$0xff] }
 0x198   : > { %3154 = vmatpush1.bf16.msra.mxu1 %v6584_v51  ;;  %v772_v51 = vld [vmem:[#allocation4 + $0x908] sm:$0xff] }
 0x199   : > { %3155 = vmatprep.subr.bf16.mxu1 %v6593_v55  ;;  %v6663_v55 = vcombine.high %v779_v48, %v783_v49  ;;  %v6656_v62 = vcombine.low %v772_v51, %v776_v52  ;;  %v843_v49 = vld [vmem:[#allocation4 + $0xb40] sm:$0xff] }
 0x19a   : > { %2986 = vmatpush1.bf16.msra.mxu0 %v6598_v58  ;;  %v6657_v58 = vcombine.high %v772_v51, %v776_v52  ;;  %v836_v52 = vld [vmem:[#allocation4 + $0xb08] sm:$0xff] }
 0x19b   : > { %2987 = vmatprep.subr.bf16.mxu0 %v6607_v60  ;;  %v784_v60 = vld [vmem:[#allocation4 + $0x968] sm:$0xff] }
 0x19c   : > { %3156 = vmatpush1.bf16.msra.mxu1 %v6592_v59  ;;  %v780_v59 = vld [vmem:[#allocation4 + $0x948] sm:$0xff] }
 0x19d   : > { %3157 = vmatprep.subr.bf16.mxu1 %v6601_v63  ;;  %v6671_v63 = vcombine.high %v787_v56, %v791_v57  ;;  %v6664_v7 = vcombine.low %v780_v59, %v784_v60  ;;  %v851_v57 = vld [vmem:[#allocation4 + $0xb80] sm:$0xff] }
 0x19e   : > { %2988 = vmatpush1.bf16.msra.mxu0 %v6606_v3  ;;  %v6665_v3 = vcombine.high %v780_v59, %v784_v60  ;;  %v844_v60 = vld [vmem:[#allocation4 + $0xb48] sm:$0xff] }
 0x19f   : > { %2989 = vmatprep.subr.bf16.mxu0 %v6615_v5  ;;  %v792_v5 = vld [vmem:[#allocation4 + $0x9a8] sm:$0xff] }
 0x1a0   : > { %3158 = vmatpush1.bf16.msra.mxu1 %v6600_v4  ;;  %v788_v4 = vld [vmem:[#allocation4 + $0x988] sm:$0xff] }
 0x1a1   : > { %3159 = vmatprep.subr.bf16.mxu1 %v6609_v8  ;;  %v6679_v8 = vcombine.high %v795_v1, %v799_v2 }
 0x1a2   : > { %2990 = vmatpush1.bf16.msra.mxu0 %v6614_v11  ;;  %v6673_v11 = vcombine.high %v788_v4, %v792_v5 }
 0x1a3   : > { %3002 = vmatprep.subr.bf16.mxu0 %v6623_v14  ;;  %v6678_v14 = vcombine.low %v795_v1, %v799_v2  ;;  %v859_v2 = vld [vmem:[#allocation4 + $0xbc0] sm:$0xff] }
 0x1a4   : > { %3160 = vmatpush1.bf16.msra.mxu1 %v6608_v13  ;;  %v800_v13 = vld [vmem:[#allocation4 + $0x9e8] sm:$0xff] }
 0x1a5   : > { %3161 = vmatprep.subr.bf16.mxu1 %v6617_v18  ;;  %2992 = vmatmul.mubr.bf16.vlgmr.msra.gmra.mrb[0].mxu0 %v7447_v15  ;;  %v815_v18 = vld [vmem:[#allocation4 + $0xa60] sm:$0xff]  ;;  %v6681_v19 = vcombine.high %v796_v12, %v800_v13 }
 0x1a6   : > { %3003 = vmatpush1.bf16.msra.mxu0 %v6622_v21  ;;  %3034 = vmatprep.mubr.bf16.mxu0 %v7448_v20  ;;  %v808_v21 = vld [vmem:[#allocation4 + $0xa28] sm:$0xff]  ;;  %v6695_v24 = vcombine.high %v811_v17, %v815_v18 }
 0x1a7   : > { %3004 = vmatprep.subr.bf16.mxu0 %v6631_v23  ;;  %v6680_v23 = vcombine.low %v796_v12, %v800_v13  ;;  %v485_v13 = vld [vmem:[#allocation4 + $0x10] sm:$0xff] }
 0x1a8   : > { %3162 = vmatpush1.bf16.msra.mxu1 %v6616_v22  ;;  %v6686_v22 = vcombine.low %v803_v9, %v807_v10  ;;  %v860_v10 = vld [vmem:[#allocation4 + $0xbc8] sm:$0xff] }
 0x1a9   : > { %3174 = vmatprep.subr.bf16.mxu1 %v6625_v26  ;;  %v823_v26 = vld [vmem:[#allocation4 + $0xaa0] sm:$0xff] }
 0x1aa   : > { %3005 = vmatpush1.bf16.msra.mxu0 %v6630_v29  ;;  %v816_v29 = vld [vmem:[#allocation4 + $0xa68] sm:$0xff]  ;;  %v6703_v32 = vcombine.high %v819_v25, %v823_v26 }
 0x1ab   : > { %3164 = vmatmul.mubr.bf16.vlgmr.msra.gmra.mrb[4].mxu1 %v7447_v15  ;;  %3006 = vmatprep.subr.bf16.mxu0 %v6639_v31  ;;  %v6672_v15 = vcombine.low %v788_v4, %v792_v5  ;;  %v6697_v35 = vcombine.high %v812_v28, %v816_v29  ;;  %v852_v5 = vld [vmem:[#allocation4 + $0xb88] sm:$0xff] }
 0x1ac   : > { %3175 = vmatpush1.bf16.msra.mxu1 %v6624_v30  ;;  %3206 = vmatprep.mubr.bf16.mxu1 %v7448_v20  ;;  %v804_v20 = vld [vmem:[#allocation4 + $0xa08] sm:$0xff]  ;;  %v6694_v30 = vcombine.low %v811_v17, %v815_v18  ;;  %v7450_v17 = vld [vmem:[%s8603_s14 + $0x10] ss:$28 sps:$4 sm:$0xff]  }
 0x1ad   : > { %3176 = vmatprep.subr.bf16.mxu1 %v6633_v34  ;;  %v6689_v27 = vcombine.high %v804_v20, %v808_v21  ;;  %v6688_v31 = vcombine.low %v804_v20, %v808_v21  ;;  %v831_v34 = vld [vmem:[#allocation4 + $0xae0] sm:$0xff]  ;;  %v497_v20 = vld [vmem:[#allocation4 + $0x70] sm:$0xff] }
 0x1ae   : > { %3007 = vmatpush1.bf16.msra.mxu0 %v6638_v37  ;;  %v824_v37 = vld [vmem:[#allocation4 + $0xaa8] sm:$0xff]  ;;  %v6711_v40 = vcombine.high %v827_v33, %v831_v34 }
 0x1af   : > { %3008 = vmatprep.subr.bf16.mxu0 %v6647_v39  ;;  %v6696_v39 = vcombine.low %v812_v28, %v816_v29  ;;  %v6705_v43 = vcombine.high %v820_v36, %v824_v37  ;;  %v505_v28 = vld [vmem:[#allocation4 + $0xb0] sm:$0xff] }
 0x1b0   : > { %3177 = vmatpush1.bf16.msra.mxu1 %v6632_v38  ;;  %v6702_v38 = vcombine.low %v819_v25, %v823_v26 }
 0x1b1   : > { %3178 = vmatprep.subr.bf16.mxu1 %v6641_v42  ;;  %v839_v42 = vld [vmem:[#allocation4 + $0xb20] sm:$0xff] }
 0x1b2   : > { %3009 = vmatpush1.bf16.msra.mxu0 %v6646_v45  ;;  %v832_v45 = vld [vmem:[#allocation4 + $0xae8] sm:$0xff]  ;;  %v6719_v48 = vcombine.high %v835_v41, %v839_v42 }
 0x1b3   : > { %3010 = vmatprep.subr.bf16.mxu0 %v6655_v47  ;;  %v6704_v47 = vcombine.low %v820_v36, %v824_v37  ;;  %v6713_v51 = vcombine.high %v828_v44, %v832_v45  ;;  %v509_v36 = vld [vmem:[#allocation4 + $0xd0] sm:$0xff] }
 0x1b4   : > { %3179 = vmatpush1.bf16.msra.mxu1 %v6640_v46  ;;  %v6710_v46 = vcombine.low %v827_v33, %v831_v34  ;;  %v8635_v33 = vld [vmem:[%s8603_s14 + $0x4] ss:$28 sps:$4 sm:$0xff]  }
 0x1b5   : > { %3180 = vmatprep.subr.bf16.mxu1 %v6649_v50  ;;  %v847_v50 = vld [vmem:[#allocation4 + $0xb60] sm:$0xff]  ;;  %v513_v37 = vld [vmem:[#allocation4 + $0xf0] sm:$0xff] }
 0x1b6   : > { %3011 = vmatpush1.bf16.msra.mxu0 %v6654_v53  ;;  %v840_v53 = vld [vmem:[#allocation4 + $0xb28] sm:$0xff]  ;;  %v6727_v56 = vcombine.high %v843_v49, %v847_v50 }
 0x1b7   : > { %3012 = vmatprep.subr.bf16.mxu0 %v6663_v55  ;;  %v6712_v55 = vcombine.low %v828_v44, %v832_v45  ;;  %v6721_v59 = vcombine.high %v836_v52, %v840_v53  ;;  %v525_v45 = vld [vmem:[#allocation4 + $0x150] sm:$0xff] }
 0x1b8   : > { %3181 = vmatpush1.bf16.msra.mxu1 %v6648_v54  ;;  %v6718_v54 = vcombine.low %v835_v41, %v839_v42  ;;  %v517_v41 = vld [vmem:[#allocation4 + $0x110] sm:$0xff] }
 0x1b9   : > { %3182 = vmatprep.subr.bf16.mxu1 %v6657_v58  ;;  %v855_v58 = vld [vmem:[#allocation4 + $0xba0] sm:$0xff]  ;;  %v521_v42 = vld [vmem:[#allocation4 + $0x130] sm:$0xff] }
 0x1ba   : > { %3013 = vmatpush1.bf16.msra.mxu0 %v6662_v61  ;;  %v848_v61 = vld [vmem:[#allocation4 + $0xb68] sm:$0xff]  ;;  %v6735_v1 = vcombine.high %v851_v57, %v855_v58  ;;  %v6403_v44 = vcombine.high %v517_v41, %v521_v42 }
 0x1bb   : > { %3014 = vmatprep.subr.bf16.mxu0 %v6671_v63  ;;  %v6720_v63 = vcombine.low %v836_v52, %v840_v53  ;;  %v6729_v4 = vcombine.high %v844_v60, %v848_v61  ;;  %v533_v53 = vld [vmem:[#allocation4 + $0x190] sm:$0xff] }
 0x1bc   : > { %3183 = vmatpush1.bf16.msra.mxu1 %v6656_v62  ;;  %v6726_v62 = vcombine.low %v843_v49, %v847_v50  ;;  %v6402_v49 = vcombine.low %v517_v41, %v521_v42  ;;  %v581_v41 = vld [vmem:[#allocation4 + $0x310] sm:$0xff] }
 0x1bd   : > { %3184 = vmatprep.subr.bf16.mxu1 %v6665_v3  ;;  %v863_v3 = vld [vmem:[#allocation4 + $0xbe0] sm:$0xff]  ;;  %v585_v42 = vld [vmem:[#allocation4 + $0x330] sm:$0xff] }
 0x1be   : > { %3015 = vmatpush1.bf16.msra.mxu0 %v6670_v6  ;;  %v856_v6 = vld [vmem:[#allocation4 + $0xba8] sm:$0xff]  ;;  %v6743_v9 = vcombine.high %v859_v2, %v863_v3 }
 0x1bf   : > { %3016 = vmatprep.subr.bf16.mxu0 %v6679_v8  ;;  %v6728_v8 = vcombine.low %v844_v60, %v848_v61  ;;  %v6737_v12 = vcombine.high %v852_v5, %v856_v6  ;;  %v541_v60 = vld [vmem:[#allocation4 + $0x1d0] sm:$0xff] }
 0x1c0   : > { %3185 = vmatpush1.bf16.msra.mxu1 %v6664_v7  ;;  %v6734_v7 = vcombine.low %v851_v57, %v855_v58  ;;  %v494_v58 = vld [vmem:[#allocation4 + $0x58] sm:$0xff]  ;;  %v545_v61 = vld [vmem:[#allocation4 + $0x1f0] sm:$0xff] }
 0x1c1   : > { %3186 = vmatprep.subr.bf16.mxu1 %v6673_v11  ;;  %v864_v11 = vld [vmem:[#allocation4 + $0xbe8] sm:$0xff] }
 0x1c2   : > { %3017 = vmatpush1.bf16.msra.mxu0 %v6678_v14  ;;  %v489_v14 = vld [vmem:[#allocation4 + $0x30] sm:$0xff]  ;;  %v6745_v21 = vcombine.high %v860_v10, %v864_v11  ;;  %v6744_v25 = vcombine.low %v860_v10, %v864_v11 }
 0x1c3   : > { %3018 = vmatprep.subr.bf16.mxu0 %v6687_v16  ;;  %v6736_v16 = vcombine.low %v852_v5, %v856_v6  ;;  %v6371_v18 = vcombine.high %v485_v13, %v489_v14  ;;  %v553_v5 = vld [vmem:[#allocation4 + $0x230] sm:$0xff] }
 0x1c4   : > { %3187 = vmatpush1.bf16.msra.mxu1 %v6672_v15  ;;  %v6742_v15 = vcombine.low %v859_v2, %v863_v3  ;;  %v502_v2 = vld [vmem:[#allocation4 + $0x98] sm:$0xff] }
 0x1c5   : > { %3188 = vmatprep.subr.bf16.mxu1 %v6681_v19  ;;  %v493_v19 = vld [vmem:[#allocation4 + $0x50] sm:$0xff] }
 0x1c6   : > { %3019 = vmatpush1.bf16.msra.mxu0 %v6686_v22  ;;  %v868_v22 = vld [vmem:[#allocation4 + $0xc08] sm:$0xff]  ;;  %v6379_v26 = vcombine.high %v493_v19, %v497_v20 }
 0x1c7   : > { %3020 = vmatprep.subr.bf16.mxu0 %v6695_v24  ;;  %v6370_v24 = vcombine.low %v485_v13, %v489_v14  ;;  %v510_v13 = vld [vmem:[#allocation4 + $0xd8] sm:$0xff] }
 0x1c8   : > { %3189 = vmatpush1.bf16.msra.mxu1 %v6680_v23  ;;  %v872_v23 = vld [vmem:[#allocation4 + $0xc28] sm:$0xff]  ;;  %v514_v14 = vld [vmem:[#allocation4 + $0xf8] sm:$0xff] }
 0x1c9   : > { %3190 = vmatprep.subr.bf16.mxu1 %v6689_v27  ;;  %v501_v27 = vld [vmem:[#allocation4 + $0x90] sm:$0xff]  ;;  %v6753_v29 = vcombine.high %v868_v22, %v872_v23  ;;  %v6752_v34 = vcombine.low %v868_v22, %v872_v23  ;;  %v518_v22 = vld [vmem:[#allocation4 + $0x118] sm:$0xff] }
 0x1ca   : > { %3021 = vmatpush1.bf16.msra.mxu0 %v6694_v30  ;;  %v869_v30 = vld [vmem:[#allocation4 + $0xc10] sm:$0xff]  ;;  %v522_v23 = vld [vmem:[#allocation4 + $0x138] sm:$0xff] }
 0x1cb   : > { %3022 = vmatprep.subr.bf16.mxu0 %v6703_v32  ;;  %v6378_v32 = vcombine.low %v493_v19, %v497_v20 }
 0x1cc   : > { %3191 = vmatpush1.bf16.msra.mxu1 %v6688_v31  ;;  %v873_v31 = vld [vmem:[#allocation4 + $0xc30] sm:$0xff] }
 0x1cd   : > { %3192 = vmatprep.subr.bf16.mxu1 %v6697_v35  ;;  %v6387_v35 = vcombine.high %v501_v27, %v505_v28  ;;  %v6754_v50 = vcombine.low %v869_v30, %v873_v31 }
 0x1ce   : > { %3023 = vmatpush1.bf16.msra.mxu0 %v6702_v38  ;;  %v6755_v38 = vcombine.high %v869_v30, %v873_v31  ;;  %v526_v30 = vld [vmem:[#allocation4 + $0x158] sm:$0xff] }
 0x1cf   : > { %3024 = vmatprep.subr.bf16.mxu0 %v6711_v40  ;;  %v6395_v40 = vcombine.high %v509_v36, %v513_v37  ;;  %v530_v31 = vld [vmem:[#allocation4 + $0x178] sm:$0xff] }
 0x1d0   : > { %3193 = vmatpush1.bf16.msra.mxu1 %v6696_v39  ;;  %v6386_v39 = vcombine.low %v501_v27, %v505_v28  ;;  %v6396_v28 = vcombine.low %v510_v13, %v514_v14 }
 0x1d1   : > { %3194 = vmatprep.subr.bf16.mxu1 %v6705_v43  ;;  %v6394_v43 = vcombine.low %v509_v36, %v513_v37  ;;  %v6404_v36 = vcombine.low %v518_v22, %v522_v23 }
 0x1d2   : > { %3025 = vmatpush1.bf16.msra.mxu0 %v6710_v46  ;;  %v529_v46 = vld [vmem:[#allocation4 + $0x170] sm:$0xff] }
 0x1d3   : > { %3026 = vmatprep.subr.bf16.mxu0 %v6719_v48  ;;  %v490_v48 = vld [vmem:[#allocation4 + $0x38] sm:$0xff] }
 0x1d4   : > { %3195 = vmatpush1.bf16.msra.mxu1 %v6704_v47  ;;  %v486_v47 = vld [vmem:[#allocation4 + $0x18] sm:$0xff] }
 0x1d5   : > { %3196 = vmatprep.subr.bf16.mxu1 %v6713_v51  ;;  %v6411_v51 = vcombine.high %v525_v45, %v529_v46  ;;  %v6373_v52 = vcombine.high %v486_v47, %v490_v48 }
 0x1d6   : > { %3027 = vmatpush1.bf16.msra.mxu0 %v6718_v54  ;;  %v537_v54 = vld [vmem:[#allocation4 + $0x1b0] sm:$0xff] }
 0x1d7   : > { %3028 = vmatprep.subr.bf16.mxu0 %v6727_v56  ;;  %v6410_v56 = vcombine.low %v525_v45, %v529_v46  ;;  %v6419_v57 = vcombine.high %v533_v53, %v537_v54  ;;  %v6467_v45 = vcombine.high %v581_v41, %v585_v42 }
 0x1d8   : > { %3197 = vmatpush1.bf16.msra.mxu1 %v6712_v55  ;;  %v7884_v55 = vld [vmem:[%s8603_s14 + $0x18] ss:$28 sps:$4 sm:$0xff]  }
 0x1d9   : > { %3198 = vmatprep.subr.bf16.mxu1 %v6721_v59  ;;  %v498_v59 = vld [vmem:[#allocation4 + $0x78] sm:$0xff] }
 0x1da   : > { %3029 = vmatpush1.bf16.msra.mxu0 %v6726_v62  ;;  %v6418_v62 = vcombine.low %v533_v53, %v537_v54  ;;  %v6381_v3 = vcombine.high %v494_v58, %v498_v59  ;;  %v6380_v11 = vcombine.low %v494_v58, %v498_v59  ;;  %v554_v58 = vld [vmem:[#allocation4 + $0x238] sm:$0xff] }
 0x1db   : > { %3030 = vmatprep.subr.bf16.mxu0 %v6735_v1  ;;  %v6427_v1 = vcombine.high %v541_v60, %v545_v61 }
 0x1dc   : > { %3199 = vmatpush1.bf16.msra.mxu1 %v6720_v63  ;;  %v6372_v63 = vcombine.low %v486_v47, %v490_v48  ;;  %v589_v47 = vld [vmem:[#allocation4 + $0x350] sm:$0xff] }
 0x1dd   : > { %3200 = vmatprep.subr.bf16.mxu1 %v6729_v4  ;;  %v549_v4 = vld [vmem:[#allocation4 + $0x210] sm:$0xff] }
 0x1de   : > { %3031 = vmatpush1.bf16.msra.mxu0 %v6734_v7  ;;  %v506_v7 = vld [vmem:[#allocation4 + $0xb8] sm:$0xff]  ;;  %v6434_v19 = vcombine.low %v549_v4, %v553_v5  ;;  %v593_v48 = vld [vmem:[#allocation4 + $0x370] sm:$0xff] }
 0x1df   : > { %3032 = vmatprep.subr.bf16.mxu0 %v6743_v9  ;;  %v6426_v9 = vcombine.low %v541_v60, %v545_v61  ;;  %v6388_v20 = vcombine.low %v502_v2, %v506_v7  ;;  %v6475_v53 = vcombine.high %v589_v47, %v593_v48  ;;  %v6474_v59 = vcombine.low %v589_v47, %v593_v48  ;;  %v649_v47 = vld [vmem:[#allocation4 + $0x530] sm:$0xff]  ;;  %v598_v48 = vld [vmem:[#allocation4 + $0x398] sm:$0xff] }
 0x1e0   : > { %3201 = vmatpush1.bf16.msra.mxu1 %v6728_v8 }
 0x1e1   : > { %3202 = vmatprep.subr.bf16.mxu1 %v6737_v12  ;;  %v6435_v12 = vcombine.high %v549_v4, %v553_v5 }
 0x1e2   : > { %3033 = vmatpush1.bf16.msra.mxu0 %v6742_v15 }
 0x1e3   : > { %3260 = vmatprep.subr.bf16.mxu0 %v6371_v18  ;;  %v561_v18 = vld [vmem:[#allocation4 + $0x270] sm:$0xff] }
 0x1e4   : > { %3203 = vmatpush1.bf16.msra.mxu1 %v6736_v16  ;;  %v6389_v16 = vcombine.high %v502_v2, %v506_v7  ;;  %v558_v2 = vld [vmem:[#allocation4 + $0x258] sm:$0xff] }
 0x1e5   : > { %3204 = vmatprep.subr.bf16.mxu1 %v6745_v21  ;;  %3035 = vmatmul.mubr.bf16.vlgmr.msra.gmra.mrb[0].mxu0 %v7450_v17 }
 0x1e6   : > { %3261 = vmatpush1.bf16.msra.mxu0 %v6370_v24  ;;  %3292 = vmatprep.mubr.bf16.mxu0 %v8635_v33  ;;  %v6397_v24 = vcombine.high %v510_v13, %v514_v14  ;;  %v566_v13 = vld [vmem:[#allocation4 + $0x298] sm:$0xff] }
 0x1e7   : > { %3262 = vmatprep.subr.bf16.mxu0 %v6379_v26  ;;  %v569_v26 = vld [vmem:[#allocation4 + $0x2b0] sm:$0xff]  ;;  %v570_v14 = vld [vmem:[#allocation4 + $0x2b8] sm:$0xff] }
 0x1e8   : > { %3205 = vmatpush1.bf16.msra.mxu1 %v6744_v25  ;;  %v565_v25 = vld [vmem:[#allocation4 + $0x290] sm:$0xff] }
 0x1e9   : > { %3217 = vmatprep.subr.bf16.mxu1 %v6753_v29  ;;  %v6451_v29 = vcombine.high %v565_v25, %v569_v26 }
 0x1ea   : > { %3263 = vmatpush1.bf16.msra.mxu0 %v6378_v32  ;;  %v6405_v32 = vcombine.high %v518_v22, %v522_v23  ;;  %v574_v22 = vld [vmem:[#allocation4 + $0x2d8] sm:$0xff] }
 0x1eb   : > { %3207 = vmatmul.mubr.bf16.vlgmr.msra.gmra.mrb[4].mxu1 %v7450_v17  ;;  %3264 = vmatprep.subr.bf16.mxu0 %v6387_v35  ;;  %v557_v17 = vld [vmem:[#allocation4 + $0x250] sm:$0xff]  ;;  %v6450_v35 = vcombine.low %v565_v25, %v569_v26  ;;  %v578_v23 = vld [vmem:[#allocation4 + $0x2f8] sm:$0xff]  ;;  %v6452_v25 = vcombine.low %v566_v13, %v570_v14 }
 0x1ec   : > { %3218 = vmatpush1.bf16.msra.mxu1 %v6752_v34  ;;  %3249 = vmatprep.mubr.bf16.mxu1 %v8277_v0  ;;  %v6443_v21 = vcombine.high %v557_v17, %v561_v18  ;;  %v6442_v27 = vcombine.low %v557_v17, %v561_v18  ;;  %v577_v34 = vld [vmem:[#allocation4 + $0x2f0] sm:$0xff] }
 0x1ed   : > { %3389 = vmatprep.subr.bf16.mxu1 %v6755_v38  ;;  %v534_v38 = vld [vmem:[#allocation4 + $0x198] sm:$0xff] }
 0x1ee   : > { %3265 = vmatpush1.bf16.msra.mxu0 %v6386_v39  ;;  %v538_v39 = vld [vmem:[#allocation4 + $0x1b8] sm:$0xff] }
 0x1ef   : > { %3266 = vmatprep.subr.bf16.mxu0 %v6395_v40  ;;  %v6413_v40 = vcombine.high %v526_v30, %v530_v31  ;;  %v6421_v46 = vcombine.high %v534_v38, %v538_v39 }
 0x1f2   : > { %3267 = vmatpush1.bf16.msra.mxu0 %v6394_v43 }
 0x1f3   : > { %3268 = vmatprep.subr.bf16.mxu0 %v6403_v44  ;;  %v6412_v44 = vcombine.low %v526_v30, %v530_v31  ;;  %v8653_v30 = vld [vmem:[%s8603_s14] ss:$28 sps:$4 sm:$0xff]   ;;  %v582_v31 = vld [vmem:[#allocation4 + $0x318] sm:$0xff] }
 0x1f6   : > { %3269 = vmatpush1.bf16.msra.mxu0 %v6402_v49  ;;  %v542_v49 = vld [vmem:[#allocation4 + $0x1d8] sm:$0xff] }
 0x1f7   : > { %6759 = vmatmul.mubr.msk.bf16.vlgmr.msra.gmra.mrb[4].mxu1 %vm2912_vm0, %v7884_v55  ;;  %3270 = vmatprep.subr.bf16.mxu0 %v6411_v51  ;;  %v6466_v51 = vcombine.low %v581_v41, %v585_v42  ;;  %v594_v41 = vld [vmem:[#allocation4 + $0x378] sm:$0xff] }
 0x1f8   : > { %3390 = vmatpush1.bf16.msra.mxu1 %v6754_v50  ;;  %3421 = vmatprep.mubr.bf16.mxu1 %v8277_v0  ;;  %v546_v50 = vld [vmem:[#allocation4 + $0x1f8] sm:$0xff] }
 0x1f9   : > { %3432 = vmatprep.subr.bf16.mxu1 %v6373_v52  ;;  %v6420_v52 = vcombine.low %v534_v38, %v538_v39  ;;  %v6429_v54 = vcombine.high %v542_v49, %v546_v50  ;;  %v6428_v60 = vcombine.low %v542_v49, %v546_v50  ;;  %v637_v38 = vld [vmem:[#allocation4 + $0x4d0] sm:$0xff]  ;;  %v602_v49 = vld [vmem:[#allocation4 + $0x3b8] sm:$0xff] }
 0x1fa   : > { %3271 = vmatpush1.bf16.msra.mxu0 %v6410_v56  ;;  %v601_v56 = vld [vmem:[#allocation4 + $0x3b0] sm:$0xff] }
 0x1fb   : > { %3272 = vmatprep.subr.bf16.mxu0 %v6419_v57  ;;  %v550_v57 = vld [vmem:[#allocation4 + $0x218] sm:$0xff]  ;;  %v641_v39 = vld [vmem:[#allocation4 + $0x4f0] sm:$0xff] }
 0x1fc   : > { %v6436_v5 = vcombine.low %v550_v57, %v554_v58  ;;  %v6522_v50 = vcombine.low %v637_v38, %v641_v39 }
 0x1fe   : > { %v8642_v6 = vpop.f32.mrb[0].mxu1  ;;  %3273 = vmatpush1.bf16.msra.mxu0 %v6418_v62  ;;  %v6437_v62 = vcombine.high %v550_v57, %v554_v58  ;;  %v610_v57 = vld [vmem:[#allocation4 + $0x3f8] sm:$0xff] }
 0x1ff   : > { %v8644_v8 = vpop.f32.mrb[1].mxu1  ;;  %6760 = vmatmul.mubr.msk.bf16.vlgmr.msra.gmra.mrb[8].mxu1 %vm2912_vm0, %v7884_v55  ;;  %3274 = vmatprep.subr.bf16.mxu0 %v6427_v1  ;;  %v597_v55 = vld [vmem:[#allocation4 + $0x390] sm:$0xff] }
 0x200   : > { %3433 = vmatpush1.bf16.msra.mxu1 %v6372_v63  ;;  %v8647_v10 = vpop.f32.mrb[2].mxu1  ;;  %3464 = vmatprep.mubr.bf16.mxu1 %v8635_v33  ;;  %v573_v33 = vld [vmem:[#allocation4 + $0x2d0] sm:$0xff]  ;;  %v6483_v61 = vcombine.high %v597_v55, %v601_v56  ;;  %v6482_v4 = vcombine.low %v597_v55, %v601_v56  ;;  %v606_v56 = vld [vmem:[#allocation4 + $0x3d8] sm:$0xff] }
 0x201   : > { %v8649_v15 = vpop.f32.mrb[3].mxu1  ;;  %3434 = vmatprep.subr.bf16.mxu1 %v6381_v3  ;;  %v6459_v37 = vcombine.high %v573_v33, %v577_v34  ;;  %v6458_v43 = vcombine.low %v573_v33, %v577_v34  ;;  %v605_v63 = vld [vmem:[#allocation4 + $0x3d0] sm:$0xff]  ;;  %v562_v3 = vld [vmem:[#allocation4 + $0x278] sm:$0xff] }
 0x202   : > { %3275 = vmatpush1.bf16.msra.mxu0 %v6426_v9  ;;  %v609_v1 = vld [vmem:[#allocation4 + $0x3f0] sm:$0xff]  ;;  %v6445_v9 = vcombine.high %v558_v2, %v562_v3  ;;  %v6444_v17 = vcombine.low %v558_v2, %v562_v3  ;;  %v618_v2 = vld [vmem:[#allocation4 + $0x438] sm:$0xff] }
 0x203   : > { %3276 = vmatprep.subr.bf16.mxu0 %v6435_v12  ;;  %v6491_v7 = vcombine.high %v605_v63, %v609_v1  ;;  %v617_v12 = vld [vmem:[#allocation4 + $0x430] sm:$0xff] }
 0x204   : > { %3435 = vmatpush1.bf16.msra.mxu1 %v6380_v11  ;;  %v613_v11 = vld [vmem:[#allocation4 + $0x410] sm:$0xff] }
 0x205   : > { %3436 = vmatprep.subr.bf16.mxu1 %v6389_v16  ;;  %v6490_v16 = vcombine.low %v605_v63, %v609_v1  ;;  %v6499_v18 = vcombine.high %v613_v11, %v617_v12  ;;  %v8657_v34 = vld [vmem:[%s8603_s14 + $0xc] ss:$28 sps:$4 sm:$0xff]  }
 0x206   : > { %3277 = vmatpush1.bf16.msra.mxu0 %v6434_v19  ;;  %v6453_v19 = vcombine.high %v566_v13, %v570_v14  ;;  %v657_v55 = vld [vmem:[#allocation4 + $0x570] sm:$0xff]  ;;  %v614_v1 = vld [vmem:[#allocation4 + $0x418] sm:$0xff] }
 0x207   : > { %3278 = vmatprep.subr.bf16.mxu0 %v6443_v21  ;;  %v625_v21 = vld [vmem:[#allocation4 + $0x470] sm:$0xff]  ;;  %v626_v13 = vld [vmem:[#allocation4 + $0x478] sm:$0xff] }
 0x208   : > { %3437 = vmatpush1.bf16.msra.mxu1 %v6388_v20  ;;  %v621_v20 = vld [vmem:[#allocation4 + $0x450] sm:$0xff] }
 0x209   : > { %3438 = vmatprep.subr.bf16.mxu1 %v6397_v24  ;;  %v6498_v24 = vcombine.low %v613_v11, %v617_v12  ;;  %v6507_v26 = vcombine.high %v621_v20, %v625_v21  ;;  %v6506_v33 = vcombine.low %v621_v20, %v625_v21  ;;  %v665_v63 = vld [vmem:[#allocation4 + $0x5b0] sm:$0xff]  ;;  %v622_v12 = vld [vmem:[#allocation4 + $0x458] sm:$0xff] }
 0x20a   : > { %3279 = vmatpush1.bf16.msra.mxu0 %v6442_v27  ;;  %v6461_v27 = vcombine.high %v574_v22, %v578_v23  ;;  %v673_v11 = vld [vmem:[#allocation4 + $0x5f0] sm:$0xff]  ;;  %v630_v21 = vld [vmem:[#allocation4 + $0x498] sm:$0xff] }
 0x20b   : > { %3280 = vmatprep.subr.bf16.mxu0 %v6451_v29  ;;  %v633_v29 = vld [vmem:[#allocation4 + $0x4b0] sm:$0xff] }
 0x20c   : > { %3439 = vmatpush1.bf16.msra.mxu1 %v6396_v28  ;;  %v629_v28 = vld [vmem:[#allocation4 + $0x490] sm:$0xff] }
 0x20d   : > { %3440 = vmatprep.subr.bf16.mxu1 %v6405_v32  ;;  %v586_v32 = vld [vmem:[#allocation4 + $0x338] sm:$0xff]  ;;  %v6514_v42 = vcombine.low %v629_v28, %v633_v29  ;;  %v681_v20 = vld [vmem:[#allocation4 + $0x630] sm:$0xff] }
 0x20e   : > { %3281 = vmatpush1.bf16.msra.mxu0 %v6450_v35  ;;  %v6460_v35 = vcombine.low %v574_v22, %v578_v23  ;;  %v634_v22 = vld [vmem:[#allocation4 + $0x4b8] sm:$0xff] }
 0x20f   : > { %3282 = vmatprep.subr.bf16.mxu0 %v6459_v37  ;;  %v6469_v37 = vcombine.high %v582_v31, %v586_v32 }
 0x210   : > { %3441 = vmatpush1.bf16.msra.mxu1 %v6404_v36  ;;  %v6515_v36 = vcombine.high %v629_v28, %v633_v29  ;;  %v689_v28 = vld [vmem:[#allocation4 + $0x670] sm:$0xff]  ;;  %v638_v29 = vld [vmem:[#allocation4 + $0x4d8] sm:$0xff] }
 0x211   : > { %3442 = vmatprep.subr.bf16.mxu1 %v6413_v40  ;;  %v590_v40 = vld [vmem:[#allocation4 + $0x358] sm:$0xff] }
 0x212   : > { %3283 = vmatpush1.bf16.msra.mxu0 %v6458_v43  ;;  %v6468_v43 = vcombine.low %v582_v31, %v586_v32  ;;  %v642_v31 = vld [vmem:[#allocation4 + $0x4f8] sm:$0xff] }
 0x213   : > { %3284 = vmatprep.subr.bf16.mxu0 %v6467_v45  ;;  %v6477_v45 = vcombine.high %v590_v40, %v594_v41 }
 0x214   : > { %3443 = vmatpush1.bf16.msra.mxu1 %v6412_v44  ;;  %v6523_v44 = vcombine.high %v637_v38, %v641_v39  ;;  %v646_v38 = vld [vmem:[#allocation4 + $0x518] sm:$0xff] }
 0x215   : > { %3444 = vmatprep.subr.bf16.mxu1 %v6421_v46  ;;  %v645_v46 = vld [vmem:[#allocation4 + $0x510] sm:$0xff]  ;;  %v650_v39 = vld [vmem:[#allocation4 + $0x538] sm:$0xff] }
 0x216   : > { %3285 = vmatpush1.bf16.msra.mxu0 %v6466_v51  ;;  %v6476_v51 = vcombine.low %v590_v40, %v594_v41  ;;  %v6530_v58 = vcombine.low %v645_v46, %v649_v47  ;;  %v6524_v41 = vcombine.low %v638_v29, %v642_v31 }
 0x217   : > { %3286 = vmatprep.subr.bf16.mxu0 %v6475_v53  ;;  %v6485_v53 = vcombine.high %v598_v48, %v602_v49 }
 0x218   : > { %3445 = vmatpush1.bf16.msra.mxu1 %v6420_v52  ;;  %v6531_v52 = vcombine.high %v645_v46, %v649_v47  ;;  %v658_v46 = vld [vmem:[#allocation4 + $0x578] sm:$0xff] }
 0x219   : > { %3446 = vmatprep.subr.bf16.mxu1 %v6429_v54  ;;  %v653_v54 = vld [vmem:[#allocation4 + $0x550] sm:$0xff] }
 0x21a   : > { %3287 = vmatpush1.bf16.msra.mxu0 %v6474_v59  ;;  %v6484_v59 = vcombine.low %v598_v48, %v602_v49  ;;  %v6538_v3 = vcombine.low %v653_v54, %v657_v55  ;;  %v6532_v48 = vcombine.low %v646_v38, %v650_v39 }
 0x21b   : > { %3288 = vmatprep.subr.bf16.mxu0 %v6483_v61  ;;  %v6493_v61 = vcombine.high %v606_v56, %v610_v57 }
 0x21c   : > { %3447 = vmatpush1.bf16.msra.mxu1 %v6428_v60  ;;  %v6539_v60 = vcombine.high %v653_v54, %v657_v55  ;;  %v666_v54 = vld [vmem:[#allocation4 + $0x5b8] sm:$0xff] }
 0x21d   : > { %3448 = vmatprep.subr.bf16.mxu1 %v6437_v62  ;;  %v661_v62 = vld [vmem:[#allocation4 + $0x590] sm:$0xff] }
 0x21e   : > { %3289 = vmatpush1.bf16.msra.mxu0 %v6482_v4  ;;  %v6492_v4 = vcombine.low %v606_v56, %v610_v57  ;;  %v6546_v14 = vcombine.low %v661_v62, %v665_v63 }
 0x21f   : > { %3290 = vmatprep.subr.bf16.mxu0 %v6491_v7  ;;  %v6501_v7 = vcombine.high %v614_v1, %v618_v2 }
 0x220   : > { %3449 = vmatpush1.bf16.msra.mxu1 %v6436_v5  ;;  %v6547_v5 = vcombine.high %v661_v62, %v665_v63  ;;  %v674_v62 = vld [vmem:[#allocation4 + $0x5f8] sm:$0xff] }
 0x221   : > { %3450 = vmatprep.subr.bf16.mxu1 %v6445_v9  ;;  %v669_v9 = vld [vmem:[#allocation4 + $0x5d0] sm:$0xff] }
 0x222   : > { %3291 = vmatpush1.bf16.msra.mxu0 %v6490_v16  ;;  %v6500_v16 = vcombine.low %v614_v1, %v618_v2  ;;  %v6554_v23 = vcombine.low %v669_v9, %v673_v11 }
 0x223   : > { %3303 = vmatprep.subr.bf16.mxu0 %v6499_v18  ;;  %v6509_v18 = vcombine.high %v622_v12, %v626_v13 }
 0x224   : > { %3451 = vmatpush1.bf16.msra.mxu1 %v6444_v17  ;;  %v6555_v17 = vcombine.high %v669_v9, %v673_v11  ;;  %v682_v9 = vld [vmem:[#allocation4 + $0x638] sm:$0xff] }
 0x225   : > { %3452 = vmatprep.subr.bf16.mxu1 %v6453_v19  ;;  %3293 = vmatmul.mubr.bf16.vlgmr.msra.gmra.mrb[4].mxu0 %v8653_v30  ;;  %v677_v19 = vld [vmem:[#allocation4 + $0x610] sm:$0xff] }
 0x226   : > { %3304 = vmatpush1.bf16.msra.mxu0 %v6498_v24  ;;  %3335 = vmatprep.mubr.bf16.mxu0 %v8657_v34  ;;  %v6508_v24 = vcombine.low %v622_v12, %v626_v13  ;;  %v6562_v32 = vcombine.low %v677_v19, %v681_v20 }
 0x227   : > { %3305 = vmatprep.subr.bf16.mxu0 %v6507_v26  ;;  %v6517_v26 = vcombine.high %v630_v21, %v634_v22 }
 0x228   : > { %3453 = vmatpush1.bf16.msra.mxu1 %v6452_v25  ;;  %v6563_v25 = vcombine.high %v677_v19, %v681_v20  ;;  %v690_v19 = vld [vmem:[#allocation4 + $0x678] sm:$0xff] }
 0x229   : > { %3454 = vmatprep.subr.bf16.mxu1 %v6461_v27  ;;  %v685_v27 = vld [vmem:[#allocation4 + $0x650] sm:$0xff] }
 0x22a   : > { %3306 = vmatpush1.bf16.msra.mxu0 %v6506_v33  ;;  %v6516_v33 = vcombine.low %v630_v21, %v634_v22  ;;  %v6570_v40 = vcombine.low %v685_v27, %v689_v28 }
 0x22b   : > { %3307 = vmatprep.subr.bf16.mxu0 %v6515_v36  ;;  %v693_v36 = vld [vmem:[#allocation4 + $0x690] sm:$0xff] }
 0x22c   : > { %3455 = vmatpush1.bf16.msra.mxu1 %v6460_v35  ;;  %v6525_v35 = vcombine.high %v638_v29, %v642_v31 }
 0x22d   : > { %3456 = vmatprep.subr.bf16.mxu1 %v6469_v37  ;;  %v697_v37 = vld [vmem:[#allocation4 + $0x6b0] sm:$0xff] }
 0x22e   : > { %3308 = vmatpush1.bf16.msra.mxu0 %v6514_v42  ;;  %v6533_v42 = vcombine.high %v646_v38, %v650_v39  ;;  %v6578_v47 = vcombine.low %v693_v36, %v697_v37 }
 0x22f   : > { %3309 = vmatprep.subr.bf16.mxu0 %v6523_v44  ;;  %v705_v44 = vld [vmem:[#allocation4 + $0x6f0] sm:$0xff] }
 0x230   : > { %3457 = vmatpush1.bf16.msra.mxu1 %v6468_v43  ;;  %v701_v43 = vld [vmem:[#allocation4 + $0x6d0] sm:$0xff] }
 0x231   : > { %3458 = vmatprep.subr.bf16.mxu1 %v6477_v45  ;;  %v654_v45 = vld [vmem:[#allocation4 + $0x558] sm:$0xff]  ;;  %v6587_v49 = vcombine.high %v701_v43, %v705_v44  ;;  %v6586_v55 = vcombine.low %v701_v43, %v705_v44 }
 0x232   : > { %3310 = vmatpush1.bf16.msra.mxu0 %v6522_v50  ;;  %v6541_v50 = vcombine.high %v654_v45, %v658_v46  ;;  %v6540_v56 = vcombine.low %v654_v45, %v658_v46  ;;  %v710_v43 = vld [vmem:[#allocation4 + $0x718] sm:$0xff] }
 0x233   : > { %3311 = vmatprep.subr.bf16.mxu0 %v6531_v52  ;;  %v713_v52 = vld [vmem:[#allocation4 + $0x730] sm:$0xff]  ;;  %v714_v44 = vld [vmem:[#allocation4 + $0x738] sm:$0xff] }
 0x234   : > { %3459 = vmatpush1.bf16.msra.mxu1 %v6476_v51  ;;  %v709_v51 = vld [vmem:[#allocation4 + $0x710] sm:$0xff]  ;;  %v8667_v46 = vld [vmem:[%s8603_s14 + $0x14] ss:$28 sps:$4 sm:$0xff]  }
 0x235   : > { %3460 = vmatprep.subr.bf16.mxu1 %v6485_v53  ;;  %v662_v53 = vld [vmem:[#allocation4 + $0x598] sm:$0xff]  ;;  %v6595_v57 = vcombine.high %v709_v51, %v713_v52  ;;  %v6594_v63 = vcombine.low %v709_v51, %v713_v52  ;;  %v769_v51 = vld [vmem:[#allocation4 + $0x8f0] sm:$0xff] }
 0x236   : > { %3312 = vmatpush1.bf16.msra.mxu0 %v6530_v58  ;;  %v6549_v58 = vcombine.high %v662_v53, %v666_v54  ;;  %v6548_v1 = vcombine.low %v662_v53, %v666_v54  ;;  %v718_v52 = vld [vmem:[#allocation4 + $0x758] sm:$0xff] }
 0x237   : > { %3313 = vmatprep.subr.bf16.mxu0 %v6539_v60  ;;  %v721_v60 = vld [vmem:[#allocation4 + $0x770] sm:$0xff]  ;;  %v722_v53 = vld [vmem:[#allocation4 + $0x778] sm:$0xff] }
 0x238   : > { %3461 = vmatpush1.bf16.msra.mxu1 %v6484_v59  ;;  %v717_v59 = vld [vmem:[#allocation4 + $0x750] sm:$0xff] }
 0x239   : > { %3462 = vmatprep.subr.bf16.mxu1 %v6493_v61  ;;  %v670_v61 = vld [vmem:[#allocation4 + $0x5d8] sm:$0xff]  ;;  %v6603_v2 = vcombine.high %v717_v59, %v721_v60  ;;  %v6602_v11 = vcombine.low %v717_v59, %v721_v60  ;;  %v777_v59 = vld [vmem:[#allocation4 + $0x930] sm:$0xff] }
 0x23a   : > { %3314 = vmatpush1.bf16.msra.mxu0 %v6538_v3  ;;  %v6557_v3 = vcombine.high %v670_v61, %v674_v62  ;;  %v6556_v12 = vcombine.low %v670_v61, %v674_v62  ;;  %v726_v60 = vld [vmem:[#allocation4 + $0x798] sm:$0xff] }
 0x23b   : > { %3315 = vmatprep.subr.bf16.mxu0 %v6547_v5  ;;  %v729_v5 = vld [vmem:[#allocation4 + $0x7b0] sm:$0xff]  ;;  %v730_v61 = vld [vmem:[#allocation4 + $0x7b8] sm:$0xff] }
 0x23c   : > { %3463 = vmatpush1.bf16.msra.mxu1 %v6492_v4  ;;  %v725_v4 = vld [vmem:[#allocation4 + $0x790] sm:$0xff] }
 0x23d   : > { %3475 = vmatprep.subr.bf16.mxu1 %v6501_v7  ;;  %v678_v7 = vld [vmem:[#allocation4 + $0x618] sm:$0xff]  ;;  %v6611_v13 = vcombine.high %v725_v4, %v729_v5  ;;  %v6610_v20 = vcombine.low %v725_v4, %v729_v5  ;;  %v785_v4 = vld [vmem:[#allocation4 + $0x970] sm:$0xff] }
 0x23e   : > { %3316 = vmatpush1.bf16.msra.mxu0 %v6546_v14  ;;  %v6565_v14 = vcombine.high %v678_v7, %v682_v9  ;;  %v6564_v21 = vcombine.low %v678_v7, %v682_v9  ;;  %v734_v5 = vld [vmem:[#allocation4 + $0x7d8] sm:$0xff] }
 0x23f   : > { %3465 = vmatmul.mubr.bf16.vlgmr.msra.gmra.mrb[12].mxu1 %v8653_v30  ;;  %3317 = vmatprep.subr.bf16.mxu0 %v6555_v17  ;;  %v6571_v30 = vcombine.high %v685_v27, %v689_v28  ;;  %v737_v17 = vld [vmem:[#allocation4 + $0x7f0] sm:$0xff]  ;;  %v698_v27 = vld [vmem:[#allocation4 + $0x6b8] sm:$0xff] }
 0x240   : > { %3476 = vmatpush1.bf16.msra.mxu1 %v6500_v16  ;;  %3507 = vmatprep.mubr.bf16.mxu1 %v8657_v34  ;;  %v6579_v34 = vcombine.high %v693_v36, %v697_v37  ;;  %v733_v16 = vld [vmem:[#allocation4 + $0x7d0] sm:$0xff]  ;;  %v706_v36 = vld [vmem:[#allocation4 + $0x6f8] sm:$0xff] }
 0x241   : > { %3477 = vmatprep.subr.bf16.mxu1 %v6509_v18  ;;  %v686_v18 = vld [vmem:[#allocation4 + $0x658] sm:$0xff]  ;;  %v6619_v22 = vcombine.high %v733_v16, %v737_v17  ;;  %v6618_v28 = vcombine.low %v733_v16, %v737_v17  ;;  %v793_v16 = vld [vmem:[#allocation4 + $0x9b0] sm:$0xff] }
 0x242   : > { %3318 = vmatpush1.bf16.msra.mxu0 %v6554_v23  ;;  %v6573_v23 = vcombine.high %v686_v18, %v690_v19  ;;  %v6572_v29 = vcombine.low %v686_v18, %v690_v19  ;;  %v738_v7 = vld [vmem:[#allocation4 + $0x7f8] sm:$0xff] }
 0x243   : > { %3319 = vmatprep.subr.bf16.mxu0 %v6563_v25  ;;  %v745_v25 = vld [vmem:[#allocation4 + $0x830] sm:$0xff]  ;;  %v742_v17 = vld [vmem:[#allocation4 + $0x818] sm:$0xff] }
 0x244   : > { %3478 = vmatpush1.bf16.msra.mxu1 %v6508_v24  ;;  %v741_v24 = vld [vmem:[#allocation4 + $0x810] sm:$0xff]  ;;  %v746_v18 = vld [vmem:[#allocation4 + $0x838] sm:$0xff] }
 0x245   : > { %3479 = vmatprep.subr.bf16.mxu1 %v6517_v26  ;;  %v694_v26 = vld [vmem:[#allocation4 + $0x698] sm:$0xff]  ;;  %v6627_v31 = vcombine.high %v741_v24, %v745_v25  ;;  %v6626_v37 = vcombine.low %v741_v24, %v745_v25  ;;  %v801_v24 = vld [vmem:[#allocation4 + $0x9f0] sm:$0xff] }
 0x246   : > { %3320 = vmatpush1.bf16.msra.mxu0 %v6562_v32  ;;  %v6581_v32 = vcombine.high %v694_v26, %v698_v27  ;;  %v6580_v38 = vcombine.low %v694_v26, %v698_v27  ;;  %v750_v25 = vld [vmem:[#allocation4 + $0x858] sm:$0xff] }
 0x247   : > { %3321 = vmatprep.subr.bf16.mxu0 %v6571_v30  ;;  %v753_v30 = vld [vmem:[#allocation4 + $0x870] sm:$0xff]  ;;  %v754_v26 = vld [vmem:[#allocation4 + $0x878] sm:$0xff] }
 0x248   : > { %3480 = vmatpush1.bf16.msra.mxu1 %v6516_v33  ;;  %v749_v33 = vld [vmem:[#allocation4 + $0x850] sm:$0xff] }
 0x249   : > { %3481 = vmatprep.subr.bf16.mxu1 %v6525_v35  ;;  %v702_v35 = vld [vmem:[#allocation4 + $0x6d8] sm:$0xff]  ;;  %v6635_v39 = vcombine.high %v749_v33, %v753_v30  ;;  %v6634_v45 = vcombine.low %v749_v33, %v753_v30  ;;  %v809_v33 = vld [vmem:[#allocation4 + $0xa30] sm:$0xff] }
 0x24a   : > { %3322 = vmatpush1.bf16.msra.mxu0 %v6570_v40  ;;  %v6589_v40 = vcombine.high %v702_v35, %v706_v36  ;;  %v758_v30 = vld [vmem:[#allocation4 + $0x898] sm:$0xff] }
 0x24b   : > { %3323 = vmatprep.subr.bf16.mxu0 %v6579_v34  ;;  %v761_v34 = vld [vmem:[#allocation4 + $0x8b0] sm:$0xff] }
 0x24c   : > { %3482 = vmatpush1.bf16.msra.mxu1 %v6524_v41  ;;  %v757_v41 = vld [vmem:[#allocation4 + $0x890] sm:$0xff] }
 0x24d   : > { %3483 = vmatprep.subr.bf16.mxu1 %v6533_v42  ;;  %v8663_v42 = vld [vmem:[%s8603_s14 + $0x8] ss:$28 sps:$4 sm:$0xff]   ;;  %v6642_v54 = vcombine.low %v757_v41, %v761_v34 }
 0x24e   : > { %3324 = vmatpush1.bf16.msra.mxu0 %v6578_v47  ;;  %v6588_v47 = vcombine.low %v702_v35, %v706_v36  ;;  %v762_v35 = vld [vmem:[#allocation4 + $0x8b8] sm:$0xff] }
 0x24f   : > { %3325 = vmatprep.subr.bf16.mxu0 %v6587_v49  ;;  %v6597_v49 = vcombine.high %v710_v43, %v714_v44 }
 0x250   : > { %3484 = vmatpush1.bf16.msra.mxu1 %v6532_v48  ;;  %v6643_v48 = vcombine.high %v757_v41, %v761_v34  ;;  %v817_v41 = vld [vmem:[#allocation4 + $0xa70] sm:$0xff]  ;;  %v766_v34 = vld [vmem:[#allocation4 + $0x8d8] sm:$0xff] }
 0x251   : > { %3485 = vmatprep.subr.bf16.mxu1 %v6541_v50  ;;  %v765_v50 = vld [vmem:[#allocation4 + $0x8d0] sm:$0xff] }
 0x252   : > { %3326 = vmatpush1.bf16.msra.mxu0 %v6586_v55  ;;  %v6596_v55 = vcombine.low %v710_v43, %v714_v44  ;;  %v6650_v62 = vcombine.low %v765_v50, %v769_v51  ;;  %v770_v43 = vld [vmem:[#allocation4 + $0x8f8] sm:$0xff] }
 0x253   : > { %3327 = vmatprep.subr.bf16.mxu0 %v6595_v57  ;;  %v6605_v57 = vcombine.high %v718_v52, %v722_v53 }
 0x254   : > { %3486 = vmatpush1.bf16.msra.mxu1 %v6540_v56  ;;  %v6651_v56 = vcombine.high %v765_v50, %v769_v51  ;;  %v774_v50 = vld [vmem:[#allocation4 + $0x918] sm:$0xff] }
 0x255   : > { %3487 = vmatprep.subr.bf16.mxu1 %v6549_v58  ;;  %v773_v58 = vld [vmem:[#allocation4 + $0x910] sm:$0xff]  ;;  %v778_v51 = vld [vmem:[#allocation4 + $0x938] sm:$0xff] }
 0x256   : > { %3328 = vmatpush1.bf16.msra.mxu0 %v6594_v63  ;;  %v6604_v63 = vcombine.low %v718_v52, %v722_v53  ;;  %v6658_v9 = vcombine.low %v773_v58, %v777_v59  ;;  %v6652_v53 = vcombine.low %v766_v34, %v770_v43 }
 0x257   : > { %3329 = vmatprep.subr.bf16.mxu0 %v6603_v2  ;;  %v6613_v2 = vcombine.high %v726_v60, %v730_v61 }
 0x258   : > { %3488 = vmatpush1.bf16.msra.mxu1 %v6548_v1  ;;  %v6659_v1 = vcombine.high %v773_v58, %v777_v59  ;;  %v786_v58 = vld [vmem:[#allocation4 + $0x978] sm:$0xff] }
 0x259   : > { %3489 = vmatprep.subr.bf16.mxu1 %v6557_v3  ;;  %v781_v3 = vld [vmem:[#allocation4 + $0x950] sm:$0xff] }
 0x25a   : > { %3330 = vmatpush1.bf16.msra.mxu0 %v6602_v11  ;;  %v6612_v11 = vcombine.low %v726_v60, %v730_v61  ;;  %v6666_v19 = vcombine.low %v781_v3, %v785_v4  ;;  %v6660_v60 = vcombine.low %v774_v50, %v778_v51 }
 0x25b   : > { %3331 = vmatprep.subr.bf16.mxu0 %v6611_v13  ;;  %v6621_v13 = vcombine.high %v734_v5, %v738_v7 }
 0x25c   : > { %3490 = vmatpush1.bf16.msra.mxu1 %v6556_v12  ;;  %v6667_v12 = vcombine.high %v781_v3, %v785_v4  ;;  %v794_v3 = vld [vmem:[#allocation4 + $0x9b8] sm:$0xff] }
 0x25d   : > { %3491 = vmatprep.subr.bf16.mxu1 %v6565_v14  ;;  %v789_v14 = vld [vmem:[#allocation4 + $0x990] sm:$0xff] }
 0x25e   : > { %3332 = vmatpush1.bf16.msra.mxu0 %v6610_v20  ;;  %v6620_v20 = vcombine.low %v734_v5, %v738_v7  ;;  %v6674_v27 = vcombine.low %v789_v14, %v793_v16 }
 0x25f   : > { %3333 = vmatprep.subr.bf16.mxu0 %v6619_v22  ;;  %v6629_v22 = vcombine.high %v742_v17, %v746_v18 }
 0x260   : > { %3492 = vmatpush1.bf16.msra.mxu1 %v6564_v21  ;;  %v6675_v21 = vcombine.high %v789_v14, %v793_v16  ;;  %v802_v14 = vld [vmem:[#allocation4 + $0x9f8] sm:$0xff] }
 0x261   : > { %3493 = vmatprep.subr.bf16.mxu1 %v6573_v23  ;;  %v797_v23 = vld [vmem:[#allocation4 + $0x9d0] sm:$0xff] }
 0x262   : > { %3334 = vmatpush1.bf16.msra.mxu0 %v6618_v28  ;;  %v6628_v28 = vcombine.low %v742_v17, %v746_v18  ;;  %v6682_v36 = vcombine.low %v797_v23, %v801_v24 }
 0x263   : > { %3346 = vmatprep.subr.bf16.mxu0 %v6627_v31  ;;  %v6637_v31 = vcombine.high %v750_v25, %v754_v26 }
 0x264   : > { %3494 = vmatpush1.bf16.msra.mxu1 %v6572_v29  ;;  %v6683_v29 = vcombine.high %v797_v23, %v801_v24  ;;  %v810_v23 = vld [vmem:[#allocation4 + $0xa38] sm:$0xff] }
 0x265   : > { %3495 = vmatprep.subr.bf16.mxu1 %v6581_v32  ;;  %3336 = vmatmul.mubr.bf16.vlgmr.msra.gmra.mrb[4].mxu0 %v8663_v42  ;;  %v805_v32 = vld [vmem:[#allocation4 + $0xa10] sm:$0xff] }
 0x266   : > { %3347 = vmatpush1.bf16.msra.mxu0 %v6626_v37  ;;  %3378 = vmatprep.mubr.bf16.mxu0 %v8667_v46  ;;  %v6636_v37 = vcombine.low %v750_v25, %v754_v26  ;;  %v6690_v44 = vcombine.low %v805_v32, %v809_v33 }
 0x267   : > { %3348 = vmatprep.subr.bf16.mxu0 %v6635_v39  ;;  %v6645_v39 = vcombine.high %v758_v30, %v762_v35 }
 0x268   : > { %3496 = vmatpush1.bf16.msra.mxu1 %v6580_v38  ;;  %v6691_v38 = vcombine.high %v805_v32, %v809_v33  ;;  %v818_v32 = vld [vmem:[#allocation4 + $0xa78] sm:$0xff] }
 0x269   : > { %3497 = vmatprep.subr.bf16.mxu1 %v6589_v40  ;;  %v813_v40 = vld [vmem:[#allocation4 + $0xa50] sm:$0xff] }
 0x26a   : > { %3349 = vmatpush1.bf16.msra.mxu0 %v6634_v45  ;;  %v6644_v45 = vcombine.low %v758_v30, %v762_v35  ;;  %v6698_v52 = vcombine.low %v813_v40, %v817_v41 }
 0x26b   : > { %3350 = vmatprep.subr.bf16.mxu0 %v6643_v48  ;;  %v821_v48 = vld [vmem:[#allocation4 + $0xa90] sm:$0xff] }
 0x26c   : > { %3498 = vmatpush1.bf16.msra.mxu1 %v6588_v47  ;;  %v6653_v47 = vcombine.high %v766_v34, %v770_v43  ;;  %v830_v43 = vld [vmem:[#allocation4 + $0xad8] sm:$0xff] }
 0x26d   : > { %3499 = vmatprep.subr.bf16.mxu1 %v6597_v49  ;;  %v825_v49 = vld [vmem:[#allocation4 + $0xab0] sm:$0xff] }
 0x26e   : > { %3351 = vmatpush1.bf16.msra.mxu0 %v6642_v54  ;;  %v6661_v54 = vcombine.high %v774_v50, %v778_v51  ;;  %v6706_v59 = vcombine.low %v821_v48, %v825_v49  ;;  %v838_v50 = vld [vmem:[#allocation4 + $0xb18] sm:$0xff] }
 0x26f   : > { %3352 = vmatprep.subr.bf16.mxu0 %v6651_v56  ;;  %v833_v56 = vld [vmem:[#allocation4 + $0xaf0] sm:$0xff]  ;;  %v842_v51 = vld [vmem:[#allocation4 + $0xb38] sm:$0xff] }
 0x270   : > { %3500 = vmatpush1.bf16.msra.mxu1 %v6596_v55  ;;  %v829_v55 = vld [vmem:[#allocation4 + $0xad0] sm:$0xff] }
 0x271   : > { %3501 = vmatprep.subr.bf16.mxu1 %v6605_v57  ;;  %v782_v57 = vld [vmem:[#allocation4 + $0x958] sm:$0xff]  ;;  %v6715_v61 = vcombine.high %v829_v55, %v833_v56  ;;  %v6714_v4 = vcombine.low %v829_v55, %v833_v56 }
 0x272   : > { %3353 = vmatpush1.bf16.msra.mxu0 %v6650_v62  ;;  %v6669_v62 = vcombine.high %v782_v57, %v786_v58  ;;  %v6668_v5 = vcombine.low %v782_v57, %v786_v58  ;;  %v846_v55 = vld [vmem:[#allocation4 + $0xb58] sm:$0xff]  ;;  %v877_v57 = vlaneseq }
 0x273   : > { %3354 = vmatprep.subr.bf16.mxu0 %v6659_v1  ;;  %v841_v1 = vld [vmem:[#allocation4 + $0xb30] sm:$0xff]  ;;  %v850_v56 = vld [vmem:[#allocation4 + $0xb78] sm:$0xff] }
 0x274   : > { %3502 = vmatpush1.bf16.msra.mxu1 %v6604_v63  ;;  %v837_v63 = vld [vmem:[#allocation4 + $0xb10] sm:$0xff]  ;;  %v7457_v58 = vld [vmem:[#allocation7 + $0x40] ss:$16 sps:$4 sm:$0xff]  }
 0x275   : > { %3503 = vmatprep.subr.bf16.mxu1 %v6613_v2  ;;  %v790_v2 = vld [vmem:[#allocation4 + $0x998] sm:$0xff]  ;;  %v6723_v7 = vcombine.high %v837_v63, %v841_v1  ;;  %v6722_v16 = vcombine.low %v837_v63, %v841_v1  ;;  %v8676_v1 = vshrl.u32 %v877_v57, 7 }
 0x276   : > { %3355 = vmatpush1.bf16.msra.mxu0 %v6658_v9  ;;  %v6677_v9 = vcombine.high %v790_v2, %v794_v3  ;;  %v6676_v17 = vcombine.low %v790_v2, %v794_v3  ;;  %v858_v63 = vld [vmem:[#allocation4 + $0xbb8] sm:$0xff]  ;;  %v6732_v3 = vcombine.low %v846_v55, %v850_v56 }
 0x277   : > { %3356 = vmatprep.subr.bf16.mxu0 %v6667_v12  ;;  %v849_v12 = vld [vmem:[#allocation4 + $0xb70] sm:$0xff]  ;;  %v7460_v2 = vld [vmem:[#allocation7 + $0x60] ss:$16 sps:$4 sm:$0xff]  }
 0x278   : > { %3504 = vmatpush1.bf16.msra.mxu1 %v6612_v11  ;;  %v845_v11 = vld [vmem:[#allocation4 + $0xb50] sm:$0xff] }
 0x279   : > { %3505 = vmatprep.subr.bf16.mxu1 %v6621_v13  ;;  %v798_v13 = vld [vmem:[#allocation4 + $0x9d8] sm:$0xff]  ;;  %v6731_v18 = vcombine.high %v845_v11, %v849_v12  ;;  %v6730_v24 = vcombine.low %v845_v11, %v849_v12 }
 0x27a   : > { %3357 = vmatpush1.bf16.msra.mxu0 %v6666_v19  ;;  %v6685_v19 = vcombine.high %v798_v13, %v802_v14  ;;  %v6684_v25 = vcombine.low %v798_v13, %v802_v14  ;;  %v866_v11 = vld [vmem:[#allocation4 + $0xbf8] sm:$0xff]  ;;  %v8679_v13 = vld [vmem:[#allocation6] sm:$0xff]  ;;  %v883_v14 = vsub.s32 1, %v8676_v1 }
 0x27b   : > { %3358 = vmatprep.subr.bf16.mxu0 %v6675_v21  ;;  %v857_v21 = vld [vmem:[#allocation4 + $0xbb0] sm:$0xff]  ;;  %v7463_v12 = vld [vmem:[#allocation7 + $0x80] ss:$16 sps:$4 sm:$0xff]  }
 0x27c   : > { %3506 = vmatpush1.bf16.msra.mxu1 %v6620_v20  ;;  %v853_v20 = vld [vmem:[#allocation4 + $0xb90] sm:$0xff] }
 0x27d   : > { %3518 = vmatprep.subr.bf16.mxu1 %v6629_v22  ;;  %v806_v22 = vld [vmem:[#allocation4 + $0xa18] sm:$0xff]  ;;  %v6739_v26 = vcombine.high %v853_v20, %v857_v21  ;;  %v6738_v33 = vcombine.low %v853_v20, %v857_v21 }
 0x27e   : > { %3359 = vmatpush1.bf16.msra.mxu0 %v6674_v27  ;;  %v6693_v27 = vcombine.high %v806_v22, %v810_v23  ;;  %v6692_v30 = vcombine.low %v806_v22, %v810_v23  ;;  %v870_v20 = vld [vmem:[#allocation4 + $0xc18] sm:$0xff]  ;;  %v884_v22 = vrot.slane %v8679_v13, %v883_v14 }
 0x27f   : > { %3508 = vmatmul.mubr.bf16.vlgmr.msra.gmra.mrb[12].mxu1 %v8663_v42  ;;  %3360 = vmatprep.subr.bf16.mxu0 %v6683_v29  ;;  %v6699_v42 = vcombine.high %v813_v40, %v817_v41  ;;  %v865_v29 = vld [vmem:[#allocation4 + $0xbf0] sm:$0xff]  ;;  %v7453_v41 = vld [vmem:[#allocation7 + $0x4] ss:$16 sps:$4 sm:$0xff]   ;;  %v7466_v23 = vld [vmem:[#allocation7 + $0xa0] ss:$16 sps:$4 sm:$0xff]  }
 0x280   : > { %3519 = vmatpush1.bf16.msra.mxu1 %v6628_v28  ;;  %3550 = vmatprep.mubr.bf16.mxu1 %v8667_v46  ;;  %v6707_v46 = vcombine.high %v821_v48, %v825_v49  ;;  %v861_v28 = vld [vmem:[#allocation4 + $0xbd0] sm:$0xff]  ;;  %v874_v21 = vld [vmem:[#allocation4 + $0xc38] sm:$0xff] }
 0x281   : > { %3520 = vmatprep.subr.bf16.mxu1 %v6637_v31  ;;  %v814_v31 = vld [vmem:[#allocation4 + $0xa58] sm:$0xff]  ;;  %v6747_v35 = vcombine.high %v861_v28, %v865_v29 }
 0x282   : > { %3361 = vmatpush1.bf16.msra.mxu0 %v6682_v36  ;;  %v6701_v36 = vcombine.high %v814_v31, %v818_v32  ;;  %v6700_v40 = vcombine.low %v814_v31, %v818_v32  ;;  %v8673_v49 = vld [vmem:[%s8603_s14 + $0x10] ss:$28 sps:$4 sm:$0xff]  }
 0x283   : > { %3362 = vmatprep.subr.bf16.mxu0 %v6691_v38  ;;  %v826_v38 = vld [vmem:[#allocation4 + $0xab8] sm:$0xff] }
 0x284   : > { %3521 = vmatpush1.bf16.msra.mxu1 %v6636_v37  ;;  %v822_v37 = vld [vmem:[#allocation4 + $0xa98] sm:$0xff] }
 0x285   : > { %3522 = vmatprep.subr.bf16.mxu1 %v6645_v39  ;;  %v6746_v39 = vcombine.low %v861_v28, %v865_v29  ;;  %v6709_v34 = vcombine.high %v822_v37, %v826_v38 }
 0x286   : > { %3363 = vmatpush1.bf16.msra.mxu0 %v6690_v44  ;;  %v834_v44 = vld [vmem:[#allocation4 + $0xaf8] sm:$0xff] }
 0x287   : > { %3364 = vmatprep.subr.bf16.mxu0 %v6699_v42  ;;  %v6708_v42 = vcombine.low %v822_v37, %v826_v38  ;;  %v6717_v48 = vcombine.high %v830_v43, %v834_v44  ;;  %v6756_v37 = vcombine.low %v870_v20, %v874_v21  ;;  %v7474_v38 = vld [vmem:[#allocation7 + $0xe4] ss:$16 sps:$4 sm:$0xff]  }
 0x288   : > { %3523 = vmatpush1.bf16.msra.mxu1 %v6644_v45  ;;  %v7451_v45 = vld [vmem:[#allocation7] ss:$16 sps:$4 sm:$0xff]  }
 0x289   : > { %3524 = vmatprep.subr.bf16.mxu1 %v6653_v47  ;;  %v7456_v47 = vld [vmem:[#allocation7 + $0x24] ss:$16 sps:$4 sm:$0xff]  }
 0x28a   : > { %3365 = vmatpush1.bf16.msra.mxu0 %v6698_v52  ;;  %v7454_v52 = vld [vmem:[#allocation7 + $0x20] ss:$16 sps:$4 sm:$0xff]  }
 0x28b   : > { %3366 = vmatprep.subr.bf16.mxu0 %v6707_v46  ;;  %v7459_v46 = vld [vmem:[#allocation7 + $0x44] ss:$16 sps:$4 sm:$0xff]  }
 0x28c   : > { %3525 = vmatpush1.bf16.msra.mxu1 %v6652_v53  ;;  %v6716_v53 = vcombine.low %v830_v43, %v834_v44  ;;  %v7472_v44 = vld [vmem:[#allocation7 + $0xe0] ss:$16 sps:$4 sm:$0xff]  }
 0x28d   : > { %3526 = vmatprep.subr.bf16.mxu1 %v6661_v54  ;;  %v6725_v54 = vcombine.high %v838_v50, %v842_v51 }
 0x28e   : > { %3367 = vmatpush1.bf16.msra.mxu0 %v6706_v59  ;;  %v6724_v59 = vcombine.low %v838_v50, %v842_v51  ;;  %v7475_v50 = vld [vmem:[#allocation7 + $0x100] ss:$16 sps:$4 sm:$0xff]   ;;  %v7483_v51 = vld [vmem:[#allocation7 + $0x124] ss:$16 sps:$4 sm:$0xff]  }
 0x28f   : > { %3368 = vmatprep.subr.bf16.mxu0 %v6715_v61  ;;  %v6733_v61 = vcombine.high %v846_v55, %v850_v56  ;;  %v7489_v55 = vld [vmem:[#allocation7 + $0x144] ss:$16 sps:$4 sm:$0xff]  }
 0x290   : > { %3527 = vmatpush1.bf16.msra.mxu1 %v6660_v60  ;;  %v7462_v60 = vld [vmem:[#allocation7 + $0x64] ss:$16 sps:$4 sm:$0xff]  }
 0x291   : > { %3528 = vmatprep.subr.bf16.mxu1 %v6669_v62  ;;  %v854_v62 = vld [vmem:[#allocation4 + $0xb98] sm:$0xff] }
 0x292   : > { %3369 = vmatpush1.bf16.msra.mxu0 %v6714_v4  ;;  %v7465_v4 = vld [vmem:[#allocation7 + $0x84] ss:$16 sps:$4 sm:$0xff]  }
 0x293   : > { %3370 = vmatprep.subr.bf16.mxu0 %v6723_v7  ;;  %v879_v7 = vsub.s32 0, %v8676_v1 }
 0x294   : > { %3529 = vmatpush1.bf16.msra.mxu1 %v6668_v5  ;;  %v6741_v5 = vcombine.high %v854_v62, %v858_v63 }
 0x295   : > { %3530 = vmatprep.subr.bf16.mxu1 %v6677_v9  ;;  %v862_v9 = vld [vmem:[#allocation4 + $0xbd8] sm:$0xff] }
 0x296   : > { %3371 = vmatpush1.bf16.msra.mxu0 %v6722_v16  ;;  %v6740_v16 = vcombine.low %v854_v62, %v858_v63  ;;  %v7484_v63 = vld [vmem:[#allocation7 + $0x28] ss:$16 sps:$4 sm:$0xff]  }
 0x297   : > { %3372 = vmatprep.subr.bf16.mxu0 %v6731_v18  ;;  %v6749_v18 = vcombine.high %v862_v9, %v866_v11 }
 0x298   : > { %3531 = vmatpush1.bf16.msra.mxu1 %v6676_v17  ;;  %v7468_v17 = vld [vmem:[#allocation7 + $0xa4] ss:$16 sps:$4 sm:$0xff]  }
 0x299   : > { %3532 = vmatprep.subr.bf16.mxu1 %v6685_v19  ;;  %v880_v19 = vrot.slane %v8679_v13, %v879_v7 }
 0x29a   : > { %3373 = vmatpush1.bf16.msra.mxu0 %v6730_v24  ;;  %v6748_v24 = vcombine.low %v862_v9, %v866_v11 }
 0x29b   : > { %3374 = vmatprep.subr.bf16.mxu0 %v6739_v26 }
 0x29c   : > { %3533 = vmatpush1.bf16.msra.mxu1 %v6684_v25  ;;  %v7471_v25 = vld [vmem:[#allocation7 + $0xc4] ss:$16 sps:$4 sm:$0xff]  }
 0x29d   : > { %3534 = vmatprep.subr.bf16.mxu1 %v6693_v27  ;;  %v6757_v27 = vcombine.high %v870_v20, %v874_v21  ;;  %v7501_v20 = vld [vmem:[#allocation7 + $0x184] ss:$16 sps:$4 sm:$0xff]  }
 0x29e   : > { %3375 = vmatpush1.bf16.msra.mxu0 %v6738_v33  ;;  %v7469_v33 = vld [vmem:[#allocation7 + $0xc0] ss:$16 sps:$4 sm:$0xff]  }
 0x29f   : > { %3376 = vmatprep.subr.bf16.mxu0 %v6747_v35 }
 0x2a0   : > { %3535 = vmatpush1.bf16.msra.mxu1 %v6692_v30 }
 0x2a1   : > { %3536 = vmatprep.subr.bf16.mxu1 %v6701_v36 }
 0x2a2   : > { %3377 = vmatpush1.bf16.msra.mxu0 %v6746_v39 }
 0x2a3   : > { %5186 = vmatprep.subr.bf16.mxu0 %v7453_v41  ;;  %v7480_v41 = vld [vmem:[#allocation7 + $0xc] ss:$16 sps:$4 sm:$0xff]  }
 0x2a4   : > { %3537 = vmatpush1.bf16.msra.mxu1 %v6700_v40 }
 0x2a5   : > { %3538 = vmatprep.subr.bf16.mxu1 %v6709_v34  ;;  %3379 = vmatmul.mubr.bf16.vlgmr.msra.gmra.mrb[4].mxu0 %v8673_v49 }
 0x2a6   : > { %5187 = vmatpush1.bf16.msra.mxu0 %v7451_v45 }
 0x2a7   : > { %5188 = vmatprep.subr.bf16.mxu0 %v7456_v47 }
 0x2a8   : > { %3539 = vmatpush1.bf16.msra.mxu1 %v6708_v42  ;;  %v7477_v42 = vld [vmem:[#allocation7 + $0x104] ss:$16 sps:$4 sm:$0xff]  }
 0x2a9   : > { %3540 = vmatprep.subr.bf16.mxu1 %v6717_v48 }
 0x2aa   : > { %5189 = vmatpush1.bf16.msra.mxu0 %v7454_v52 }
 0x2ab   : > { %5190 = vmatprep.subr.bf16.mxu0 %v7459_v46 }
 0x2ac   : > { %3541 = vmatpush1.bf16.msra.mxu1 %v6716_v53  ;;  %v7478_v53 = vld [vmem:[#allocation7 + $0x8] ss:$16 sps:$4 sm:$0xff]  }
 0x2ad   : > { %3542 = vmatprep.subr.bf16.mxu1 %v6725_v54  ;;  %v7486_v54 = vld [vmem:[#allocation7 + $0x2c] ss:$16 sps:$4 sm:$0xff]  }
 0x2ae   : > { %5191 = vmatpush1.bf16.msra.mxu0 %v7457_v58  ;;  %v7890_v58 = vld [vmem:[%s8603_s14 + $0x18] ss:$28 sps:$4 sm:$0xff]  }
 0x2af   : > { %5192 = vmatprep.subr.bf16.mxu0 %v7462_v60  ;;  %v7487_v60 = vld [vmem:[#allocation7 + $0x140] ss:$16 sps:$4 sm:$0xff]  }
 0x2b0   : > { %3543 = vmatpush1.bf16.msra.mxu1 %v6724_v59 }
 0x2b1   : > { %3544 = vmatprep.subr.bf16.mxu1 %v6733_v61 }
 0x2b2   : > { %5193 = vmatpush1.bf16.msra.mxu0 %v7460_v2  ;;  %v7495_v2 = vld [vmem:[#allocation7 + $0x164] ss:$16 sps:$4 sm:$0xff]  }
 0x2b3   : > { %5194 = vmatprep.subr.bf16.mxu0 %v7465_v4 }
 0x2b4   : > { %3545 = vmatpush1.bf16.msra.mxu1 %v6732_v3 }
 0x2b5   : > { %3546 = vmatprep.subr.bf16.mxu1 %v6741_v5  ;;  %v7492_v5 = vld [vmem:[#allocation7 + $0x4c] ss:$16 sps:$4 sm:$0xff]  }
 0x2b6   : > { %5195 = vmatpush1.bf16.msra.mxu0 %v7463_v12 }
 0x2b7   : > { %5196 = vmatprep.subr.bf16.mxu0 %v7468_v17 }
 0x2b8   : > { %3547 = vmatpush1.bf16.msra.mxu1 %v6740_v16  ;;  %v3036_v26 = vpop.f32.mrb[0].mxu0  ;;  %v7493_v16 = vld [vmem:[#allocation7 + $0x160] ss:$16 sps:$4 sm:$0xff]  }
 0x2b9   : > { %3548 = vmatprep.subr.bf16.mxu1 %v6749_v18  ;;  %v7153_v28 = vadd.f32 %v3036_v26, %v880_v19  ;;  %v3038_v29 = vpop.f32.mrb[1].mxu0  ;;  %v7499_v26 = vld [vmem:[#allocation7 + $0x180] ss:$16 sps:$4 sm:$0xff]  }
 0x2ba   : > { %v7155_v31 = vadd.f32 %v3038_v29, %v884_v22  ;;  %v3040_v32 = vpop.f32.mrb[2].mxu0  ;;  %5197 = vmatpush1.bf16.msra.mxu0 %v7466_v23  ;;  %v7507_v29 = vld [vmem:[#allocation7 + $0x1a4] ss:$16 sps:$4 sm:$0xff]  }
 0x2bb   : > { %v7154_v30 = vadd.f32 %v7153_v28, %v8642_v6  ;;  %v7157_v35 = vadd.f32 %v3040_v32, %v880_v19  ;;  %v3042_v36 = vpop.f32.mrb[3].mxu0  ;;  %5198 = vmatprep.subr.bf16.mxu0 %v7471_v25  ;;  %v7490_v19 = vld [vmem:[#allocation7 + $0x48] ss:$16 sps:$4 sm:$0xff]   ;;  %v7504_v32 = vld [vmem:[#allocation7 + $0x8c] ss:$16 sps:$4 sm:$0xff]  }
 0x2bc   : > { %3549 = vmatpush1.bf16.msra.mxu1 %v6748_v24  ;;  %v7156_v39 = vadd.f32 %v7155_v31, %v8644_v8  ;;  %v7159_v40 = vadd.f32 %v3042_v36, %v884_v22  ;;  %v7498_v22 = vld [vmem:[#allocation7 + $0x6c] ss:$16 sps:$4 sm:$0xff]   ;;  %v7496_v28 = vld [vmem:[#allocation7 + $0x68] ss:$16 sps:$4 sm:$0xff]  }
 0x2bd   : > { %3561 = vmatprep.subr.bf16.mxu1 %v6757_v27  ;;  %v7158_v34 = vadd.f32 %v7157_v35, %v8647_v10  ;;  %v3604_v6 = vmax.f32 %v7154_v30, 0.0  ;;  %v7502_v30 = vld [vmem:[#allocation7 + $0x88] ss:$16 sps:$4 sm:$0xff]   ;;  %v7513_v35 = vld [vmem:[#allocation7 + $0x1c4] ss:$16 sps:$4 sm:$0xff]  }
 0x2be   : > { %v7160_v43 = vadd.f32 %v7159_v40, %v8649_v15  ;;  %5199 = vmatpush1.bf16.msra.mxu0 %v7469_v33  ;;  %v3605_v47 = vmax.f32 %v7156_v39, 0.0  ;;  %v887_v15 = vsub.s32 2, %v8676_v1  ;;  %v7505_v33 = vld [vmem:[#allocation7 + $0x1a0] ss:$16 sps:$4 sm:$0xff]   ;;  %v7510_v36 = vld [vmem:[#allocation7 + $0xac] ss:$16 sps:$4 sm:$0xff]  }
 0x2bf   : > { %3551 = vmatmul.mubr.bf16.vlgmr.msra.gmra.mrb[12].mxu1 %v8673_v49  ;;  %v3612_v45 = vmax.f32 %v7158_v34, 0.0  ;;  %5200 = vmatprep.subr.bf16.mxu0 %v7474_v38  ;;  %v891_v49 = vsub.s32 3, %v8676_v1  ;;  %v7508_v38 = vld [vmem:[#allocation7 + $0xa8] ss:$16 sps:$4 sm:$0xff]   ;;  %v7519_v39 = vld [vmem:[#allocation7 + $0x1e4] ss:$16 sps:$4 sm:$0xff]  }
 0x2c0   : > { %3562 = vmatpush1.bf16.msra.mxu1 %v6756_v37  ;;  %v3613_v48 = vmax.f32 %v7160_v43, 0.0  ;;  %3593 = vmatprep.mubr.bf16.mxu1 %v8277_v0  ;;  %v888_v52 = vrot.slane %v8679_v13, %v887_v15  ;;  %v7481_v0 = vld [vmem:[#allocation7 + $0x120] ss:$16 sps:$4 sm:$0xff]   ;;  %v7516_v40 = vld [vmem:[#allocation7 + $0xcc] ss:$16 sps:$4 sm:$0xff]  }
 0x2c1   : > { %5358 = vmatprep.subr.bf16.mxu1 %v7480_v41  ;;  %v8694_v8 = vpack.c.bf16 %v3612_v45, %v3604_v6  ;;  %v892_v46 = vrot.slane %v8679_v13, %v891_v49  ;;  %v7511_v37 = vld [vmem:[#allocation7 + $0x1c0] ss:$16 sps:$4 sm:$0xff]   ;;  %v7514_v34 = vld [vmem:[#allocation7 + $0xc8] ss:$16 sps:$4 sm:$0xff]   ;;  %v7525_v43 = vld [vmem:[#allocation7 + $0x204] ss:$16 sps:$4 sm:$0xff]  }
 0x2c2   : > { %5201 = vmatpush1.bf16.msra.mxu0 %v7472_v44  ;;  %v3621_v10 = vpack.c.bf16 %v3613_v48, %v3605_v47  ;;  %v7517_v41 = vld [vmem:[#allocation7 + $0x1e0] ss:$16 sps:$4 sm:$0xff]   ;;  %v7522_v44 = vld [vmem:[#allocation7 + $0xec] ss:$16 sps:$4 sm:$0xff]   ;;  %v7520_v45 = vld [vmem:[#allocation7 + $0xe8] ss:$16 sps:$4 sm:$0xff]  }
 0x2c3   : > { %5202 = vmatprep.subr.bf16.mxu0 %v7477_v42  ;;  %v7523_v6 = vld [vmem:[#allocation7 + $0x200] ss:$16 sps:$4 sm:$0xff]   ;;  %v7531_v42 = vld [vmem:[#allocation7 + $0x224] ss:$16 sps:$4 sm:$0xff]   ;;  %v7528_v47 = vld [vmem:[#allocation7 + $0x10c] ss:$16 sps:$4 sm:$0xff]  }
 0x2c4   : > { %5218 = vmatprep.mubr.bf16.mxu0 %v3621_v10  ;;  %v7529_v48 = vld [vmem:[#allocation7 + $0x220] ss:$16 sps:$4 sm:$0xff]  }
 0x2c6   : > { %5203 = vmatpush1.bf16.msra.mxu0 %v7475_v50  ;;  %v7537_v50 = vld [vmem:[#allocation7 + $0x244] ss:$16 sps:$4 sm:$0xff]  }
 0x2c7   : > { %5204 = vmatprep.subr.bf16.mxu0 %v7483_v51  ;;  %v7534_v51 = vld [vmem:[#allocation7 + $0x12c] ss:$16 sps:$4 sm:$0xff]  }
 0x2ca   : > { %v3251_v56 = vpop.f32.mrb[4].mxu1  ;;  %5205 = vmatpush1.bf16.msra.mxu0 %v7481_v0  ;;  %v7532_v0 = vld [vmem:[#allocation7 + $0x128] ss:$16 sps:$4 sm:$0xff]  }
 0x2cb   : > { %v7161_v57 = vadd.f32 %v3251_v56, %v888_v52  ;;  %6761 = vmatmul.mubr.msk.bf16.vlgmr.msra.gmra.mrb[12].mxu1 %vm2912_vm0, %v7890_v58  ;;  %v3253_v59 = vpop.f32.mrb[5].mxu1  ;;  %5206 = vmatprep.subr.bf16.mxu0 %v7489_v55  ;;  %v7538_v55 = vld [vmem:[#allocation7 + $0x148] ss:$16 sps:$4 sm:$0xff]   ;;  %v7549_v56 = vld [vmem:[#allocation7 + $0x284] ss:$16 sps:$4 sm:$0xff]  }
 0x2cc   : > { %5359 = vmatpush1.bf16.msra.mxu1 %v7478_v53  ;;  %v7162_v61 = vadd.f32 %v3253_v59, %v892_v46  ;;  %5390 = vmatprep.mubr.bf16.mxu1 %v3621_v10  ;;  %v3255_v62 = vpop.f32.mrb[6].mxu1  ;;  %v7526_v10 = vld [vmem:[#allocation7 + $0x108] ss:$16 sps:$4 sm:$0xff]   ;;  %v7543_v53 = vld [vmem:[#allocation7 + $0x264] ss:$16 sps:$4 sm:$0xff]  }
 0x2cd   : > { %v7163_v3 = vadd.f32 %v3255_v62, %v888_v52  ;;  %v3257_v4 = vpop.f32.mrb[7].mxu1  ;;  %5360 = vmatprep.subr.bf16.mxu1 %v7486_v54  ;;  %v3606_v11 = vmax.f32 %v7161_v57, 0.0  ;;  %v7535_v52 = vld [vmem:[#allocation7 + $0x240] ss:$16 sps:$4 sm:$0xff]   ;;  %v7546_v57 = vld [vmem:[#allocation7 + $0x16c] ss:$16 sps:$4 sm:$0xff]  }
 0x2ce   : > { %v7164_v9 = vadd.f32 %v3257_v4, %v892_v46  ;;  %5207 = vmatpush1.bf16.msra.mxu0 %v7487_v60  ;;  %v3607_v17 = vmax.f32 %v7162_v61, 0.0  ;;  %v7540_v46 = vld [vmem:[#allocation7 + $0x14c] ss:$16 sps:$4 sm:$0xff]   ;;  %v7541_v54 = vld [vmem:[#allocation7 + $0x260] ss:$16 sps:$4 sm:$0xff]  }
 0x2cf   : > { %v3614_v12 = vmax.f32 %v7163_v3, 0.0  ;;  %5208 = vmatprep.subr.bf16.mxu0 %v7495_v2  ;;  %v7547_v58 = vld [vmem:[#allocation7 + $0x280] ss:$16 sps:$4 sm:$0xff]   ;;  %v7544_v59 = vld [vmem:[#allocation7 + $0x168] ss:$16 sps:$4 sm:$0xff]  }
 0x2d0   : > { %v3615_v18 = vmax.f32 %v7164_v9, 0.0  ;;  %5361 = vmatpush1.bf16.msra.mxu1 %v7484_v63  ;;  %v7555_v60 = vld [vmem:[#allocation7 + $0x2a4] ss:$16 sps:$4 sm:$0xff]   ;;  %v7552_v61 = vld [vmem:[#allocation7 + $0x18c] ss:$16 sps:$4 sm:$0xff]  }
 0x2d1   : > { %v8706_v21 = vpack.c.bf16 %v3614_v12, %v3606_v11  ;;  %5362 = vmatprep.subr.bf16.mxu1 %v7492_v5  ;;  %v7553_v62 = vld [vmem:[#allocation7 + $0x2a0] ss:$16 sps:$4 sm:$0xff]   ;;  %v7550_v63 = vld [vmem:[#allocation7 + $0x188] ss:$16 sps:$4 sm:$0xff]   ;;  %v7561_v2 = vld [vmem:[#allocation7 + $0x2c4] ss:$16 sps:$4 sm:$0xff]  }
 0x2d2   : > { %v8708_v23 = vpack.c.bf16 %v3615_v18, %v3607_v17  ;;  %v8710_v24 = vpop.f32.mrb[8].mxu1  ;;  %5209 = vmatpush1.bf16.msra.mxu0 %v7493_v16  ;;  %v7558_v3 = vld [vmem:[#allocation7 + $0x1ac] ss:$16 sps:$4 sm:$0xff]   ;;  %v7559_v4 = vld [vmem:[#allocation7 + $0x2c0] ss:$16 sps:$4 sm:$0xff]  }
 0x2d3   : > { %v8712_v25 = vpop.f32.mrb[9].mxu1  ;;  %5210 = vmatprep.subr.bf16.mxu0 %v7501_v20  ;;  %v7556_v5 = vld [vmem:[#allocation7 + $0x1a8] ss:$16 sps:$4 sm:$0xff]   ;;  %v7567_v9 = vld [vmem:[#allocation7 + $0x2e4] ss:$16 sps:$4 sm:$0xff]  }
 0x2d4   : > { %5363 = vmatpush1.bf16.msra.mxu1 %v7490_v19  ;;  %v8714_v27 = vpop.f32.mrb[10].mxu1  ;;  %v7564_v11 = vld [vmem:[#allocation7 + $0x1cc] ss:$16 sps:$4 sm:$0xff]   ;;  %v7565_v12 = vld [vmem:[#allocation7 + $0x2e0] ss:$16 sps:$4 sm:$0xff]  }
 0x2d5   : > { %v8716_v31 = vpop.f32.mrb[11].mxu1  ;;  %5364 = vmatprep.subr.bf16.mxu1 %v7498_v22  ;;  %v7562_v16 = vld [vmem:[#allocation7 + $0x1c8] ss:$16 sps:$4 sm:$0xff]   ;;  %v7573_v17 = vld [vmem:[#allocation7 + $0x304] ss:$16 sps:$4 sm:$0xff]  }
 0x2d6   : > { %5211 = vmatpush1.bf16.msra.mxu0 %v7499_v26  ;;  %v7570_v18 = vld [vmem:[#allocation7 + $0x1ec] ss:$16 sps:$4 sm:$0xff]   ;;  %v7571_v19 = vld [vmem:[#allocation7 + $0x300] ss:$16 sps:$4 sm:$0xff]   ;;  %v7568_v20 = vld [vmem:[#allocation7 + $0x1e8] ss:$16 sps:$4 sm:$0xff]  }
 0x2d7   : > { %5212 = vmatprep.subr.bf16.mxu0 %v7507_v29  ;;  %v7579_v22 = vld [vmem:[#allocation7 + $0x324] ss:$16 sps:$4 sm:$0xff]   ;;  %v7576_v26 = vld [vmem:[#allocation7 + $0x20c] ss:$16 sps:$4 sm:$0xff]   ;;  %v7574_v29 = vld [vmem:[#allocation7 + $0x208] ss:$16 sps:$4 sm:$0xff]  }
 0x2d8   : > { %5365 = vmatpush1.bf16.msra.mxu1 %v7496_v28  ;;  %v7577_v28 = vld [vmem:[#allocation7 + $0x320] ss:$16 sps:$4 sm:$0xff]  }
 0x2d9   : > { %5366 = vmatprep.subr.bf16.mxu1 %v7504_v32  ;;  %v7582_v32 = vld [vmem:[#allocation7 + $0x22c] ss:$16 sps:$4 sm:$0xff]  }
 0x2da   : > { %5213 = vmatpush1.bf16.msra.mxu0 %v7505_v33  ;;  %v7585_v33 = vld [vmem:[#allocation7 + $0x344] ss:$16 sps:$4 sm:$0xff]  }
 0x2db   : > { %5214 = vmatprep.subr.bf16.mxu0 %v7513_v35  ;;  %v7580_v35 = vld [vmem:[#allocation7 + $0x228] ss:$16 sps:$4 sm:$0xff]  }
 0x2dc   : > { %5367 = vmatpush1.bf16.msra.mxu1 %v7502_v30  ;;  %v7583_v30 = vld [vmem:[#allocation7 + $0x340] ss:$16 sps:$4 sm:$0xff]  }
 0x2dd   : > { %5368 = vmatprep.subr.bf16.mxu1 %v7510_v36  ;;  %v7591_v36 = vld [vmem:[#allocation7 + $0x364] ss:$16 sps:$4 sm:$0xff]  }
 0x2de   : > { %5215 = vmatpush1.bf16.msra.mxu0 %v7511_v37  ;;  %v7588_v37 = vld [vmem:[#allocation7 + $0x24c] ss:$16 sps:$4 sm:$0xff]  }
 0x2df   : > { %5216 = vmatprep.subr.bf16.mxu0 %v7519_v39  ;;  %v7586_v39 = vld [vmem:[#allocation7 + $0x248] ss:$16 sps:$4 sm:$0xff]  }
 0x2e0   : > { %5369 = vmatpush1.bf16.msra.mxu1 %v7508_v38  ;;  %v7589_v38 = vld [vmem:[#allocation7 + $0x360] ss:$16 sps:$4 sm:$0xff]  }
 0x2e1   : > { %5370 = vmatprep.subr.bf16.mxu1 %v7516_v40  ;;  %v7597_v40 = vld [vmem:[#allocation7 + $0x384] ss:$16 sps:$4 sm:$0xff]  }
 0x2e2   : > { %5217 = vmatpush1.bf16.msra.mxu0 %v7517_v41  ;;  %v7594_v41 = vld [vmem:[#allocation7 + $0x26c] ss:$16 sps:$4 sm:$0xff]  }
 0x2e3   : > { %5229 = vmatprep.subr.bf16.mxu0 %v7525_v43  ;;  %v7603_v43 = vld [vmem:[#allocation7 + $0x3a4] ss:$16 sps:$4 sm:$0xff]  }
 0x2e4   : > { %5371 = vmatpush1.bf16.msra.mxu1 %v7514_v34  ;;  %v7592_v34 = vld [vmem:[#allocation7 + $0x268] ss:$16 sps:$4 sm:$0xff]  }
 0x2e5   : > { %5372 = vmatprep.subr.bf16.mxu1 %v7522_v44  ;;  %5219 = vmatmul.mubr.bf16.vlgmr.msra.gmra.mrb[8].mxu0 %v8694_v8  ;;  %v7601_v44 = vld [vmem:[#allocation7 + $0x3a0] ss:$16 sps:$4 sm:$0xff]  }
 0x2e6   : > { %5230 = vmatpush1.bf16.msra.mxu0 %v7523_v6  ;;  %5261 = vmatprep.mubr.bf16.mxu0 %v8708_v23  ;;  %v7598_v6 = vld [vmem:[#allocation7 + $0x288] ss:$16 sps:$4 sm:$0xff]  }
 0x2e7   : > { %5231 = vmatprep.subr.bf16.mxu0 %v7531_v42  ;;  %v7606_v42 = vld [vmem:[#allocation7 + $0x2ac] ss:$16 sps:$4 sm:$0xff]  }
 0x2e8   : > { %5373 = vmatpush1.bf16.msra.mxu1 %v7520_v45  ;;  %v7609_v45 = vld [vmem:[#allocation7 + $0x3c4] ss:$16 sps:$4 sm:$0xff]  }
 0x2e9   : > { %5374 = vmatprep.subr.bf16.mxu1 %v7528_v47  ;;  %v7607_v47 = vld [vmem:[#allocation7 + $0x3c0] ss:$16 sps:$4 sm:$0xff]  }
 0x2ea   : > { %5232 = vmatpush1.bf16.msra.mxu0 %v7529_v48  ;;  %v7604_v48 = vld [vmem:[#allocation7 + $0x2a8] ss:$16 sps:$4 sm:$0xff]  }
 0x2eb   : > { %5233 = vmatprep.subr.bf16.mxu0 %v7537_v50  ;;  %v7612_v50 = vld [vmem:[#allocation7 + $0x2cc] ss:$16 sps:$4 sm:$0xff]  }
 0x2ec   : > { %5375 = vmatpush1.bf16.msra.mxu1 %v7526_v10  ;;  %v7615_v10 = vld [vmem:[#allocation7 + $0x3e4] ss:$16 sps:$4 sm:$0xff]  }
 0x2ed   : > { %5376 = vmatprep.subr.bf16.mxu1 %v7534_v51  ;;  %v7613_v51 = vld [vmem:[#allocation7 + $0x3e0] ss:$16 sps:$4 sm:$0xff]  }
 0x2ee   : > { %5234 = vmatpush1.bf16.msra.mxu0 %v7535_v52  ;;  %v7610_v52 = vld [vmem:[#allocation7 + $0x2c8] ss:$16 sps:$4 sm:$0xff]  }
 0x2ef   : > { %5235 = vmatprep.subr.bf16.mxu0 %v7543_v53  ;;  %v7618_v53 = vld [vmem:[#allocation7 + $0x2ec] ss:$16 sps:$4 sm:$0xff]  }
 0x2f0   : > { %5377 = vmatpush1.bf16.msra.mxu1 %v7532_v0  ;;  %v7645_v0 = vld [vmem:[#allocation7 + $0x404] ss:$16 sps:$4 sm:$0xff]  }
 0x2f1   : > { %5378 = vmatprep.subr.bf16.mxu1 %v7540_v46  ;;  %v7643_v46 = vld [vmem:[#allocation7 + $0x400] ss:$16 sps:$4 sm:$0xff]  }
 0x2f2   : > { %5236 = vmatpush1.bf16.msra.mxu0 %v7541_v54  ;;  %v7616_v54 = vld [vmem:[#allocation7 + $0x2e8] ss:$16 sps:$4 sm:$0xff]  }
 0x2f3   : > { %5237 = vmatprep.subr.bf16.mxu0 %v7549_v56  ;;  %v7621_v56 = vld [vmem:[#allocation7 + $0x30c] ss:$16 sps:$4 sm:$0xff]  }
 0x2f4   : > { %5379 = vmatpush1.bf16.msra.mxu1 %v7538_v55  ;;  %v7651_v55 = vld [vmem:[#allocation7 + $0x424] ss:$16 sps:$4 sm:$0xff]  }
 0x2f5   : > { %5380 = vmatprep.subr.bf16.mxu1 %v7546_v57  ;;  %v7649_v57 = vld [vmem:[#allocation7 + $0x420] ss:$16 sps:$4 sm:$0xff]  }
 0x2f6   : > { %5238 = vmatpush1.bf16.msra.mxu0 %v7547_v58  ;;  %v7619_v58 = vld [vmem:[#allocation7 + $0x308] ss:$16 sps:$4 sm:$0xff]  }
 0x2f7   : > { %5239 = vmatprep.subr.bf16.mxu0 %v7555_v60  ;;  %v7624_v60 = vld [vmem:[#allocation7 + $0x32c] ss:$16 sps:$4 sm:$0xff]  }
 0x2f8   : > { %5381 = vmatpush1.bf16.msra.mxu1 %v7544_v59  ;;  %v7657_v59 = vld [vmem:[#allocation7 + $0x444] ss:$16 sps:$4 sm:$0xff]  }
 0x2f9   : > { %5382 = vmatprep.subr.bf16.mxu1 %v7552_v61  ;;  %v7655_v61 = vld [vmem:[#allocation7 + $0x440] ss:$16 sps:$4 sm:$0xff]  }
 0x2fa   : > { %5240 = vmatpush1.bf16.msra.mxu0 %v7553_v62  ;;  %v7622_v62 = vld [vmem:[#allocation7 + $0x328] ss:$16 sps:$4 sm:$0xff]  }
 0x2fb   : > { %5241 = vmatprep.subr.bf16.mxu0 %v7561_v2  ;;  %v7627_v2 = vld [vmem:[#allocation7 + $0x34c] ss:$16 sps:$4 sm:$0xff]  }
 0x2fc   : > { %5383 = vmatpush1.bf16.msra.mxu1 %v7550_v63  ;;  %v7663_v63 = vld [vmem:[#allocation7 + $0x464] ss:$16 sps:$4 sm:$0xff]  }
 0x2fd   : > { %5384 = vmatprep.subr.bf16.mxu1 %v7558_v3  ;;  %v7661_v3 = vld [vmem:[#allocation7 + $0x460] ss:$16 sps:$4 sm:$0xff]  }
 0x2fe   : > { %5242 = vmatpush1.bf16.msra.mxu0 %v7559_v4  ;;  %v7625_v4 = vld [vmem:[#allocation7 + $0x348] ss:$16 sps:$4 sm:$0xff]  }
 0x2ff   : > { %5243 = vmatprep.subr.bf16.mxu0 %v7567_v9  ;;  %v7630_v9 = vld [vmem:[#allocation7 + $0x36c] ss:$16 sps:$4 sm:$0xff]  }
 0x300   : > { %5385 = vmatpush1.bf16.msra.mxu1 %v7556_v5  ;;  %v7669_v5 = vld [vmem:[#allocation7 + $0x484] ss:$16 sps:$4 sm:$0xff]  }
 0x301   : > { %5386 = vmatprep.subr.bf16.mxu1 %v7564_v11  ;;  %v7667_v11 = vld [vmem:[#allocation7 + $0x480] ss:$16 sps:$4 sm:$0xff]  }
 0x302   : > { %5244 = vmatpush1.bf16.msra.mxu0 %v7565_v12  ;;  %v7628_v12 = vld [vmem:[#allocation7 + $0x368] ss:$16 sps:$4 sm:$0xff]  }
 0x303   : > { %5245 = vmatprep.subr.bf16.mxu0 %v7573_v17  ;;  %v7633_v17 = vld [vmem:[#allocation7 + $0x38c] ss:$16 sps:$4 sm:$0xff]  }
 0x304   : > { %5387 = vmatpush1.bf16.msra.mxu1 %v7562_v16  ;;  %v7675_v16 = vld [vmem:[#allocation7 + $0x4a4] ss:$16 sps:$4 sm:$0xff]  }
 0x305   : > { %5388 = vmatprep.subr.bf16.mxu1 %v7570_v18  ;;  %v7673_v18 = vld [vmem:[#allocation7 + $0x4a0] ss:$16 sps:$4 sm:$0xff]  }
 0x306   : > { %5246 = vmatpush1.bf16.msra.mxu0 %v7571_v19  ;;  %v7631_v19 = vld [vmem:[#allocation7 + $0x388] ss:$16 sps:$4 sm:$0xff]  }
 0x307   : > { %5247 = vmatprep.subr.bf16.mxu0 %v7579_v22  ;;  %v7636_v22 = vld [vmem:[#allocation7 + $0x3ac] ss:$16 sps:$4 sm:$0xff]  }
 0x308   : > { %5389 = vmatpush1.bf16.msra.mxu1 %v7568_v20  ;;  %v7681_v20 = vld [vmem:[#allocation7 + $0x4c4] ss:$16 sps:$4 sm:$0xff]  }
 0x309   : > { %5401 = vmatprep.subr.bf16.mxu1 %v7576_v26  ;;  %v7679_v26 = vld [vmem:[#allocation7 + $0x4c0] ss:$16 sps:$4 sm:$0xff]  }
 0x30a   : > { %5248 = vmatpush1.bf16.msra.mxu0 %v7577_v28  ;;  %v7634_v28 = vld [vmem:[#allocation7 + $0x3a8] ss:$16 sps:$4 sm:$0xff]  }
 0x30b   : > { %5391 = vmatmul.mubr.bf16.vlgmr.msra.gmra.mrb[16].mxu1 %v8694_v8  ;;  %5249 = vmatprep.subr.bf16.mxu0 %v7585_v33  ;;  %v7595_v8 = vld [vmem:[#allocation7 + $0x380] ss:$16 sps:$4 sm:$0xff]  }
 0x30c   : > { %5402 = vmatpush1.bf16.msra.mxu1 %v7574_v29  ;;  %5433 = vmatprep.mubr.bf16.mxu1 %v8708_v23  ;;  %v7600_v23 = vld [vmem:[#allocation7 + $0x28c] ss:$16 sps:$4 sm:$0xff]   ;;  %v7687_v29 = vld [vmem:[#allocation7 + $0x4e4] ss:$16 sps:$4 sm:$0xff]   ;;  %v7685_v33 = vld [vmem:[#allocation7 + $0x4e0] ss:$16 sps:$4 sm:$0xff]  }
 0x30d   : > { %5403 = vmatprep.subr.bf16.mxu1 %v7582_v32  ;;  %v7639_v32 = vld [vmem:[#allocation7 + $0x3cc] ss:$16 sps:$4 sm:$0xff]  }
 0x30e   : > { %5250 = vmatpush1.bf16.msra.mxu0 %v7583_v30  ;;  %v7637_v30 = vld [vmem:[#allocation7 + $0x3c8] ss:$16 sps:$4 sm:$0xff]  }
 0x30f   : > { %5251 = vmatprep.subr.bf16.mxu0 %v7591_v36  ;;  %v7642_v36 = vld [vmem:[#allocation7 + $0x3ec] ss:$16 sps:$4 sm:$0xff]  }
 0x310   : > { %5404 = vmatpush1.bf16.msra.mxu1 %v7580_v35  ;;  %v7693_v35 = vld [vmem:[#allocation7 + $0x504] ss:$16 sps:$4 sm:$0xff]  }
 0x311   : > { %5405 = vmatprep.subr.bf16.mxu1 %v7588_v37  ;;  %v7691_v37 = vld [vmem:[#allocation7 + $0x500] ss:$16 sps:$4 sm:$0xff]  }
 0x312   : > { %5252 = vmatpush1.bf16.msra.mxu0 %v7589_v38  ;;  %v7640_v38 = vld [vmem:[#allocation7 + $0x3e8] ss:$16 sps:$4 sm:$0xff]  }
 0x313   : > { %5253 = vmatprep.subr.bf16.mxu0 %v7597_v40  ;;  %v7648_v40 = vld [vmem:[#allocation7 + $0x40c] ss:$16 sps:$4 sm:$0xff]  }
 0x314   : > { %5406 = vmatpush1.bf16.msra.mxu1 %v7586_v39  ;;  %v7699_v39 = vld [vmem:[#allocation7 + $0x524] ss:$16 sps:$4 sm:$0xff]  }
 0x315   : > { %5407 = vmatprep.subr.bf16.mxu1 %v7594_v41  ;;  %v7697_v41 = vld [vmem:[#allocation7 + $0x520] ss:$16 sps:$4 sm:$0xff]  }
 0x316   : > { %5254 = vmatpush1.bf16.msra.mxu0 %v7595_v8  ;;  %v7646_v8 = vld [vmem:[#allocation7 + $0x408] ss:$16 sps:$4 sm:$0xff]  }
 0x317   : > { %5255 = vmatprep.subr.bf16.mxu0 %v7603_v43  ;;  %v7654_v43 = vld [vmem:[#allocation7 + $0x42c] ss:$16 sps:$4 sm:$0xff]  }
 0x318   : > { %5408 = vmatpush1.bf16.msra.mxu1 %v7592_v34  ;;  %v7705_v34 = vld [vmem:[#allocation7 + $0x544] ss:$16 sps:$4 sm:$0xff]  }
 0x319   : > { %5409 = vmatprep.subr.bf16.mxu1 %v7600_v23  ;;  %v7703_v23 = vld [vmem:[#allocation7 + $0x540] ss:$16 sps:$4 sm:$0xff]  }
 0x31a   : > { %5256 = vmatpush1.bf16.msra.mxu0 %v7601_v44  ;;  %v7652_v44 = vld [vmem:[#allocation7 + $0x428] ss:$16 sps:$4 sm:$0xff]  }
 0x31b   : > { %5257 = vmatprep.subr.bf16.mxu0 %v7609_v45  ;;  %v7660_v45 = vld [vmem:[#allocation7 + $0x44c] ss:$16 sps:$4 sm:$0xff]  }
 0x31c   : > { %5410 = vmatpush1.bf16.msra.mxu1 %v7598_v6  ;;  %v7711_v6 = vld [vmem:[#allocation7 + $0x564] ss:$16 sps:$4 sm:$0xff]  }
 0x31d   : > { %5411 = vmatprep.subr.bf16.mxu1 %v7606_v42  ;;  %v7709_v42 = vld [vmem:[#allocation7 + $0x560] ss:$16 sps:$4 sm:$0xff]  }
 0x31e   : > { %5258 = vmatpush1.bf16.msra.mxu0 %v7607_v47  ;;  %v7658_v47 = vld [vmem:[#allocation7 + $0x448] ss:$16 sps:$4 sm:$0xff]  }
 0x31f   : > { %5259 = vmatprep.subr.bf16.mxu0 %v7615_v10  ;;  %v7666_v10 = vld [vmem:[#allocation7 + $0x46c] ss:$16 sps:$4 sm:$0xff]  }
 0x320   : > { %5412 = vmatpush1.bf16.msra.mxu1 %v7604_v48  ;;  %v7717_v48 = vld [vmem:[#allocation7 + $0x584] ss:$16 sps:$4 sm:$0xff]  }
 0x321   : > { %5413 = vmatprep.subr.bf16.mxu1 %v7612_v50  ;;  %v7715_v50 = vld [vmem:[#allocation7 + $0x580] ss:$16 sps:$4 sm:$0xff]  }
 0x322   : > { %5260 = vmatpush1.bf16.msra.mxu0 %v7613_v51  ;;  %v7723_v51 = vld [vmem:[#allocation7 + $0x5a4] ss:$16 sps:$4 sm:$0xff]  }
 0x323   : > { %5272 = vmatprep.subr.bf16.mxu0 %v7645_v0  ;;  %v7721_v0 = vld [vmem:[#allocation7 + $0x5a0] ss:$16 sps:$4 sm:$0xff]  }
 0x324   : > { %5414 = vmatpush1.bf16.msra.mxu1 %v7610_v52  ;;  %v7672_v52 = vld [vmem:[#allocation7 + $0x48c] ss:$16 sps:$4 sm:$0xff]  }
 0x325   : > { %5415 = vmatprep.subr.bf16.mxu1 %v7618_v53  ;;  %5262 = vmatmul.mubr.bf16.vlgmr.msra.gmra.mrb[8].mxu0 %v8706_v21  ;;  %v7670_v53 = vld [vmem:[#allocation7 + $0x488] ss:$16 sps:$4 sm:$0xff]  }
 0x326   : > { %5273 = vmatpush1.bf16.msra.mxu0 %v7643_v46  ;;  %v7729_v46 = vld [vmem:[#allocation7 + $0x5c4] ss:$16 sps:$4 sm:$0xff]  }
 0x327   : > { %5274 = vmatprep.subr.bf16.mxu0 %v7651_v55  ;;  %v7727_v55 = vld [vmem:[#allocation7 + $0x5c0] ss:$16 sps:$4 sm:$0xff]  }
 0x328   : > { %5416 = vmatpush1.bf16.msra.mxu1 %v7616_v54  ;;  %v7678_v54 = vld [vmem:[#allocation7 + $0x4ac] ss:$16 sps:$4 sm:$0xff]  }
 0x329   : > { %5417 = vmatprep.subr.bf16.mxu1 %v7621_v56  ;;  %v7676_v56 = vld [vmem:[#allocation7 + $0x4a8] ss:$16 sps:$4 sm:$0xff]  }
 0x32a   : > { %5275 = vmatpush1.bf16.msra.mxu0 %v7649_v57  ;;  %v7735_v57 = vld [vmem:[#allocation7 + $0x5e4] ss:$16 sps:$4 sm:$0xff]  }
 0x32b   : > { %5276 = vmatprep.subr.bf16.mxu0 %v7657_v59  ;;  %v7733_v59 = vld [vmem:[#allocation7 + $0x5e0] ss:$16 sps:$4 sm:$0xff]  }
 0x32c   : > { %5418 = vmatpush1.bf16.msra.mxu1 %v7619_v58  ;;  %v7684_v58 = vld [vmem:[#allocation7 + $0x4cc] ss:$16 sps:$4 sm:$0xff]  }
 0x32d   : > { %5419 = vmatprep.subr.bf16.mxu1 %v7624_v60  ;;  %v7682_v60 = vld [vmem:[#allocation7 + $0x4c8] ss:$16 sps:$4 sm:$0xff]  }
 0x32e   : > { %5277 = vmatpush1.bf16.msra.mxu0 %v7655_v61  ;;  %v7741_v61 = vld [vmem:[#allocation7 + $0x604] ss:$16 sps:$4 sm:$0xff]  }
 0x32f   : > { %5278 = vmatprep.subr.bf16.mxu0 %v7663_v63  ;;  %v7688_v63 = vld [vmem:[#allocation7 + $0x4e8] ss:$16 sps:$4 sm:$0xff]  }
 0x330   : > { %5420 = vmatpush1.bf16.msra.mxu1 %v7622_v62  ;;  %v7690_v62 = vld [vmem:[#allocation7 + $0x4ec] ss:$16 sps:$4 sm:$0xff]  }
 0x331   : > { %5421 = vmatprep.subr.bf16.mxu1 %v7627_v2  ;;  %v7696_v2 = vld [vmem:[#allocation7 + $0x50c] ss:$16 sps:$4 sm:$0xff]  }
 0x332   : > { %5279 = vmatpush1.bf16.msra.mxu0 %v7661_v3  ;;  %v7694_v3 = vld [vmem:[#allocation7 + $0x508] ss:$16 sps:$4 sm:$0xff]  }
 0x333   : > { %5280 = vmatprep.subr.bf16.mxu0 %v7669_v5  ;;  %v7700_v5 = vld [vmem:[#allocation7 + $0x528] ss:$16 sps:$4 sm:$0xff]  }
 0x334   : > { %5422 = vmatpush1.bf16.msra.mxu1 %v7625_v4  ;;  %v7702_v4 = vld [vmem:[#allocation7 + $0x52c] ss:$16 sps:$4 sm:$0xff]  }
 0x335   : > { %5423 = vmatprep.subr.bf16.mxu1 %v7630_v9  ;;  %v7708_v9 = vld [vmem:[#allocation7 + $0x54c] ss:$16 sps:$4 sm:$0xff]  }
 0x336   : > { %5281 = vmatpush1.bf16.msra.mxu0 %v7667_v11  ;;  %v7706_v11 = vld [vmem:[#allocation7 + $0x548] ss:$16 sps:$4 sm:$0xff]  }
 0x337   : > { %5282 = vmatprep.subr.bf16.mxu0 %v7675_v16  ;;  %v895_v16 = vsub.s32 4, %v8676_v1 }
 0x338   : > { %5424 = vmatpush1.bf16.msra.mxu1 %v7628_v12  ;;  %v7714_v12 = vld [vmem:[#allocation7 + $0x56c] ss:$16 sps:$4 sm:$0xff]  }
 0x339   : > { %5425 = vmatprep.subr.bf16.mxu1 %v7633_v17  ;;  %v899_v17 = vsub.s32 5, %v8676_v1 }
 0x33a   : > { %5283 = vmatpush1.bf16.msra.mxu0 %v7673_v18  ;;  %v7712_v18 = vld [vmem:[#allocation7 + $0x568] ss:$16 sps:$4 sm:$0xff]  }
 0x33b   : > { %5284 = vmatprep.subr.bf16.mxu0 %v7681_v20  ;;  %v896_v20 = vrot.slane %v8679_v13, %v895_v16  ;;  %v7772_v16 = vld [vmem:[#allocation7 + $0x6a8] ss:$16 sps:$4 sm:$0xff]  }
 0x33c   : > { %5426 = vmatpush1.bf16.msra.mxu1 %v7631_v19  ;;  %v7720_v19 = vld [vmem:[#allocation7 + $0x58c] ss:$16 sps:$4 sm:$0xff]  }
 0x33d   : > { %5427 = vmatprep.subr.bf16.mxu1 %v7636_v22  ;;  %v900_v22 = vrot.slane %v8679_v13, %v899_v17  ;;  %v7891_v17 = vld [vmem:[#allocation6] sm:$0xff] }
 0x33e   : > { %5285 = vmatpush1.bf16.msra.mxu0 %v7679_v26  ;;  %v7718_v26 = vld [vmem:[#allocation7 + $0x588] ss:$16 sps:$4 sm:$0xff]  }
 0x33f   : > { %5286 = vmatprep.subr.bf16.mxu0 %v7687_v29  ;;  %v7726_v29 = vld [vmem:[#allocation7 + $0x5ac] ss:$16 sps:$4 sm:$0xff]  }
 0x340   : > { %5428 = vmatpush1.bf16.msra.mxu1 %v7634_v28 }
 0x341   : > { %5429 = vmatprep.subr.bf16.mxu1 %v7639_v32 }
 0x342   : > { %5287 = vmatpush1.bf16.msra.mxu0 %v7685_v33 }
 0x343   : > { %5288 = vmatprep.subr.bf16.mxu0 %v7693_v35 }
 0x344   : > { %5430 = vmatpush1.bf16.msra.mxu1 %v7637_v30 }
 0x345   : > { %5431 = vmatprep.subr.bf16.mxu1 %v7642_v36 }
 0x346   : > { %5289 = vmatpush1.bf16.msra.mxu0 %v7691_v37 }
 0x347   : > { %5290 = vmatprep.subr.bf16.mxu0 %v7699_v39  ;;  %v7724_v39 = vld [vmem:[#allocation7 + $0x5a8] ss:$16 sps:$4 sm:$0xff]  }
 0x348   : > { %5432 = vmatpush1.bf16.msra.mxu1 %v7640_v38 }
 0x349   : > { %5444 = vmatprep.subr.bf16.mxu1 %v7648_v40 }
 0x34a   : > { %5291 = vmatpush1.bf16.msra.mxu0 %v7697_v41 }
 0x34b   : > { %5434 = vmatmul.mubr.bf16.vlgmr.msra.gmra.mrb[16].mxu1 %v8706_v21  ;;  %5292 = vmatprep.subr.bf16.mxu0 %v7705_v34  ;;  %v7664_v21 = vld [vmem:[#allocation7 + $0x468] ss:$16 sps:$4 sm:$0xff]  }
 0x34c   : > { %5445 = vmatpush1.bf16.msra.mxu1 %v7646_v8  ;;  %v7732_v8 = vld [vmem:[#allocation7 + $0x5cc] ss:$16 sps:$4 sm:$0xff]  }
 0x34d   : > { %5446 = vmatprep.subr.bf16.mxu1 %v7654_v43 }
 0x34e   : > { %5293 = vmatpush1.bf16.msra.mxu0 %v7703_v23 }
 0x34f   : > { %5294 = vmatprep.subr.bf16.mxu0 %v7711_v6  ;;  %v7730_v6 = vld [vmem:[#allocation7 + $0x5c8] ss:$16 sps:$4 sm:$0xff]  }
 0x350   : > { %5447 = vmatpush1.bf16.msra.mxu1 %v7652_v44 }
 0x351   : > { %5448 = vmatprep.subr.bf16.mxu1 %v7660_v45 }
 0x352   : > { %5295 = vmatpush1.bf16.msra.mxu0 %v7709_v42 }
 0x353   : > { %5296 = vmatprep.subr.bf16.mxu0 %v7717_v48 }
 0x354   : > { %5449 = vmatpush1.bf16.msra.mxu1 %v7658_v47 }
 0x355   : > { %5450 = vmatprep.subr.bf16.mxu1 %v7666_v10  ;;  %v7739_v10 = vld [vmem:[#allocation7 + $0x600] ss:$16 sps:$4 sm:$0xff]  }
 0x356   : > { %5297 = vmatpush1.bf16.msra.mxu0 %v7715_v50  ;;  %v7747_v50 = vld [vmem:[#allocation7 + $0x624] ss:$16 sps:$4 sm:$0xff]  }
 0x357   : > { %5298 = vmatprep.subr.bf16.mxu0 %v7723_v51  ;;  %v7753_v51 = vld [vmem:[#allocation7 + $0x644] ss:$16 sps:$4 sm:$0xff]  }
 0x358   : > { %5451 = vmatpush1.bf16.msra.mxu1 %v7664_v21  ;;  %v7744_v21 = vld [vmem:[#allocation7 + $0x60c] ss:$16 sps:$4 sm:$0xff]  }
 0x359   : > { %5452 = vmatprep.subr.bf16.mxu1 %v7672_v52  ;;  %v7750_v52 = vld [vmem:[#allocation7 + $0x62c] ss:$16 sps:$4 sm:$0xff]  }
 0x35a   : > { %5299 = vmatpush1.bf16.msra.mxu0 %v7721_v0  ;;  %v7751_v0 = vld [vmem:[#allocation7 + $0x640] ss:$16 sps:$4 sm:$0xff]  }
 0x35b   : > { %5300 = vmatprep.subr.bf16.mxu0 %v7729_v46  ;;  %v7759_v46 = vld [vmem:[#allocation7 + $0x664] ss:$16 sps:$4 sm:$0xff]  }
 0x35c   : > { %5453 = vmatpush1.bf16.msra.mxu1 %v7670_v53  ;;  %v7748_v53 = vld [vmem:[#allocation7 + $0x628] ss:$16 sps:$4 sm:$0xff]  }
 0x35d   : > { %5454 = vmatprep.subr.bf16.mxu1 %v7678_v54  ;;  %v7756_v54 = vld [vmem:[#allocation7 + $0x64c] ss:$16 sps:$4 sm:$0xff]  }
 0x35e   : > { %5301 = vmatpush1.bf16.msra.mxu0 %v7727_v55  ;;  %v7757_v55 = vld [vmem:[#allocation7 + $0x660] ss:$16 sps:$4 sm:$0xff]  }
 0x35f   : > { %5302 = vmatprep.subr.bf16.mxu0 %v7735_v57  ;;  %v7765_v57 = vld [vmem:[#allocation7 + $0x684] ss:$16 sps:$4 sm:$0xff]  }
 0x360   : > { %5455 = vmatpush1.bf16.msra.mxu1 %v7676_v56  ;;  %v7754_v56 = vld [vmem:[#allocation7 + $0x648] ss:$16 sps:$4 sm:$0xff]  }
 0x361   : > { %5456 = vmatprep.subr.bf16.mxu1 %v7684_v58  ;;  %v7762_v58 = vld [vmem:[#allocation7 + $0x66c] ss:$16 sps:$4 sm:$0xff]  }
 0x362   : > { %5303 = vmatpush1.bf16.msra.mxu0 %v7733_v59  ;;  %v7763_v59 = vld [vmem:[#allocation7 + $0x680] ss:$16 sps:$4 sm:$0xff]  }
 0x363   : > { %5315 = vmatprep.subr.bf16.mxu0 %v7741_v61  ;;  %v7771_v61 = vld [vmem:[#allocation7 + $0x6a4] ss:$16 sps:$4 sm:$0xff]  }
 0x364   : > { %5457 = vmatpush1.bf16.msra.mxu1 %v7682_v60  ;;  %v7760_v60 = vld [vmem:[#allocation7 + $0x668] ss:$16 sps:$4 sm:$0xff]  }
 0x365   : > { %5458 = vmatprep.subr.bf16.mxu1 %v7690_v62  ;;  %v7768_v62 = vld [vmem:[#allocation7 + $0x68c] ss:$16 sps:$4 sm:$0xff]  }
 0x368   : > { %5459 = vmatpush1.bf16.msra.mxu1 %v7688_v63  ;;  %v7769_v63 = vld [vmem:[#allocation7 + $0x6a0] ss:$16 sps:$4 sm:$0xff]  }
 0x369   : > { %5460 = vmatprep.subr.bf16.mxu1 %v7696_v2  ;;  %v903_v2 = vsub.s32 6, %v8676_v1 }
 0x36c   : > { %5461 = vmatpush1.bf16.msra.mxu1 %v7694_v3  ;;  %v7766_v3 = vld [vmem:[#allocation7 + $0x688] ss:$16 sps:$4 sm:$0xff]  }
 0x36d   : > { %5462 = vmatprep.subr.bf16.mxu1 %v7702_v4  ;;  %v907_v4 = vsub.s32 7, %v8676_v1 }
 0x370   : > { %5463 = vmatpush1.bf16.msra.mxu1 %v7700_v5  ;;  %v7777_v5 = vld [vmem:[#allocation7 + $0x6c4] ss:$16 sps:$4 sm:$0xff]  }
 0x371   : > { %5464 = vmatprep.subr.bf16.mxu1 %v7708_v9  ;;  %v7774_v9 = vld [vmem:[#allocation7 + $0x6ac] ss:$16 sps:$4 sm:$0xff]  }
 0x374   : > { %5465 = vmatpush1.bf16.msra.mxu1 %v7706_v11  ;;  %v904_v11 = vrot.slane %v8679_v13, %v903_v2  ;;  %v7789_v13 = vld [vmem:[#allocation7 + $0x704] ss:$16 sps:$4 sm:$0xff]   ;;  %v7826_v2 = vld [vmem:[#allocation7 + $0x7c8] ss:$16 sps:$4 sm:$0xff]  }
 0x375   : > { %5466 = vmatprep.subr.bf16.mxu1 %v7714_v12  ;;  %v7775_v12 = vld [vmem:[#allocation7 + $0x6c0] ss:$16 sps:$4 sm:$0xff]  }
 0x378   : > { %5467 = vmatpush1.bf16.msra.mxu1 %v7712_v18  ;;  %v3380_v28 = vpop.f32.mrb[4].mxu0  ;;  %v908_v18 = vrot.slane %v7891_v17, %v907_v4  ;;  %v7834_v4 = vld [vmem:[#allocation7 + $0x7ec] ss:$16 sps:$4 sm:$0xff]   ;;  %v7839_v17 = vld [vmem:[#allocation10 + $0x80] sm:$0xff]  }
 0x379   : > { %5468 = vmatprep.subr.bf16.mxu1 %v7720_v19  ;;  %v7165_v32 = vadd.f32 %v3380_v28, %v896_v20  ;;  %v3382_v33 = vpop.f32.mrb[5].mxu0  ;;  %v7783_v19 = vld [vmem:[#allocation7 + $0x6e4] ss:$16 sps:$4 sm:$0xff]  }
 0x37a   : > { %v7167_v30 = vadd.f32 %v3382_v33, %v900_v22  ;;  %v3384_v35 = vpop.f32.mrb[6].mxu0 }
 0x37b   : > { %v7166_v36 = vadd.f32 %v7165_v32, %v8710_v24  ;;  %v7169_v37 = vadd.f32 %v3384_v35, %v896_v20  ;;  %v3386_v38 = vpop.f32.mrb[7].mxu0  ;;  %v7738_v24 = vld [vmem:[#allocation7 + $0x5ec] ss:$16 sps:$4 sm:$0xff]  }
 0x37c   : > { %5469 = vmatpush1.bf16.msra.mxu1 %v7718_v26  ;;  %v7168_v40 = vadd.f32 %v7167_v30, %v8712_v25  ;;  %v7171_v41 = vadd.f32 %v3386_v38, %v900_v22  ;;  %v7736_v25 = vld [vmem:[#allocation7 + $0x5e8] ss:$16 sps:$4 sm:$0xff]   ;;  %v7780_v20 = vld [vmem:[#allocation7 + $0x6cc] ss:$16 sps:$4 sm:$0xff]  }
 0x37d   : > { %5470 = vmatprep.subr.bf16.mxu1 %v7726_v29  ;;  %v7170_v34 = vadd.f32 %v7169_v37, %v8714_v27  ;;  %v3608_v23 = vmax.f32 %v7166_v36, 0.0  ;;  %v7745_v27 = vld [vmem:[#allocation7 + $0x620] ss:$16 sps:$4 sm:$0xff]   ;;  %v7778_v30 = vld [vmem:[#allocation7 + $0x6c8] ss:$16 sps:$4 sm:$0xff]  }
 0x37e   : > { %v7172_v43 = vadd.f32 %v7171_v41, %v8716_v31  ;;  %v3609_v45 = vmax.f32 %v7168_v40, 0.0  ;;  %v7742_v31 = vld [vmem:[#allocation7 + $0x608] ss:$16 sps:$4 sm:$0xff]   ;;  %v7781_v29 = vld [vmem:[#allocation7 + $0x6e0] ss:$16 sps:$4 sm:$0xff]  }
 0x37f   : > { %v3616_v44 = vmax.f32 %v7170_v34, 0.0  ;;  %v7786_v37 = vld [vmem:[#allocation7 + $0x6ec] ss:$16 sps:$4 sm:$0xff]   ;;  %v7787_v41 = vld [vmem:[#allocation7 + $0x700] ss:$16 sps:$4 sm:$0xff]  }
 0x380   : > { %5471 = vmatpush1.bf16.msra.mxu1 %v7724_v39  ;;  %v3617_v42 = vmax.f32 %v7172_v43, 0.0  ;;  %v7784_v43 = vld [vmem:[#allocation7 + $0x6e8] ss:$16 sps:$4 sm:$0xff]  }
 0x381   : > { %5472 = vmatprep.subr.bf16.mxu1 %v7732_v8  ;;  %v3624_v47 = vpack.c.bf16 %v3616_v44, %v3608_v23  ;;  %v7792_v44 = vld [vmem:[#allocation7 + $0x70c] ss:$16 sps:$4 sm:$0xff]  }
 0x382   : > { %v3625_v48 = vpack.c.bf16 %v3617_v42, %v3609_v45  ;;  %v7795_v45 = vld [vmem:[#allocation7 + $0x724] ss:$16 sps:$4 sm:$0xff]   ;;  %v7793_v42 = vld [vmem:[#allocation7 + $0x720] ss:$16 sps:$4 sm:$0xff]  }
 0x384   : > { %5473 = vmatpush1.bf16.msra.mxu1 %v7730_v6  ;;  %5304 = vmatprep.mubr.bf16.mxu0 %v3625_v48 }
 0x385   : > { %5474 = vmatprep.subr.bf16.mxu1 %v7738_v24  ;;  %5476 = vmatprep.mubr.bf16.mxu1 %v3625_v48  ;;  %v7790_v24 = vld [vmem:[#allocation7 + $0x708] ss:$16 sps:$4 sm:$0xff]   ;;  %v7798_v48 = vld [vmem:[#allocation7 + $0x72c] ss:$16 sps:$4 sm:$0xff]  }
 0x386   : > { %5305 = vmatmul.mubr.bf16.vlgmr.msra.gmra.mrb[8].mxu0 %v3624_v47 }
 0x387   : > { %5316 = vmatpush1.bf16.msra.mxu0 %v7739_v10  ;;  %v7799_v10 = vld [vmem:[#allocation7 + $0x740] ss:$16 sps:$4 sm:$0xff]  }
 0x388   : > { %5475 = vmatpush1.bf16.msra.mxu1 %v7736_v25  ;;  %5317 = vmatprep.subr.bf16.mxu0 %v7747_v50  ;;  %v7796_v25 = vld [vmem:[#allocation7 + $0x728] ss:$16 sps:$4 sm:$0xff]   ;;  %v7807_v50 = vld [vmem:[#allocation7 + $0x764] ss:$16 sps:$4 sm:$0xff]  }
 0x389   : > { %5487 = vmatprep.subr.bf16.mxu1 %v7744_v21  ;;  %v7804_v21 = vld [vmem:[#allocation7 + $0x74c] ss:$16 sps:$4 sm:$0xff]  }
 0x38b   : > { %5477 = vmatmul.mubr.bf16.vlgmr.msra.gmra.mrb[16].mxu1 %v3624_v47  ;;  %5318 = vmatpush1.bf16.msra.mxu0 %v7745_v27  ;;  %v7801_v47 = vld [vmem:[#allocation7 + $0x744] ss:$16 sps:$4 sm:$0xff]   ;;  %v7805_v27 = vld [vmem:[#allocation7 + $0x760] ss:$16 sps:$4 sm:$0xff]  }
 0x38c   : > { %5488 = vmatpush1.bf16.msra.mxu1 %v7742_v31  ;;  %5319 = vmatprep.subr.bf16.mxu0 %v7753_v51  ;;  %v7802_v31 = vld [vmem:[#allocation7 + $0x748] ss:$16 sps:$4 sm:$0xff]   ;;  %v7813_v51 = vld [vmem:[#allocation7 + $0x784] ss:$16 sps:$4 sm:$0xff]  }
 0x38d   : > { %5489 = vmatprep.subr.bf16.mxu1 %v7750_v52  ;;  %v7810_v52 = vld [vmem:[#allocation7 + $0x76c] ss:$16 sps:$4 sm:$0xff]  }
 0x38f   : > { %5320 = vmatpush1.bf16.msra.mxu0 %v7751_v0  ;;  %v7811_v0 = vld [vmem:[#allocation7 + $0x780] ss:$16 sps:$4 sm:$0xff]  }
 0x390   : > { %5490 = vmatpush1.bf16.msra.mxu1 %v7748_v53  ;;  %5321 = vmatprep.subr.bf16.mxu0 %v7759_v46  ;;  %v7808_v53 = vld [vmem:[#allocation7 + $0x768] ss:$16 sps:$4 sm:$0xff]   ;;  %v7819_v46 = vld [vmem:[#allocation7 + $0x7a4] ss:$16 sps:$4 sm:$0xff]  }
 0x391   : > { %5491 = vmatprep.subr.bf16.mxu1 %v7756_v54  ;;  %v7816_v54 = vld [vmem:[#allocation7 + $0x78c] ss:$16 sps:$4 sm:$0xff]  }
 0x393   : > { %5322 = vmatpush1.bf16.msra.mxu0 %v7757_v55  ;;  %v7817_v55 = vld [vmem:[#allocation7 + $0x7a0] ss:$16 sps:$4 sm:$0xff]  }
 0x394   : > { %5492 = vmatpush1.bf16.msra.mxu1 %v7754_v56  ;;  %5323 = vmatprep.subr.bf16.mxu0 %v7765_v57  ;;  %v7814_v56 = vld [vmem:[#allocation7 + $0x788] ss:$16 sps:$4 sm:$0xff]   ;;  %v7825_v57 = vld [vmem:[#allocation7 + $0x7c4] ss:$16 sps:$4 sm:$0xff]  }
 0x395   : > { %5493 = vmatprep.subr.bf16.mxu1 %v7762_v58  ;;  %v7822_v58 = vld [vmem:[#allocation7 + $0x7ac] ss:$16 sps:$4 sm:$0xff]  }
 0x397   : > { %5324 = vmatpush1.bf16.msra.mxu0 %v7763_v59  ;;  %v7823_v59 = vld [vmem:[#allocation7 + $0x7c0] ss:$16 sps:$4 sm:$0xff]  }
 0x398   : > { %5494 = vmatpush1.bf16.msra.mxu1 %v7760_v60  ;;  %5325 = vmatprep.subr.bf16.mxu0 %v7771_v61  ;;  %v7820_v60 = vld [vmem:[#allocation7 + $0x7a8] ss:$16 sps:$4 sm:$0xff]   ;;  %v7831_v61 = vld [vmem:[#allocation7 + $0x7e4] ss:$16 sps:$4 sm:$0xff]  }
 0x399   : > { %5495 = vmatprep.subr.bf16.mxu1 %v7768_v62  ;;  %v7828_v62 = vld [vmem:[#allocation7 + $0x7cc] ss:$16 sps:$4 sm:$0xff]  }
 0x39b   : > { %5326 = vmatpush1.bf16.msra.mxu0 %v7769_v63  ;;  %v7829_v63 = vld [vmem:[#allocation7 + $0x7e0] ss:$16 sps:$4 sm:$0xff]  }
 0x39c   : > { %5496 = vmatpush1.bf16.msra.mxu1 %v7766_v3  ;;  %5327 = vmatprep.subr.bf16.mxu0 %v7777_v5  ;;  %v7835_v3 = vld [vmem:[#allocation10 + $0x40] sm:$0xff]  }
 0x39d   : > { %5497 = vmatprep.subr.bf16.mxu1 %v7774_v9  ;;  %v7836_v5 = vld [vmem:[#allocation10] sm:$0xff]  }
 0x39e   : > { %v3595_v22 = vpop.f32.mrb[12].mxu1  ;;  %v7832_v9 = vld [vmem:[#allocation7 + $0x7e8] ss:$16 sps:$4 sm:$0xff]  }
 0x39f   : > { %v7173_v26 = vadd.f32 %v3595_v22, %v904_v11  ;;  %v3597_v28 = vpop.f32.mrb[13].mxu1  ;;  %5328 = vmatpush1.bf16.msra.mxu0 %v7775_v12  ;;  %v7837_v12 = vld [vmem:[#allocation10 + $0xc0] sm:$0xff]   ;;  %v7843_v22 = vld [vmem:[#allocation10 + $0x88] sm:$0xff]  }
 0x3a0   : > { %v7174_v32 = vadd.f32 %v3597_v28, %v908_v18  ;;  %5498 = vmatpush1.bf16.msra.mxu1 %v7772_v16  ;;  %v3599_v33 = vpop.f32.mrb[14].mxu1  ;;  %5329 = vmatprep.subr.bf16.mxu0 %v7783_v19  ;;  %v7840_v16 = vld [vmem:[#allocation10 + $0x8] sm:$0xff]   ;;  %v7845_v28 = vld [vmem:[#allocation10 + $0xd0] sm:$0xff]  }
 0x3a1   : > { %v7175_v35 = vadd.f32 %v3599_v33, %v904_v11  ;;  %v3601_v36 = vpop.f32.mrb[15].mxu1  ;;  %5499 = vmatprep.subr.bf16.mxu1 %v7780_v20  ;;  %v3610_v39 = vmax.f32 %v7173_v26, 0.0  ;;  %v7838_v11 = vld [vmem:[#allocation10 + $0x48] sm:$0xff]   ;;  %v7844_v20 = vld [vmem:[#allocation10 + $0x10] sm:$0xff]   ;;  %v7846_v26 = vld [vmem:[#allocation10 + $0x58] sm:$0xff]  }
 0x3a2   : > { %v7176_v38 = vadd.f32 %v3601_v36, %v908_v18  ;;  %v3611_v8 = vmax.f32 %v7174_v32, 0.0  ;;  %v7842_v18 = vld [vmem:[#allocation10 + $0x50] sm:$0xff]   ;;  %v7841_v19 = vld [vmem:[#allocation10 + $0xc8] sm:$0xff]   ;;  %v7850_v33 = vld [vmem:[#allocation10 + $0x60] sm:$0xff]  }
 0x3a3   : > { %v3618_v40 = vmax.f32 %v7175_v35, 0.0  ;;  %5330 = vmatpush1.bf16.msra.mxu0 %v7781_v29  ;;  %v7848_v29 = vld [vmem:[#allocation10 + $0x18] sm:$0xff]   ;;  %v7847_v32 = vld [vmem:[#allocation10 + $0x90] sm:$0xff]   ;;  %v7854_v36 = vld [vmem:[#allocation10 + $0x68] sm:$0xff]  }
 0x3a4   : > { %v3619_v34 = vmax.f32 %v7176_v38, 0.0  ;;  %5500 = vmatpush1.bf16.msra.mxu1 %v7778_v30  ;;  %5331 = vmatprep.subr.bf16.mxu0 %v7789_v13  ;;  %v7849_v30 = vld [vmem:[#allocation10 + $0xd8] sm:$0xff]   ;;  %v7852_v13 = vld [vmem:[#allocation10 + $0x20] sm:$0xff]  }
 0x3a5   : > { %v8735_v23 = vpack.c.bf16 %v3618_v40, %v3610_v39  ;;  %5501 = vmatprep.subr.bf16.mxu1 %v7786_v37  ;;  %v7851_v35 = vld [vmem:[#allocation10 + $0x98] sm:$0xff]   ;;  %v7853_v37 = vld [vmem:[#allocation10 + $0xe0] sm:$0xff]   ;;  %v7856_v39 = vld [vmem:[#allocation10 + $0x28] sm:$0xff]  }
 0x3a6   : > { %v3627_v6 = vpack.c.bf16 %v3619_v34, %v3611_v8  ;;  %v7855_v38 = vld [vmem:[#allocation10 + $0xa0] sm:$0xff]   ;;  %v7857_v40 = vld [vmem:[#allocation10 + $0xe8] sm:$0xff]   ;;  %v7860_v34 = vld [vmem:[#allocation10 + $0x30] sm:$0xff]  }
 0x3a7   : > { %5332 = vmatpush1.bf16.msra.mxu0 %v7787_v41  ;;  %v7858_v41 = vld [vmem:[#allocation10 + $0x70] sm:$0xff]   ;;  %v7859_v8 = vld [vmem:[#allocation10 + $0xa8] sm:$0xff]  }
 0x3a8   : > { %5502 = vmatpush1.bf16.msra.mxu1 %v7784_v43  ;;  %5347 = vmatprep.mubr.bf16.mxu0 %v3627_v6  ;;  %v7861_v43 = vld [vmem:[#allocation10 + $0xf0] sm:$0xff]  }
 0x3a9   : > { %5519 = vmatprep.mubr.bf16.mxu1 %v3627_v6  ;;  %5503 = vmatprep.subr.bf16.mxu1 %v7792_v44  ;;  %v7863_v44 = vld [vmem:[#allocation10 + $0xb0] sm:$0xff]   ;;  %v7864_v6 = vld [vmem:[#allocation10 + $0x38] sm:$0xff]  }
 0x3aa   : > { %5333 = vmatprep.subr.bf16.mxu0 %v7795_v45  ;;  %v7865_v45 = vld [vmem:[#allocation10 + $0xf8] sm:$0xff]  }
 0x3ab   : > { %5334 = vmatpush1.bf16.msra.mxu0 %v7793_v42  ;;  %v7866_v42 = vld [vmem:[#allocation10 + $0xb8] sm:$0xff]  }
 0x3ac   : > { %5504 = vmatpush1.bf16.msra.mxu1 %v7790_v24  ;;  %5335 = vmatprep.subr.bf16.mxu0 %v7801_v47  ;;  %v8278_v24 = vmov 0.0   ;;  %v3884_v47 = vld [vmem:[#allocation9] sm:$0xf] }
 0x3ad   : > { %5505 = vmatprep.subr.bf16.mxu1 %v7798_v48  ;;  %v3889_v48 = vrot.slane %v3884_v47, %v879_v7 }
 0x3af   : > { %5336 = vmatpush1.bf16.msra.mxu0 %v7799_v10  ;;  %v3893_v10 = vrot.slane %v3884_v47, %v883_v14 }
 0x3b0   : > { %5506 = vmatpush1.bf16.msra.mxu1 %v7796_v25  ;;  %5337 = vmatprep.subr.bf16.mxu0 %v7807_v50 }
 0x3b1   : > { %5507 = vmatprep.subr.bf16.mxu1 %v7804_v21 }
 0x3b3   : > { %5338 = vmatpush1.bf16.msra.mxu0 %v7805_v27 }
 0x3b4   : > { %5508 = vmatpush1.bf16.msra.mxu1 %v7802_v31  ;;  %5339 = vmatprep.subr.bf16.mxu0 %v7813_v51  ;;  %v3897_v51 = vrot.slane %v3884_v47, %v887_v15  ;;  %v7867_v15 = vld [vmem:[#allocation13] sm:$0xff]  }
 0x3b5   : > { %5509 = vmatprep.subr.bf16.mxu1 %v7810_v52 }
 0x3b7   : > { %5340 = vmatpush1.bf16.msra.mxu0 %v7811_v0 }
 0x3b8   : > { %5510 = vmatpush1.bf16.msra.mxu1 %v7808_v53  ;;  %5341 = vmatprep.subr.bf16.mxu0 %v7819_v46  ;;  %v3901_v53 = vrot.slane %v3884_v47, %v891_v49 }
 0x3b9   : > { %5511 = vmatprep.subr.bf16.mxu1 %v7816_v54 }
 0x3bb   : > { %5342 = vmatpush1.bf16.msra.mxu0 %v7817_v55 }
 0x3bc   : > { %5512 = vmatpush1.bf16.msra.mxu1 %v7814_v56  ;;  %5343 = vmatprep.subr.bf16.mxu0 %v7825_v57 }
 0x3bd   : > { %5513 = vmatprep.subr.bf16.mxu1 %v7822_v58 }
 0x3bf   : > { %5344 = vmatpush1.bf16.msra.mxu0 %v7823_v59 }
 0x3c0   : > { %5514 = vmatpush1.bf16.msra.mxu1 %v7820_v60  ;;  %5345 = vmatprep.subr.bf16.mxu0 %v7831_v61 }
 0x3c1   : > { %5515 = vmatprep.subr.bf16.mxu1 %v7828_v62 }
 0x3c3   : > { %5346 = vmatpush1.bf16.msra.mxu0 %v7829_v63 }
 0x3c4   : > { %5516 = vmatpush1.bf16.msra.mxu1 %v7826_v2  ;;  %7080 = vmatprep.subr.bf16.mxu0 %v7835_v3 }
 0x3c5   : > { %5517 = vmatprep.subr.bf16.mxu1 %v7834_v4 }
 0x3c6   : > { %5348 = vmatmul.mubr.bf16.vlgmr.msra.gmra.mrb[8].mxu0 %v8735_v23 }
 0x3c7   : > { %7081 = vmatpush3.bf16.msra.mxu0 %v7836_v5 }
 0x3c8   : > { %5518 = vmatpush1.bf16.msra.mxu1 %v7832_v9  ;;  %7082 = vmatprep.subr.bf16.mxu0 %v7838_v11  ;;  %v7868_v11 = vld [vmem:[#allocation13 + $0x8] sm:$0xff]  }
 0x3c9   : > { %7102 = vmatprep.subr.bf16.mxu1 %v7837_v12 }
 0x3cb   : > { %5520 = vmatmul.mubr.bf16.vlgmr.msra.gmra.mrb[16].mxu1 %v8735_v23  ;;  %7083 = vmatpush3.bf16.msra.mxu0 %v7840_v16  ;;  %v7862_v23 = vld [vmem:[#allocation10 + $0x78] sm:$0xff]  }
 0x3cc   : > { %7103 = vmatpush3.bf16.msra.mxu1 %v7839_v17  ;;  %7084 = vmatprep.subr.bf16.mxu0 %v7842_v18  ;;  %v7869_v16 = vld [vmem:[#allocation13 + $0x10] sm:$0xff]   ;;  %v7870_v17 = vld [vmem:[#allocation13 + $0x18] sm:$0xff]   ;;  %v7871_v18 = vld [vmem:[#allocation13 + $0x20] sm:$0xff]  }
 0x3cd   : > { %7104 = vmatprep.subr.bf16.mxu1 %v7841_v19  ;;  %v7872_v19 = vld [vmem:[#allocation13 + $0x28] sm:$0xff]  }
 0x3cf   : > { %7085 = vmatpush3.bf16.msra.mxu0 %v7844_v20  ;;  %v7873_v20 = vld [vmem:[#allocation13 + $0x30] sm:$0xff]  }
 0x3d0   : > { %7105 = vmatpush3.bf16.msra.mxu1 %v7843_v22  ;;  %7086 = vmatprep.subr.bf16.mxu0 %v7846_v26  ;;  %v7874_v22 = vld [vmem:[#allocation13 + $0x38] sm:$0xff]  }
 0x3d1   : > { %7106 = vmatprep.subr.bf16.mxu1 %v7845_v28 }
 0x3d3   : > { %7087 = vmatpush3.bf16.msra.mxu0 %v7848_v29  ;;  %v7018_v29 = vld [vmem:[#allocation12] ss:$0 sm:$0xff] }
 0x3d4   : > { %7107 = vmatpush3.bf16.msra.mxu1 %v7847_v32  ;;  %7088 = vmatprep.subr.bf16.mxu0 %v7850_v33 }
 0x3d5   : > { %7108 = vmatprep.subr.bf16.mxu1 %v7849_v30 }
 0x3d7   : > { %7089 = vmatpush3.bf16.msra.mxu0 %v7852_v13 }
 0x3d8   : > { %7109 = vmatpush3.bf16.msra.mxu1 %v7851_v35  ;;  %7090 = vmatprep.subr.bf16.mxu0 %v7854_v36 }
 0x3d9   : > { %7110 = vmatprep.subr.bf16.mxu1 %v7853_v37 }
 0x3db   : > { %7091 = vmatpush3.bf16.msra.mxu0 %v7856_v39 }
 0x3dc   : > { %7111 = vmatpush3.bf16.msra.mxu1 %v7855_v38  ;;  %7092 = vmatprep.subr.bf16.mxu0 %v7858_v41 }
 0x3dd   : > { %7112 = vmatprep.subr.bf16.mxu1 %v7857_v40 }
 0x3df   : > { %7093 = vmatpush3.bf16.msra.mxu0 %v7860_v34 }
 0x3e0   : > { %7113 = vmatpush3.bf16.msra.mxu1 %v7859_v8  ;;  %7094 = vmatprep.subr.bf16.mxu0 %v7862_v23 }
 0x3e1   : > { %7114 = vmatprep.subr.bf16.mxu1 %v7861_v43 }
 0x3e3   : > { %7095 = vmatpush3.bf16.msra.mxu0 %v7864_v6 }
 0x3e4   : > { %7115 = vmatpush3.bf16.msra.mxu1 %v7863_v44  ;;  %7133 = vmatprep.subr.bf16.mxu0 %v8278_v24 }
 0x3e5   : > { %7116 = vmatprep.subr.bf16.mxu1 %v7865_v45  ;;  %v7051_v45 = vld [vmem:[#allocation15] ss:$0 sm:$0xff] }
 0x3e8   : > { %7117 = vmatpush3.bf16.msra.mxu1 %v7866_v42 }
 0x499   : > { %v5349_v25 = vpop.f32.mrb[8].mxu0 }
 0x49a   : > { %v7177_v50 = vadd.f32 %v5349_v25, %v3889_v48  ;;  %v5351_v21 = vpop.f32.mrb[9].mxu0 }
 0x49b   : > { %v7178_v27 = vadd.f32 %v5351_v21, %v3893_v10  ;;  %v5353_v31 = vpop.f32.mrb[10].mxu0 }
 0x49c   : > { %v7179_v52 = vadd.f32 %v5353_v31, %v3889_v48  ;;  %v5355_v0 = vpop.f32.mrb[11].mxu0  ;;  %v5530_v54 = vmax.f32 %v7177_v50, 0.0 }
 0x49d   : > { %v7180_v46 = vadd.f32 %v5355_v0, %v3893_v10  ;;  %v5531_v56 = vmax.f32 %v7178_v27, 0.0 }
 0x49e   : > { %v5534_v55 = vmax.f32 %v7179_v52, 0.0  ;;  %v5521_v7 = vpop.f32.mrb[16].mxu1 }
 0x49f   : > { %v5535_v57 = vmax.f32 %v7180_v46, 0.0  ;;  %v7181_v14 = vadd.f32 %v5521_v7, %v3897_v51  ;;  %v5523_v58 = vpop.f32.mrb[17].mxu1 }
 0x4a0   : > { %v5538_v59 = vpack.c.bf16 %v5534_v55, %v5530_v54  ;;  %v7182_v60 = vadd.f32 %v5523_v58, %v3901_v53  ;;  %v5525_v61 = vpop.f32.mrb[18].mxu1 }
 0x4a1   : > { %v5539_v62 = vpack.c.bf16 %v5535_v57, %v5531_v56  ;;  %v7183_v63 = vadd.f32 %v5525_v61, %v3897_v51  ;;  %v5527_v2 = vpop.f32.mrb[19].mxu1  ;;  %v5532_v4 = vmax.f32 %v7181_v14, 0.0 }
 0x4a2   : > { %v7184_v3 = vadd.f32 %v5527_v2, %v3901_v53  ;;  %v5533_v1 = vmax.f32 %v7182_v60, 0.0 }
 0x4a3   : > { %v5536_v5 = vmax.f32 %v7183_v63, 0.0  ;;  %5837 = vmatprep.mubr.bf16.mxu0 %v5539_v62 }
 0x4a4   : > { %v5537_v49 = vmax.f32 %v7184_v3, 0.0  ;;  %5838 = vmatmul.mubr.bf16.vlgmr.msra.gmra.mrb[12].mxu0 %v5538_v59 }
 0x4a5   : > { %v5540_v9 = vpack.c.bf16 %v5536_v5, %v5532_v4  ;;  %7134 = vmatpush3.bf16.msra.mxu0 %v7867_v15  ;;  %7149 = vmatprep.mubr.msk.bf16.mxu0 %vm8279_vm1, %v8278_v24 }
 0x4a6   : > { %v5541_v12 = vpack.c.bf16 %v5537_v49, %v5533_v1  ;;  %7135 = vmatprep.subr.bf16.mxu0 %v8278_v24 }
 0x4a8   : > { %5878 = vmatprep.mubr.bf16.mxu1 %v5541_v12 }
 0x4a9   : > { %5879 = vmatmul.mubr.bf16.vlgmr.msra.gmra.mrb[20].mxu1 %v5540_v9  ;;  %7136 = vmatpush3.bf16.msra.mxu0 %v7868_v11 }
 0x4aa   : > { %7137 = vmatprep.subr.bf16.mxu0 %v8278_v24 }
 0x4ad   : > { %7138 = vmatpush3.bf16.msra.mxu0 %v7869_v16 }
 0x4ae   : > { %7139 = vmatprep.subr.bf16.mxu0 %v8278_v24 }
 0x4b1   : > { %7140 = vmatpush3.bf16.msra.mxu0 %v7870_v17 }
 0x4b2   : > { %7141 = vmatprep.subr.bf16.mxu0 %v8278_v24 }
 0x4b5   : > { %7142 = vmatpush3.bf16.msra.mxu0 %v7871_v18 }
 0x4b6   : > { %7143 = vmatprep.subr.bf16.mxu0 %v8278_v24 }
 0x4b9   : > { %7144 = vmatpush3.bf16.msra.mxu0 %v7872_v19 }
 0x4ba   : > { %7145 = vmatprep.subr.bf16.mxu0 %v8278_v24 }
 0x4bd   : > { %7146 = vmatpush3.bf16.msra.mxu0 %v7873_v20 }
 0x4be   : > { %7147 = vmatprep.subr.bf16.mxu0 %v8278_v24 }
 0x4c1   : > { %7148 = vmatpush3.bf16.msra.mxu0 %v7874_v22 }
 0x577   : > { %v7096_v26 = vpop.f32.mrb[12].mxu0 }
 0x578   : > { %v7097_v28 = vpop.f32.mrb[13].mxu0 }
 0x579   : > { %v7098_v32 = vadd.f32 %v7097_v28, %v7096_v26  ;;  %v7099_v33 = vpop.f32.mrb[14].mxu0 }
 0x57a   : > { %v7100_v30 = vpop.f32.mrb[15].mxu0 }
 0x57b   : > { %v7101_v13 = vadd.f32 %v7100_v30, %v7099_v33  ;;  %v5840_v35 = vadd.f32 %v7098_v32, %v7018_v29 }
 0x57c   : > { %v7118_v36 = vpop.f32.mrb[20].mxu1 }
 0x57d   : > { %v7119_v37 = vpop.f32.mrb[21].mxu1  ;;  %v5843_v38 = vadd.f32 %v7101_v13, %v7018_v29 }
 0x57e   : > { %v7120_v39 = vadd.f32 %v7119_v37, %v7118_v36  ;;  %v7121_v40 = vpop.f32.mrb[22].mxu1 }
 0x57f   : > { %v7122_v41 = vpop.f32.mrb[23].mxu1 }
 0x580   : > { %v5881_v8 = vadd.f32 %v7120_v39, %v5840_v35  ;;  %v7123_v34 = vadd.f32 %v7122_v41, %v7121_v40 }
 0x582   : > { %v5884_v43 = vadd.f32 %v7123_v34, %v5843_v38  ;;  %v5887_v23 = vmax.f32 %v5881_v8, 0.0 }
 0x584   : > { %v5888_v44 = vmax.f32 %v5884_v43, 0.0 }
 0x586   : > { %v5889_v6 = vpack.c.bf16 %v5888_v44, %v5887_v23 }
 0x588   : > { %7150 = vmatmul.mubr.bf16.vlgmr.msra.gmra.mrb[16].mxu0 %v5889_v6 }
 0x65b   : > { %v5995_v42 = vpop.f32.mrb[16].mxu0 }
 0x65c   : > { %v5996_v24 = vadd.f32 %v7051_v45, %v5995_v42  ;;  %v7151_v47 = vpop.f32.mrb[17].mxu0 }
 0x65d   : > { %v5998_v48 = vpop.f32.mrb[18].mxu0 }
 0x65e   : > { %6002 = vmax.xlane.f32.xlu0 %v5996_v24  ;;  %v7152_v10 = vpop.f32.mrb[19].mxu0  ;;  %v5999_v25 = vadd.f32 %v7051_v45, %v5998_v48 }
 0x662   : > { %6004 = vmax.xlane.f32.xlu0 %v5999_v25 }
 0x6eb   : > { %v6003_v50 = vpop.xlane.xlu0 %6002 }
 0x6ec   : > { %v6006_v21 = vsub.f32 %v5996_v24, %v6003_v50 }
 0x6ee   : > { %v6008_v27 = vmul.f32 1.442695, %v6006_v21 }
 0x6ef   : > { %v6005_v31 = vpop.xlane.xlu0 %6004 }
 0x6f0   : > { %v6007_v51 = vsub.f32 %v5999_v25, %v6005_v31  ;;  %7875 = vpow2.f32 %v6008_v27 }
 0x6f2   : > { %v6010_v52 = vmul.f32 1.442695, %v6007_v51 }
 0x6f4   : > { %7877 = vpow2.f32 %v6010_v52 }
 0x6fa   : > { %v7876_v0 = vpop.eup %7875 }
 0x6fb   : > { %6012 = vadd.xlane.f32.xlu1 %v7876_v0 }
 0x6fe   : > { %v7878_v53 = vpop.eup %7877 }
 0x6ff   : > { %6014 = vadd.xlane.f32.xlu1 %v7878_v53 }
 0x788   : > { %v6013_v46 = vpop.xlane.xlu1 %6012 }
 0x789   : > { %7879 = vlog2.f32 %v6013_v46 }
 0x78c   : > { %v6015_v54 = vpop.xlane.xlu1 %6014 }
 0x78d   : > { %7881 = vlog2.f32 %v6015_v54 }
 0x793   : > { %v7880_v55 = vpop.eup %7879 }
 0x794   : > { %v6017_v7 = vmul.f32 0.6931472, %v7880_v55 }
 0x796   : > { %v6020_v56 = vsub.f32 %v6006_v21, %v6017_v7  ;;  %6031 = sbr.rel (!%p8852_p1) target bundleno = 1998 (0x7ce), region = 96 }
 0x797   : > { %v7882_v57 = vpop.eup %7881 }
 0x798   : > { %6023 = vst.msk [vmem:[%s8757_s21] sm:$0xff] %vm6022_vm2, %v6020_v56  ;;  %v6019_v14 = vmul.f32 0.6931472, %v7882_v57 }
 0x79a   : > { %v6021_v58 = vsub.f32 %v6007_v51, %v6019_v14 }
 0x79c   : > { %6024 = vst.msk [vmem:[%s8757_s21 + $0x8] sm:$0xff] %vm6022_vm2, %v6021_v58 }
 0x79d   : > { %s8863_s17 = smov (!%p6034_p4, %s6033_s17), 2 }
 0x79e   : > { %s7062_s20 = sshll.u32 %s8863_s17, 7 }
 0x79f   : > { %p7065_p8 = scmp.eq.s32.totalorder %s7062_s20, 0 }
 0x7a0   : > { %s8774_s16 = sshrl.u32 (!%p7065_p8), %s8863_s17, 1 }
 0x7a1   : > { %6042 = sbr.rel (%p7065_p8) target bundleno = 1998 (0x7ce), region = 100  ;;  %p7066_p11 = scmp.le.s32.totalorder (!%p7065_p8), %s8774_s16, 0 }
 0x7a8   : > { %6212 = sbr.rel (%p7066_p11) target bundleno = 1977 (0x7b9), region = 182  ;;  %s8228_s26 = smov (!%p7066_p11), %s8768_s13  }
 0x7a9   : > { %s8232_s15 = smov (!%p7066_p11), %s8757_s21   ;;  %s8236_s22 = smov (!%p7066_p11), 0  }
 0x7aa   : > { %s8240_s24 = smov (!%p7066_p11), 0  }
 0x7af LB: >> { %v6106_v59 = vld [vmem:[%s8234_s15] sm:$0xff]  ;;  %v6108_v60 = vld [vmem:[%s8234_s15 + $0x8] sm:$0xff]  ;;  %s6110_s29 = sadd.s32 1, %s8238_s22  ;;  %s6100_s24 = sadd.s32 1, %s8242_s24   ;;  %s8242_s24 = sphi %s8240_s24, %s6100_s24   ;;  %s8238_s22 = sphi %s8236_s22, %s8237_s22   ;;  %s8234_s15 = sphi %s8232_s15, %s6115_s15   ;;  %s8230_s26 = sphi %s8228_s26, %s6116_s26  }
 0x7b0   : >> { %6107 = vst [vmem:[%s8230_s26] sm:$0xff] %v6106_v59  ;;  %6109 = vst [vmem:[%s8230_s26 + $0x8] sm:$0xff] %v6108_v60  ;;  %p6111_p10 = scmp.ge.s32.totalorder %s6110_s29, %s8774_s16  ;;  %p6099_p2 = scmp.ge.s32.totalorder %s6100_s24, %s8774_s16 }
 0x7b2   : >> { %s8865_s29 = smov (%p6111_p10, %s6110_s29), 0  ;;  %6102 = sbr.rel (!%p6099_p2) target bundleno = 1967 (0x7af), region = 188 }
 0x7b3   : >> { %s7067_s18 = sshll.u32 %s8865_s29, 4  ;;  %s8237_s22 = smov %s8865_s29  }
 0x7b4   : >> { %s6115_s15 = scalar_lea.vmem %s8757_s21, %s7067_s18 [#allocation16]   ;;  %s6116_s26 = scalar_lea.vmem %s8768_s13, %s7067_s18  }
 0x7b9 PF: > { %s8784_s9 = sand.u32 1, %s8863_s17   ;;  %s7078_s14 = sshll.u32 %s8774_s16, 4 }
 0x7ba   : > { %s6121_s25 = scalar_lea.vmem %s8757_s21, %s7078_s14 [#allocation16]   ;;  %s6123_s19 = scalar_lea.vmem %s8768_s13, %s7078_s14  }
 0x7bb   : > { %p7072_p13 = scmp.le.s32.totalorder %s8784_s9, 0 }
 0x7bc   : > { %s8244_s27 = smov (!%p7072_p13), %s6123_s19   ;;  %s8248_s23 = smov (!%p7072_p13), %s6121_s25  }
 0x7bd   : > { %6226 = sbr.rel (%p7072_p13) target bundleno = 1998 (0x7ce), region = 193  ;;  %s8252_s28 = smov (!%p7072_p13), 0  }
 0x7be   : > { %s8256_s30 = smov (!%p7072_p13), 0  }
 0x7c4 LB: >> { %v6133_v61 = vld [vmem:[%s8250_s23] sm:$0xff]  ;;  %s6135_s17 = sadd.s32 1, %s8254_s28  ;;  %s6127_s30 = sadd.s32 1, %s8258_s30   ;;  %s8258_s30 = sphi %s8256_s30, %s6127_s30   ;;  %s8254_s28 = sphi %s8252_s28, %s8253_s28   ;;  %s8250_s23 = sphi %s8248_s23, %s6140_s23   ;;  %s8246_s27 = sphi %s8244_s27, %s6141_s27  }
 0x7c5   : >> { %6134 = vst [vmem:[%s8246_s27] sm:$0xff] %v6133_v61  ;;  %p6136_p3 = scmp.ge.s32.totalorder %s6135_s17, %s8784_s9  ;;  %p6126_p6 = scmp.ge.s32.totalorder %s6127_s30, %s8784_s9 }
 0x7c7   : >> { %s8867_s17 = smov (%p6136_p3, %s6135_s17), 0  ;;  %6129 = sbr.rel (!%p6126_p6) target bundleno = 1988 (0x7c4), region = 199 }
 0x7c8   : >> { %s7073_s21 = sshll.u32 %s8867_s17, 3  ;;  %s8253_s28 = smov %s8867_s17  }
 0x7c9   : >> { %s6140_s23 = scalar_lea.vmem %s6121_s25, %s7073_s21 [#allocation16]   ;;  %s6141_s27 = scalar_lea.vmem %s6123_s19, %s7073_s21  }
 0x7ce PF: > { %s8855_s12 = sld [smem:[#allocation23_spill]]  ;;  %s8856_s1 = sld [smem:[#allocation24_spill]] }
 0x7cf   : > { %s8857_s30 = smov %s8218_s10  ;;  %s8858_s10 = smov %s8222_s11 }
 0x7d4   : > { %p23_p7 = scmp.ge.s32.totalorder %s8855_s12, 5   ;;  %s8859_s11 = smov %s8856_s1 }
 0x7d6   :  { %25 = sbr.rel (!%p23_p7) target bundleno = 11 (0xb), region = 210 }
 0x7dd   :  { %6157 = vsyncpa [#allocation3], 1 }
 0x7de   :  { %6159 = vsyncpa [#allocation3 + $0x1], 1 }
 0x7df   :  { %6160 = vsyncpa [#allocation5], 1 }
 0x7e0   :  { %6161 = vsyncpa [#allocation8], 1 }
 0x7e1   :  { %6162 = vsyncpa [#allocation11], 1 }
 0x7e2   :  { %6163 = vsyncpa [#allocation14], 1 }

</bundles_post_ra>
